<compile_context>
chip_gen: v7x
topology: tpu7x:2x2x1
jax: 0.10.0
libtpu: 0.0.40
codegen_flags: <defaults>
</compile_context>

<pallas_src>
import functools

import jax
import jax.numpy as jnp
from jax import lax
from jax.experimental import pallas as pl
from jax.experimental.pallas import tpu as pltpu

LN_EPS = 1e-5
NEG_INF = -1e9


def _layer_norm(x, gamma, beta):
    mu = jnp.mean(x, axis=-1, keepdims=True)
    var = jnp.mean((x - mu) ** 2, axis=-1, keepdims=True)
    return (x - mu) * lax.rsqrt(var + LN_EPS) * gamma + beta


def _kernel(struct_ref, extra_ref, bias_ref,
            wqkv_ref, ln_g_ref, ln_b_ref,
            w1t_ref, b1_ref, w2t_ref, b2_ref, prelu_ref,
            out_ref, mha_ref, *, n_heads):
    # All vector refs are 2-D slabs; R = Bb * T rows.
    x0 = struct_ref[...]                                   # [R, H] (residual input)
    x = x0 + extra_ref[...]                                # + (clust + bidir + pos_emb)
    gamma = ln_g_ref[...]
    beta = ln_b_ref[...]
    xn = _layer_norm(x, gamma, beta)

    # Fused QKV projection: one [R,H] x [H,3H] matmul (softmax scale pre-folded
    # into the Q columns of wqkv, so no per-score-tile multiply below).
    qkv = jnp.dot(xn, wqkv_ref[...], preferred_element_type=jnp.float32)
    H = qkv.shape[1] // 3
    dh = H // n_heads

    q = qkv[:, :H]
    k = qkv[:, H:2 * H]
    v = qkv[:, 2 * H:]

    # Precomputed additive block-diagonal causal bias (0 / -1e9), shape [R, R].
    bias = bias_ref[...]

    dn = (((1,), (1,)), ((), ()))            # contract last dims, no batch dims
    for h in range(n_heads):                 # static unroll, n_heads small
        qh = q[:, h * dh:(h + 1) * dh]
        kh = k[:, h * dh:(h + 1) * dh]
        vh = v[:, h * dh:(h + 1) * dh]
        s = lax.dot_general(qh, kh, dn,
                            preferred_element_type=jnp.float32) + bias
        m = jnp.max(s, axis=-1, keepdims=True)
        p = jnp.exp(s - m)
        l = jnp.sum(p, axis=-1, keepdims=True)
        # attention_dropout: identity in eval mode.
        o_h = jnp.dot(p, vh, preferred_element_type=jnp.float32)
        # Normalise AFTER PV: rescale the narrow [R, dh] head output, not the
        # [R, R] probability tile.  Exact reciprocal keeps 1e-4 parity.
        mha_ref[:, h * dh:(h + 1) * dh] = o_h * pl.reciprocal(l)

    mha = mha_ref[...]                                     # [R, H]
    y = _layer_norm(mha + x0, gamma, beta)                 # shared LN params

    # feed_forward: Linear(H,H) -> PReLU -> Linear(H,2)  (weights pre-transposed)
    h1 = jnp.dot(y, w1t_ref[...], preferred_element_type=jnp.float32) + b1_ref[...]
    a = prelu_ref[0]                                       # SMEM scalar
    h1 = jnp.where(h1 > 0, h1, a * h1)
    out = jnp.dot(h1, w2t_ref[...], preferred_element_type=jnp.float32) + b2_ref[...]
    out_ref[...] = out                                     # one [R, 2] store


def prepare_params(params, *, n_heads, seq_len, block_b):
    """One-time (init-time) parameter preparation — NOT per forward call."""
    H = params["Qw"].shape[0]
    assert H % n_heads == 0, "hidden_dim must be divisible by n_heads"
    assert params["pos_emb"].shape[0] == seq_len
    dh = H // n_heads
    scale = jnp.float32(1.0 / (dh ** 0.5))

    # Fused Q|K|V with the softmax scale folded into the Q columns.
    wqkv = jnp.concatenate(
        [params["Qw"] * scale, params["Kw"], params["Vw"]], axis=1)   # (H, 3H)

    # Additive block-diagonal causal mask over the flattened (Bb*T) rows:
    # a row only attends to earlier rows of the SAME sample.
    R = block_b * seq_len
    row = jnp.arange(R, dtype=jnp.int32)
    same = (row[:, None] // seq_len) == (row[None, :] // seq_len)
    causal = row[None, :] <= row[:, None]
    bias = jnp.where(same & causal, 0.0, NEG_INF).astype(jnp.float32)  # (R, R)

    return {
        "wqkv": wqkv,
        "bias": bias,
        "ln_g": params["ln_g"],
        "ln_b": params["ln_b"],
        "w1t": params["W1"].T,                 # (H, H)
        "b1": params["b1"],
        "w2t": params["W2"].T,                 # (H, 2)
        "b2": params["b2"],
        "prelu_a": params["prelu_a"].reshape(1).astype(jnp.float32),
        "pos_emb": params["pos_emb"],          # (T, H)
        "block_b": block_b,
        "seq_len": seq_len,
        "n_heads": n_heads,
        "hidden": H,
    }


def graph_temporal_layer(structural, pos_clust, pos_bidir, exist_nodes, prep):
    # exist_nodes accepted for API parity with the PyTorch module but unused
    # (it is unused in the attention branch of the reference forward as well).
    del exist_nodes
    B, T, H = structural.shape
    assert T == prep["seq_len"] and H == prep["hidden"]

    Bb = prep["block_b"]
    Bp = ((B + Bb - 1) // Bb) * Bb
    pad = Bp - B

    # Fold pos_emb into the (clust + bidir) stream -> one fewer kernel input.
    extra = pos_clust + pos_bidir + prep["pos_emb"][None]

    def flat(x):
        if pad:
            x = jnp.pad(x, ((0, pad), (0, 0), (0, 0)))
        return x.reshape(Bp * T, H)

    s2 = flat(structural)
    e2 = flat(extra)

    R = Bb * T
    seq_spec = pl.BlockSpec((R, H), lambda b: (b, 0))
    const = lambda shape: pl.BlockSpec(shape, lambda b: (0, 0))

    kernel = functools.partial(_kernel, n_heads=prep["n_heads"])

    out = pl.pallas_call(
        kernel,
        out_shape=jax.ShapeDtypeStruct((Bp * T, 2), jnp.float32),
        grid_spec=pltpu.PrefetchScalarGridSpec(
            num_scalar_prefetch=0,
            grid=(Bp // Bb,),
            in_specs=[
                seq_spec,                  # structural (flattened)
                seq_spec,                  # clust + bidir + pos_emb (flattened)
                const((R, R)),             # additive causal/block-diag bias
                const((H, 3 * H)),         # fused scaled-Q | K | V weights
                const((1, H)),             # layer_norm gamma (shared)
                const((1, H)),             # layer_norm beta  (shared)
                const((H, H)),             # feedforward_linear_1.weight^T
                const((1, H)),             # feedforward_linear_1.bias
                const((H, 2)),             # feedforward_linear_2.weight^T
                const((1, 2)),             # feedforward_linear_2.bias
                pl.BlockSpec(memory_space=pltpu.MemorySpace.SMEM),  # PReLU alpha
            ],
            out_specs=pl.BlockSpec((R, 2), lambda b: (b, 0)),
            scratch_shapes=[pltpu.VMEM((R, H), jnp.float32)],   # per-head mha acc
        ),
        compiler_params=pltpu.CompilerParams(
            dimension_semantics=("parallel",)),
    )(s2, e2, prep["bias"], prep["wqkv"], prep["ln_g"], prep["ln_b"],
      prep["w1t"], prep["b1"], prep["w2t"], prep["b2"], prep["prelu_a"])

    return out.reshape(Bp, T, 2)[:B]


def reference_jax(structural, pos_clust, pos_bidir, params, *, n_heads):
    B, T, H = structural.shape
    dh = H // n_heads
    x = structural + params["pos_emb"][None] + pos_clust + pos_bidir
    g, b = params["ln_g"][0], params["ln_b"][0]

    def ln(z):
        mu = jnp.mean(z, -1, keepdims=True)
        var = jnp.mean((z - mu) ** 2, -1, keepdims=True)
        return (z - mu) / jnp.sqrt(var + LN_EPS) * g + b

    xn = ln(x)
    q = jnp.einsum("bth,hd->btd", xn, params["Qw"])
    k = jnp.einsum("bth,hd->btd", xn, params["Kw"])
    v = jnp.einsum("bth,hd->btd", xn, params["Vw"])
    qh = q.reshape(B, T, n_heads, dh).transpose(0, 2, 1, 3)
    kh = k.reshape(B, T, n_heads, dh).transpose(0, 2, 1, 3)
    vh = v.reshape(B, T, n_heads, dh).transpose(0, 2, 1, 3)
    s = jnp.einsum("bhqd,bhkd->bhqk", qh, kh) / (dh ** 0.5)
    mask = jnp.tril(jnp.ones((T, T), bool))
    s = jnp.where(mask[None, None], s, NEG_INF)
    p = jax.nn.softmax(s, -1)
    o = jnp.einsum("bhqk,bhkd->bhqd", p, vh).transpose(0, 2, 1, 3).reshape(B, T, H)
    y = ln(o + structural)
    h1 = y @ params["W1"].T + params["b1"][0]
    a = params["prelu_a"][0, 0]
    h1 = jnp.where(h1 > 0, h1, a * h1)
    return h1 @ params["W2"].T + params["b2"][0]


# TODO(synk): GRU / LSTM temporal_module_type branches (recurrent scans) and the
# python-side all_attention_weights / all_node_features logging lists are not
# implemented as Pallas kernels; only the attention branch is covered.

if __name__ == "__main__":
    # B=32, T=8, H=32, block_b=16 -> R=128 rows/step, grid of 2 blocks
    # (multiple of 2 so both v7x TensorCores get a "parallel" block each).
    B, T, H, n_heads = 32, 8, 32, 4

    key = jax.random.PRNGKey(0)
    ks = jax.random.split(key, 12)
    params = {
        "Qw": 0.1 * jax.random.normal(ks[0], (H, H), jnp.float32),
        "Kw": 0.1 * jax.random.normal(ks[1], (H, H), jnp.float32),
        "Vw": 0.1 * jax.random.normal(ks[2], (H, H), jnp.float32),
        "ln_g": jnp.ones((1, H), jnp.float32),
        "ln_b": jnp.zeros((1, H), jnp.float32),
        "W1": 0.1 * jax.random.normal(ks[3], (H, H), jnp.float32),
        "b1": jnp.zeros((1, H), jnp.float32),
        "prelu_a": jnp.full((1, 1), 0.25, jnp.float32),
        "W2": 0.1 * jax.random.normal(ks[4], (2, H), jnp.float32),
        "b2": jnp.zeros((1, 2), jnp.float32),
        "pos_emb": 0.1 * jax.random.normal(ks[5], (T, H), jnp.float32),
    }

    structural = jax.random.normal(ks[6], (B, T, H), jnp.float32)
    pos_clust = 0.1 * jax.random.normal(ks[7], (B, T, H), jnp.float32)
    pos_bidir = 0.1 * jax.random.normal(ks[8], (B, T, H), jnp.float32)
    exist_nodes = jnp.ones((B, T), jnp.float32)   # unused (matches reference)

    # One-time parameter prep (hoisted out of the per-call wrapper).
    prep = prepare_params(params, n_heads=n_heads, seq_len=T, block_b=16)
    prep = jax.tree_util.tree_map(
        lambda x: jax.block_until_ready(x) if isinstance(x, jax.Array) else x, prep)

    out = graph_temporal_layer(structural, pos_clust, pos_bidir, exist_nodes, prep)
    jax.block_until_ready(out)

    ref = reference_jax(structural, pos_clust, pos_bidir, params, n_heads=n_heads)
    assert out.shape == (B, T, 2), out.shape
    err = float(jnp.max(jnp.abs(out - ref)))
    assert jnp.allclose(out, ref, rtol=1e-4, atol=1e-4), err

    print("KERNEL_OK")
</pallas_src>

<mosaic_0001>
module attributes {stable_mosaic.version = 11 : i64} {
  func.func @_kernel(%arg0: i32, %arg1: memref<128x32xf32, #tpu.memory_space<vmem>>, %arg2: memref<128x32xf32, #tpu.memory_space<vmem>>, %arg3: memref<128x128xf32, #tpu.memory_space<vmem>>, %arg4: memref<32x96xf32, #tpu.memory_space<vmem>>, %arg5: memref<1x32xf32, #tpu.memory_space<vmem>>, %arg6: memref<1x32xf32, #tpu.memory_space<vmem>>, %arg7: memref<32x32xf32, #tpu.memory_space<vmem>>, %arg8: memref<1x32xf32, #tpu.memory_space<vmem>>, %arg9: memref<32x2xf32, #tpu.memory_space<vmem>>, %arg10: memref<1x2xf32, #tpu.memory_space<vmem>>, %arg11: memref<1xf32, #tpu.memory_space<smem>>, %arg12: memref<128x2xf32, #tpu.memory_space<vmem>>, %arg13: memref<128x32xf32, #tpu.memory_space<vmem>>) attributes {dimension_semantics = [#tpu.dimension_semantics<parallel>], iteration_bounds = array<i64: 2>, scalar_prefetch = 0 : i64, scratch_operands = 1 : i64, tpu.core_type = #tpu.core_type<tc>, window_params = [{transform_indices = @transform_0, window_bounds = array<i64: 128, 32>}, {transform_indices = @transform_1, window_bounds = array<i64: 128, 32>}, {pipeline_mode = #tpu.pipeline_mode<synchronous>, transform_indices = @transform_2, window_bounds = array<i64: 128, 128>}, {pipeline_mode = #tpu.pipeline_mode<synchronous>, transform_indices = @transform_3, window_bounds = array<i64: 32, 96>}, {pipeline_mode = #tpu.pipeline_mode<synchronous>, transform_indices = @transform_4, window_bounds = array<i64: 1, 32>}, {pipeline_mode = #tpu.pipeline_mode<synchronous>, transform_indices = @transform_5, window_bounds = array<i64: 1, 32>}, {pipeline_mode = #tpu.pipeline_mode<synchronous>, transform_indices = @transform_6, window_bounds = array<i64: 32, 32>}, {pipeline_mode = #tpu.pipeline_mode<synchronous>, transform_indices = @transform_7, window_bounds = array<i64: 1, 32>}, {pipeline_mode = #tpu.pipeline_mode<synchronous>, transform_indices = @transform_8, window_bounds = array<i64: 32, 2>}, {pipeline_mode = #tpu.pipeline_mode<synchronous>, transform_indices = @transform_9, window_bounds = array<i64: 1, 2>}, {transform_indices = @transform_10, window_bounds = array<i64: 1>}, {transform_indices = @transform_11, window_bounds = array<i64: 128, 2>}]} {
    %c0 = arith.constant 0 : index
    %c0_0 = arith.constant 0 : index
    %0 = vector.load %arg1[%c0, %c0_0] : memref<128x32xf32, #tpu.memory_space<vmem>>, vector<128x32xf32>
    %c0_1 = arith.constant 0 : index
    %c0_2 = arith.constant 0 : index
    %1 = vector.load %arg2[%c0_1, %c0_2] : memref<128x32xf32, #tpu.memory_space<vmem>>, vector<128x32xf32>
    %2 = arith.addf %0, %1 : vector<128x32xf32>
    %c0_3 = arith.constant 0 : index
    %c0_4 = arith.constant 0 : index
    %3 = vector.load %arg5[%c0_3, %c0_4] : memref<1x32xf32, #tpu.memory_space<vmem>>, vector<1x32xf32>
    %c0_5 = arith.constant 0 : index
    %c0_6 = arith.constant 0 : index
    %4 = vector.load %arg6[%c0_5, %c0_6] : memref<1x32xf32, #tpu.memory_space<vmem>>, vector<1x32xf32>
    %cst = arith.constant dense<0.000000e+00> : vector<128xf32>
    %5 = vector.multi_reduction <add>, %2, %cst [1] : vector<128x32xf32> to vector<128xf32>
    %6 = vector.shape_cast %5 : vector<128xf32> to vector<128x1xf32>
    %cst_7 = arith.constant 3.200000e+01 : f32
    %7 = vector.broadcast %cst_7 : f32 to vector<128x1xf32>
    %8 = arith.divf %6, %7 : vector<128x1xf32>
    %9 = vector.broadcast %8 : vector<128x1xf32> to vector<128x32xf32>
    %10 = arith.subf %2, %9 : vector<128x32xf32>
    %11 = arith.mulf %10, %10 : vector<128x32xf32>
    %cst_8 = arith.constant dense<0.000000e+00> : vector<128xf32>
    %12 = vector.multi_reduction <add>, %11, %cst_8 [1] : vector<128x32xf32> to vector<128xf32>
    %13 = vector.shape_cast %12 : vector<128xf32> to vector<128x1xf32>
    %cst_9 = arith.constant 3.200000e+01 : f32
    %14 = vector.broadcast %cst_9 : f32 to vector<128x1xf32>
    %15 = arith.divf %13, %14 : vector<128x1xf32>
    %16 = vector.broadcast %8 : vector<128x1xf32> to vector<128x32xf32>
    %17 = arith.subf %2, %16 : vector<128x32xf32>
    %cst_10 = arith.constant 9.99999974E-6 : f32
    %18 = vector.broadcast %cst_10 : f32 to vector<128x1xf32>
    %19 = arith.addf %15, %18 : vector<128x1xf32>
    %20 = math.rsqrt %19 : vector<128x1xf32>
    %21 = vector.broadcast %20 : vector<128x1xf32> to vector<128x32xf32>
    %22 = arith.mulf %17, %21 : vector<128x32xf32>
    %23 = vector.broadcast %3 : vector<1x32xf32> to vector<128x32xf32>
    %24 = arith.mulf %22, %23 : vector<128x32xf32>
    %25 = vector.broadcast %4 : vector<1x32xf32> to vector<128x32xf32>
    %26 = arith.addf %24, %25 : vector<128x32xf32>
    %c0_11 = arith.constant 0 : index
    %c0_12 = arith.constant 0 : index
    %27 = vector.load %arg4[%c0_11, %c0_12] : memref<32x96xf32, #tpu.memory_space<vmem>>, vector<32x96xf32>
    %cst_13 = arith.constant dense<0.000000e+00> : vector<128x96xf32>
    %28 = tpu.matmul %26, %27, %cst_13 {dimension_numbers = #tpu.dot_dimension_numbers<[1], [0], [0], [1], [0, 0, 1, 1], [], []>} : vector<128x32xf32>, vector<32x96xf32>, vector<128x96xf32> -> vector<128x96xf32>
    %29 = vector.extract_strided_slice %28 {offsets = [0, 0], sizes = [128, 32], strides = [1, 1]} : vector<128x96xf32> to vector<128x32xf32>
    %30 = vector.extract_strided_slice %28 {offsets = [0, 32], sizes = [128, 32], strides = [1, 1]} : vector<128x96xf32> to vector<128x32xf32>
    %31 = vector.extract_strided_slice %28 {offsets = [0, 64], sizes = [128, 32], strides = [1, 1]} : vector<128x96xf32> to vector<128x32xf32>
    %c0_14 = arith.constant 0 : index
    %c0_15 = arith.constant 0 : index
    %32 = vector.load %arg3[%c0_14, %c0_15] : memref<128x128xf32, #tpu.memory_space<vmem>>, vector<128x128xf32>
    %33 = vector.extract_strided_slice %29 {offsets = [0, 0], sizes = [128, 8], strides = [1, 1]} : vector<128x32xf32> to vector<128x8xf32>
    %34 = vector.extract_strided_slice %30 {offsets = [0, 0], sizes = [128, 8], strides = [1, 1]} : vector<128x32xf32> to vector<128x8xf32>
    %35 = vector.extract_strided_slice %31 {offsets = [0, 0], sizes = [128, 8], strides = [1, 1]} : vector<128x32xf32> to vector<128x8xf32>
    %cst_16 = arith.constant dense<0.000000e+00> : vector<128x128xf32>
    %36 = tpu.matmul %33, %34, %cst_16 {dimension_numbers = #tpu.dot_dimension_numbers<[1], [1], [0], [0], [0, 0, 1, 0], [], []>} : vector<128x8xf32>, vector<128x8xf32>, vector<128x128xf32> -> vector<128x128xf32>
    %37 = arith.addf %36, %32 : vector<128x128xf32>
    %cst_17 = arith.constant dense<0xFF800000> : vector<128xf32>
    %38 = vector.multi_reduction <maximumf>, %37, %cst_17 [1] : vector<128x128xf32> to vector<128xf32>
    %39 = vector.shape_cast %38 : vector<128xf32> to vector<128x1xf32>
    %40 = vector.broadcast %39 : vector<128x1xf32> to vector<128x128xf32>
    %41 = arith.subf %37, %40 : vector<128x128xf32>
    %42 = math.exp %41 : vector<128x128xf32>
    %cst_18 = arith.constant dense<0.000000e+00> : vector<128xf32>
    %43 = vector.multi_reduction <add>, %42, %cst_18 [1] : vector<128x128xf32> to vector<128xf32>
    %44 = vector.shape_cast %43 : vector<128xf32> to vector<128x1xf32>
    %cst_19 = arith.constant dense<0.000000e+00> : vector<128x8xf32>
    %45 = tpu.matmul %42, %35, %cst_19 {dimension_numbers = #tpu.dot_dimension_numbers<[1], [0], [0], [1], [0, 0, 1, 1], [], []>} : vector<128x128xf32>, vector<128x8xf32>, vector<128x8xf32> -> vector<128x8xf32>
    %46 = tpu.reciprocal %44 : vector<128x1xf32> -> vector<128x1xf32>
    %47 = vector.broadcast %46 : vector<128x1xf32> to vector<128x8xf32>
    %48 = arith.mulf %45, %47 : vector<128x8xf32>
    %c0_20 = arith.constant 0 : index
    %c0_21 = arith.constant 0 : index
    %49 = vector.load %arg13[%c0_20, %c0_21] : memref<128x32xf32, #tpu.memory_space<vmem>>, vector<128x8xf32>
    tpu.vector_store %arg13[%c0_20, %c0_21], %48 {strides = array<i32>} : memref<128x32xf32, #tpu.memory_space<vmem>>, vector<128x8xf32>,
    %50 = vector.extract_strided_slice %29 {offsets = [0, 8], sizes = [128, 8], strides = [1, 1]} : vector<128x32xf32> to vector<128x8xf32>
    %51 = vector.extract_strided_slice %30 {offsets = [0, 8], sizes = [128, 8], strides = [1, 1]} : vector<128x32xf32> to vector<128x8xf32>
    %52 = vector.extract_strided_slice %31 {offsets = [0, 8], sizes = [128, 8], strides = [1, 1]} : vector<128x32xf32> to vector<128x8xf32>
    %cst_22 = arith.constant dense<0.000000e+00> : vector<128x128xf32>
    %53 = tpu.matmul %50, %51, %cst_22 {dimension_numbers = #tpu.dot_dimension_numbers<[1], [1], [0], [0], [0, 0, 1, 0], [], []>} : vector<128x8xf32>, vector<128x8xf32>, vector<128x128xf32> -> vector<128x128xf32>
    %54 = arith.addf %53, %32 : vector<128x128xf32>
    %cst_23 = arith.constant dense<0xFF800000> : vector<128xf32>
    %55 = vector.multi_reduction <maximumf>, %54, %cst_23 [1] : vector<128x128xf32> to vector<128xf32>
    %56 = vector.shape_cast %55 : vector<128xf32> to vector<128x1xf32>
    %57 = vector.broadcast %56 : vector<128x1xf32> to vector<128x128xf32>
    %58 = arith.subf %54, %57 : vector<128x128xf32>
    %59 = math.exp %58 : vector<128x128xf32>
    %cst_24 = arith.constant dense<0.000000e+00> : vector<128xf32>
    %60 = vector.multi_reduction <add>, %59, %cst_24 [1] : vector<128x128xf32> to vector<128xf32>
    %61 = vector.shape_cast %60 : vector<128xf32> to vector<128x1xf32>
    %cst_25 = arith.constant dense<0.000000e+00> : vector<128x8xf32>
    %62 = tpu.matmul %59, %52, %cst_25 {dimension_numbers = #tpu.dot_dimension_numbers<[1], [0], [0], [1], [0, 0, 1, 1], [], []>} : vector<128x128xf32>, vector<128x8xf32>, vector<128x8xf32> -> vector<128x8xf32>
    %63 = tpu.reciprocal %61 : vector<128x1xf32> -> vector<128x1xf32>
    %64 = vector.broadcast %63 : vector<128x1xf32> to vector<128x8xf32>
    %65 = arith.mulf %62, %64 : vector<128x8xf32>
    %c0_26 = arith.constant 0 : index
    %c8 = arith.constant 8 : index
    %66 = vector.load %arg13[%c0_26, %c8] : memref<128x32xf32, #tpu.memory_space<vmem>>, vector<128x8xf32>
    tpu.vector_store %arg13[%c0_26, %c8], %65 {strides = array<i32>} : memref<128x32xf32, #tpu.memory_space<vmem>>, vector<128x8xf32>,
    %67 = vector.extract_strided_slice %29 {offsets = [0, 16], sizes = [128, 8], strides = [1, 1]} : vector<128x32xf32> to vector<128x8xf32>
    %68 = vector.extract_strided_slice %30 {offsets = [0, 16], sizes = [128, 8], strides = [1, 1]} : vector<128x32xf32> to vector<128x8xf32>
    %69 = vector.extract_strided_slice %31 {offsets = [0, 16], sizes = [128, 8], strides = [1, 1]} : vector<128x32xf32> to vector<128x8xf32>
    %cst_27 = arith.constant dense<0.000000e+00> : vector<128x128xf32>
    %70 = tpu.matmul %67, %68, %cst_27 {dimension_numbers = #tpu.dot_dimension_numbers<[1], [1], [0], [0], [0, 0, 1, 0], [], []>} : vector<128x8xf32>, vector<128x8xf32>, vector<128x128xf32> -> vector<128x128xf32>
    %71 = arith.addf %70, %32 : vector<128x128xf32>
    %cst_28 = arith.constant dense<0xFF800000> : vector<128xf32>
    %72 = vector.multi_reduction <maximumf>, %71, %cst_28 [1] : vector<128x128xf32> to vector<128xf32>
    %73 = vector.shape_cast %72 : vector<128xf32> to vector<128x1xf32>
    %74 = vector.broadcast %73 : vector<128x1xf32> to vector<128x128xf32>
    %75 = arith.subf %71, %74 : vector<128x128xf32>
    %76 = math.exp %75 : vector<128x128xf32>
    %cst_29 = arith.constant dense<0.000000e+00> : vector<128xf32>
    %77 = vector.multi_reduction <add>, %76, %cst_29 [1] : vector<128x128xf32> to vector<128xf32>
    %78 = vector.shape_cast %77 : vector<128xf32> to vector<128x1xf32>
    %cst_30 = arith.constant dense<0.000000e+00> : vector<128x8xf32>
    %79 = tpu.matmul %76, %69, %cst_30 {dimension_numbers = #tpu.dot_dimension_numbers<[1], [0], [0], [1], [0, 0, 1, 1], [], []>} : vector<128x128xf32>, vector<128x8xf32>, vector<128x8xf32> -> vector<128x8xf32>
    %80 = tpu.reciprocal %78 : vector<128x1xf32> -> vector<128x1xf32>
    %81 = vector.broadcast %80 : vector<128x1xf32> to vector<128x8xf32>
    %82 = arith.mulf %79, %81 : vector<128x8xf32>
    %c0_31 = arith.constant 0 : index
    %c16 = arith.constant 16 : index
    %83 = vector.load %arg13[%c0_31, %c16] : memref<128x32xf32, #tpu.memory_space<vmem>>, vector<128x8xf32>
    tpu.vector_store %arg13[%c0_31, %c16], %82 {strides = array<i32>} : memref<128x32xf32, #tpu.memory_space<vmem>>, vector<128x8xf32>,
    %84 = vector.extract_strided_slice %29 {offsets = [0, 24], sizes = [128, 8], strides = [1, 1]} : vector<128x32xf32> to vector<128x8xf32>
    %85 = vector.extract_strided_slice %30 {offsets = [0, 24], sizes = [128, 8], strides = [1, 1]} : vector<128x32xf32> to vector<128x8xf32>
    %86 = vector.extract_strided_slice %31 {offsets = [0, 24], sizes = [128, 8], strides = [1, 1]} : vector<128x32xf32> to vector<128x8xf32>
    %cst_32 = arith.constant dense<0.000000e+00> : vector<128x128xf32>
    %87 = tpu.matmul %84, %85, %cst_32 {dimension_numbers = #tpu.dot_dimension_numbers<[1], [1], [0], [0], [0, 0, 1, 0], [], []>} : vector<128x8xf32>, vector<128x8xf32>, vector<128x128xf32> -> vector<128x128xf32>
    %88 = arith.addf %87, %32 : vector<128x128xf32>
    %cst_33 = arith.constant dense<0xFF800000> : vector<128xf32>
    %89 = vector.multi_reduction <maximumf>, %88, %cst_33 [1] : vector<128x128xf32> to vector<128xf32>
    %90 = vector.shape_cast %89 : vector<128xf32> to vector<128x1xf32>
    %91 = vector.broadcast %90 : vector<128x1xf32> to vector<128x128xf32>
    %92 = arith.subf %88, %91 : vector<128x128xf32>
    %93 = math.exp %92 : vector<128x128xf32>
    %cst_34 = arith.constant dense<0.000000e+00> : vector<128xf32>
    %94 = vector.multi_reduction <add>, %93, %cst_34 [1] : vector<128x128xf32> to vector<128xf32>
    %95 = vector.shape_cast %94 : vector<128xf32> to vector<128x1xf32>
    %cst_35 = arith.constant dense<0.000000e+00> : vector<128x8xf32>
    %96 = tpu.matmul %93, %86, %cst_35 {dimension_numbers = #tpu.dot_dimension_numbers<[1], [0], [0], [1], [0, 0, 1, 1], [], []>} : vector<128x128xf32>, vector<128x8xf32>, vector<128x8xf32> -> vector<128x8xf32>
    %97 = tpu.reciprocal %95 : vector<128x1xf32> -> vector<128x1xf32>
    %98 = vector.broadcast %97 : vector<128x1xf32> to vector<128x8xf32>
    %99 = arith.mulf %96, %98 : vector<128x8xf32>
    %c0_36 = arith.constant 0 : index
    %c24 = arith.constant 24 : index
    %100 = vector.load %arg13[%c0_36, %c24] : memref<128x32xf32, #tpu.memory_space<vmem>>, vector<128x8xf32>
    tpu.vector_store %arg13[%c0_36, %c24], %99 {strides = array<i32>} : memref<128x32xf32, #tpu.memory_space<vmem>>, vector<128x8xf32>,
    %c0_37 = arith.constant 0 : index
    %c0_38 = arith.constant 0 : index
    %101 = vector.load %arg13[%c0_37, %c0_38] : memref<128x32xf32, #tpu.memory_space<vmem>>, vector<128x32xf32>
    %102 = arith.addf %101, %0 : vector<128x32xf32>
    %cst_39 = arith.constant dense<0.000000e+00> : vector<128xf32>
    %103 = vector.multi_reduction <add>, %102, %cst_39 [1] : vector<128x32xf32> to vector<128xf32>
    %104 = vector.shape_cast %103 : vector<128xf32> to vector<128x1xf32>
    %cst_40 = arith.constant 3.200000e+01 : f32
    %105 = vector.broadcast %cst_40 : f32 to vector<128x1xf32>
    %106 = arith.divf %104, %105 : vector<128x1xf32>
    %107 = vector.broadcast %106 : vector<128x1xf32> to vector<128x32xf32>
    %108 = arith.subf %102, %107 : vector<128x32xf32>
    %109 = arith.mulf %108, %108 : vector<128x32xf32>
    %cst_41 = arith.constant dense<0.000000e+00> : vector<128xf32>
    %110 = vector.multi_reduction <add>, %109, %cst_41 [1] : vector<128x32xf32> to vector<128xf32>
    %111 = vector.shape_cast %110 : vector<128xf32> to vector<128x1xf32>
    %cst_42 = arith.constant 3.200000e+01 : f32
    %112 = vector.broadcast %cst_42 : f32 to vector<128x1xf32>
    %113 = arith.divf %111, %112 : vector<128x1xf32>
    %114 = vector.broadcast %106 : vector<128x1xf32> to vector<128x32xf32>
    %115 = arith.subf %102, %114 : vector<128x32xf32>
    %cst_43 = arith.constant 9.99999974E-6 : f32
    %116 = vector.broadcast %cst_43 : f32 to vector<128x1xf32>
    %117 = arith.addf %113, %116 : vector<128x1xf32>
    %118 = math.rsqrt %117 : vector<128x1xf32>
    %119 = vector.broadcast %118 : vector<128x1xf32> to vector<128x32xf32>
    %120 = arith.mulf %115, %119 : vector<128x32xf32>
    %121 = vector.broadcast %3 : vector<1x32xf32> to vector<128x32xf32>
    %122 = arith.mulf %120, %121 : vector<128x32xf32>
    %123 = vector.broadcast %4 : vector<1x32xf32> to vector<128x32xf32>
    %124 = arith.addf %122, %123 : vector<128x32xf32>
    %c0_44 = arith.constant 0 : index
    %c0_45 = arith.constant 0 : index
    %125 = vector.load %arg7[%c0_44, %c0_45] : memref<32x32xf32, #tpu.memory_space<vmem>>, vector<32x32xf32>
    %cst_46 = arith.constant dense<0.000000e+00> : vector<128x32xf32>
    %126 = tpu.matmul %124, %125, %cst_46 {dimension_numbers = #tpu.dot_dimension_numbers<[1], [0], [0], [1], [0, 0, 1, 1], [], []>} : vector<128x32xf32>, vector<32x32xf32>, vector<128x32xf32> -> vector<128x32xf32>
    %c0_47 = arith.constant 0 : index
    %c0_48 = arith.constant 0 : index
    %127 = vector.load %arg8[%c0_47, %c0_48] : memref<1x32xf32, #tpu.memory_space<vmem>>, vector<1x32xf32>
    %128 = vector.broadcast %127 : vector<1x32xf32> to vector<128x32xf32>
    %129 = arith.addf %126, %128 : vector<128x32xf32>
    %c0_49 = arith.constant 0 : index
    %130 = memref.load %arg11[%c0_49] : memref<1xf32, #tpu.memory_space<smem>>
    %cst_50 = arith.constant 0.000000e+00 : f32
    %131 = vector.broadcast %cst_50 : f32 to vector<128x32xf32>
    %132 = arith.cmpf ogt, %129, %131 : vector<128x32xf32>
    %133 = vector.broadcast %130 : f32 to vector<128x32xf32>
    %134 = arith.mulf %133, %129 : vector<128x32xf32>
    %135 = arith.select %132, %129, %134 : vector<128x32xi1>, vector<128x32xf32>
    %c0_51 = arith.constant 0 : index
    %c0_52 = arith.constant 0 : index
    %136 = vector.load %arg9[%c0_51, %c0_52] : memref<32x2xf32, #tpu.memory_space<vmem>>, vector<32x2xf32>
    %cst_53 = arith.constant dense<0.000000e+00> : vector<128x2xf32>
    %137 = tpu.matmul %135, %136, %cst_53 {dimension_numbers = #tpu.dot_dimension_numbers<[1], [0], [0], [1], [0, 0, 1, 1], [], []>} : vector<128x32xf32>, vector<32x2xf32>, vector<128x2xf32> -> vector<128x2xf32>
    %c0_54 = arith.constant 0 : index
    %c0_55 = arith.constant 0 : index
    %138 = vector.load %arg10[%c0_54, %c0_55] : memref<1x2xf32, #tpu.memory_space<vmem>>, vector<1x2xf32>
    %139 = vector.broadcast %138 : vector<1x2xf32> to vector<128x2xf32>
    %140 = arith.addf %137, %139 : vector<128x2xf32>
    %c0_56 = arith.constant 0 : index
    %c0_57 = arith.constant 0 : index
    %141 = vector.load %arg12[%c0_56, %c0_57] : memref<128x2xf32, #tpu.memory_space<vmem>>, vector<128x2xf32>
    tpu.vector_store %arg12[%c0_56, %c0_57], %140 {strides = array<i32>} : memref<128x2xf32, #tpu.memory_space<vmem>>, vector<128x2xf32>,
    return
  }
  func.func @transform_0(%arg0: i32) -> (i32, i32) {
    %c0_i32 = arith.constant 0 : i32
    %c0_i32_0 = arith.constant 0 : i32
    return %arg0, %c0_i32 : i32, i32
  }
  func.func @transform_1(%arg0: i32) -> (i32, i32) {
    %c0_i32 = arith.constant 0 : i32
    %c0_i32_0 = arith.constant 0 : i32
    return %arg0, %c0_i32 : i32, i32
  }
  func.func @transform_2(%arg0: i32) -> (i32, i32) {
    %c0_i32 = arith.constant 0 : i32
    %c0_i32_0 = arith.constant 0 : i32
    %c0_i32_1 = arith.constant 0 : i32
    return %c0_i32, %c0_i32_0 : i32, i32
  }
  func.func @transform_3(%arg0: i32) -> (i32, i32) {
    %c0_i32 = arith.constant 0 : i32
    %c0_i32_0 = arith.constant 0 : i32
    %c0_i32_1 = arith.constant 0 : i32
    return %c0_i32, %c0_i32_0 : i32, i32
  }
  func.func @transform_4(%arg0: i32) -> (i32, i32) {
    %c0_i32 = arith.constant 0 : i32
    %c0_i32_0 = arith.constant 0 : i32
    %c0_i32_1 = arith.constant 0 : i32
    return %c0_i32, %c0_i32_0 : i32, i32
  }
  func.func @transform_5(%arg0: i32) -> (i32, i32) {
    %c0_i32 = arith.constant 0 : i32
    %c0_i32_0 = arith.constant 0 : i32
    %c0_i32_1 = arith.constant 0 : i32
    return %c0_i32, %c0_i32_0 : i32, i32
  }
  func.func @transform_6(%arg0: i32) -> (i32, i32) {
    %c0_i32 = arith.constant 0 : i32
    %c0_i32_0 = arith.constant 0 : i32
    %c0_i32_1 = arith.constant 0 : i32
    return %c0_i32, %c0_i32_0 : i32, i32
  }
  func.func @transform_7(%arg0: i32) -> (i32, i32) {
    %c0_i32 = arith.constant 0 : i32
    %c0_i32_0 = arith.constant 0 : i32
    %c0_i32_1 = arith.constant 0 : i32
    return %c0_i32, %c0_i32_0 : i32, i32
  }
  func.func @transform_8(%arg0: i32) -> (i32, i32) {
    %c0_i32 = arith.constant 0 : i32
    %c0_i32_0 = arith.constant 0 : i32
    %c0_i32_1 = arith.constant 0 : i32
    return %c0_i32, %c0_i32_0 : i32, i32
  }
  func.func @transform_9(%arg0: i32) -> (i32, i32) {
    %c0_i32 = arith.constant 0 : i32
    %c0_i32_0 = arith.constant 0 : i32
    %c0_i32_1 = arith.constant 0 : i32
    return %c0_i32, %c0_i32_0 : i32, i32
  }
  func.func @transform_10(%arg0: i32) -> i32 {
    %c0_i32 = arith.constant 0 : i32
    %c0_i32_0 = arith.constant 0 : i32
    return %c0_i32 : i32
  }
  func.func @transform_11(%arg0: i32) -> (i32, i32) {
    %c0_i32 = arith.constant 0 : i32
    %c0_i32_0 = arith.constant 0 : i32
    return %arg0, %c0_i32 : i32, i32
  }
}

</mosaic_0001>

<bundles_post_ra>
// kernel: tpu_custom_call.1
= control target key start
LH: loop header
LB: loop body
LE: loop exit
PB: predicated region body
PF: predicated region fallthrough
CT: control target
= control target key end

     0   :  { %s6611_s19 = smov 0   ;;  %s8783_s0 = inlined_call_operand.vmem [shape: f32[256,32], index: 0, kind: input, shape index: {}]   ;;  %s8784_s1 = inlined_call_operand.vmem [shape: f32[256,32], index: 1, kind: input, shape index: {}]   ;;  %s8785_s2 = inlined_call_operand.vmem [shape: f32[128,128], index: 2, kind: input, shape index: {}]   ;;  %s8786_s3 = inlined_call_operand.vmem [shape: f32[32,96], index: 3, kind: input, shape index: {}]   ;;  %s8787_s4 = inlined_call_operand.vmem [shape: f32[1,32], index: 4, kind: input, shape index: {}]   ;;  %s8788_s5 = inlined_call_operand.vmem [shape: f32[1,32], index: 5, kind: input, shape index: {}]   ;;  %s8789_s6 = inlined_call_operand.vmem [shape: f32[32,32], index: 6, kind: input, shape index: {}]   ;;  %s8790_s7 = inlined_call_operand.vmem [shape: f32[1,32], index: 7, kind: input, shape index: {}]   ;;  %s8791_s8 = inlined_call_operand.vmem [shape: f32[32,2], index: 8, kind: input, shape index: {}]   ;;  %s8792_s9 = inlined_call_operand.vmem [shape: f32[1,2], index: 9, kind: input, shape index: {}]   ;;  %s8793_s10 = inlined_call_operand.<no memory space> [shape: f32[1], index: 10, kind: input, shape index: {}]   ;;  %s8794_s11 = inlined_call_operand.vmem [shape: f32[256,2], index: 11, kind: output, shape index: {}]  }
   0x1   :  { %16 = sst [smem:[#allocation3]] %s8793_s10 }
   0x2 LB: > { %s4429_s20 = sadd.s32 4294967295, %s6532_s19   ;;  %p4433_p0 = scmp.ge.s32.totalorder %s6532_s19, 1  ;;  %s6532_s19 = sphi %s6611_s19, %s22_s19  }
   0x3   : > { %p350_p1 = scmp.lt.s32.totalorder %s6532_s19, 3 }
   0x5   : > { %p351_p2 = pnand %p4433_p0, %p350_p1 }
   0x7   : > { %354 = sbr.rel (%p351_p2) target bundleno = 3734 (0xe96), region = 64 }
   0xe   : > { %s4434_s21 = sshll.u32 %s4429_s20, 4  ;;  %vm463_vm0 = vcmask 261120   ;;  %vm978_vm1 = vcmask 64512   ;;  %s6534_s10 = smov 96   ;;  %vm2215_vm3 = vcmask 130112   ;;  %vm2906_vm4 = vcmask 195712  }
   0xf   : > { %p396_p3 = scmp.lt.s32.totalorder %s4434_s21, 31  ;;  %s6535_s23 = smov 64   ;;  %vm7009_vm2 = vmpackc.low %vm978_vm1, %vm978_vm1  ;;  %vm3597_vm5 = vcmask 261312  }
  0x10   : > { %s6536_s25 = smov 88   ;;  %s6537_s26 = smov 120  }
  0x11   : > { %s8966_s21 = smov (!%p396_p3, %s4434_s21), 31  ;;  %s6540_s28 = smov 112  }
  0x12   : > { %s6619_s22 = sshll.u32 %s8966_s21, 3  ;;  %s6541_s29 = smov 48  }
  0x13   : > { %s6625_s24 = scalar_lea.vmem %s8783_s0, %s6619_s22  ;;  %s6631_s27 = scalar_lea.vmem %s8784_s1, %s6619_s22 }
  0x14   : > { %v413_v0 = vld [vmem:[%s6625_s24] sm:$0xff]  ;;  %v415_v2 = vld [vmem:[%s6625_s24 + $0x10] sm:$0xff]  ;;  %v414_v5 = vld [vmem:[%s6625_s24 + $0x8] sm:$0xff]  ;;  %s6542_s30 = smov 72   ;;  %s6543_s12 = smov 104  }
  0x15   : > { %v429_v1 = vld [vmem:[%s6631_s27] sm:$0xff]  ;;  %v431_v4 = vld [vmem:[%s6631_s27 + $0x10] sm:$0xff]  ;;  %v430_v6 = vld [vmem:[%s6631_s27 + $0x8] sm:$0xff]  ;;  %s6545_s13 = smov 8   ;;  %s6546_s14 = smov 16  }
  0x16   : > { %v6636_v3 = vadd.f32 %v429_v1, %v413_v0  ;;  %v6641_v7 = vadd.f32 %v431_v4, %v415_v2  ;;  %v6643_v8 = vadd.f32 %v430_v6, %v414_v5  ;;  %v416_v9 = vld [vmem:[%s6625_s24 + $0x18] sm:$0xff]  ;;  %v417_v11 = vld [vmem:[%s6625_s24 + $0x20] sm:$0xff]  ;;  %v418_v15 = vld [vmem:[%s6625_s24 + $0x28] sm:$0xff]  ;;  %s6547_s15 = smov 24   ;;  %s4090_s17 = sld [smem:[#allocation3]] }
  0x17   : > { %v432_v10 = vld [vmem:[%s6631_s27 + $0x18] sm:$0xff]  ;;  %v433_v14 = vld [vmem:[%s6631_s27 + $0x20] sm:$0xff]  ;;  %v434_v16 = vld [vmem:[%s6631_s27 + $0x28] sm:$0xff] }
  0x18   : > { %v464_v12 = vsel %vm463_vm0, %v6636_v3, 0.0  ;;  %v6650_v13 = vadd.f32 %v432_v10, %v416_v9  ;;  %v470_v17 = vsel %vm463_vm0, %v6641_v7, 0.0  ;;  %v467_v18 = vsel %vm463_vm0, %v6643_v8, 0.0  ;;  %v419_v22 = vld [vmem:[%s6625_s24 + $0x30] sm:$0xff]  ;;  %v420_v24 = vld [vmem:[%s6625_s24 + $0x38] sm:$0xff]  ;;  %v421_v30 = vld [vmem:[%s6625_s24 + $0x40] sm:$0xff] }
  0x19   : > { %465 = vadd.xlane.f32.xlu0 %v464_v12  ;;  %471 = vadd.xlane.f32.xlu1 %v470_v17  ;;  %v6659_v19 = vadd.f32 %v433_v14, %v417_v11  ;;  %v6663_v21 = vadd.f32 %v434_v16, %v418_v15  ;;  %v435_v23 = vld [vmem:[%s6631_s27 + $0x30] sm:$0xff]  ;;  %v436_v25 = vld [vmem:[%s6631_s27 + $0x38] sm:$0xff]  ;;  %v437_v31 = vld [vmem:[%s6631_s27 + $0x40] sm:$0xff] }
  0x1a   : > { %v473_v20 = vsel %vm463_vm0, %v6650_v13, 0.0  ;;  %v6671_v27 = vadd.f32 %v435_v23, %v419_v22  ;;  %v6675_v29 = vadd.f32 %v436_v25, %v420_v24  ;;  %v422_v32 = vld [vmem:[%s6625_s24 + $0x48] sm:$0xff]  ;;  %v6683_v35 = vadd.f32 %v437_v31, %v421_v30  ;;  %v423_v38 = vld [vmem:[%s6625_s24 + $0x50] sm:$0xff]  ;;  %v424_v40 = vld [vmem:[%s6625_s24 + $0x58] sm:$0xff] }
  0x1b   : > { %v476_v26 = vsel %vm463_vm0, %v6659_v19, 0.0  ;;  %v479_v28 = vsel %vm463_vm0, %v6663_v21, 0.0  ;;  %v438_v33 = vld [vmem:[%s6631_s27 + $0x48] sm:$0xff]  ;;  %v439_v39 = vld [vmem:[%s6631_s27 + $0x50] sm:$0xff]  ;;  %v440_v41 = vld [vmem:[%s6631_s27 + $0x58] sm:$0xff] }
  0x1c   : > { %v482_v34 = vsel %vm463_vm0, %v6671_v27, 0.0  ;;  %v485_v36 = vsel %vm463_vm0, %v6675_v29, 0.0  ;;  %v6687_v37 = vadd.f32 %v438_v33, %v422_v32  ;;  %v488_v42 = vsel %vm463_vm0, %v6683_v35, 0.0  ;;  %v425_v46 = vld [vmem:[%s6625_s24 + $0x60] sm:$0xff]  ;;  %v426_v48 = vld [vmem:[%s6625_s24 + $0x68] sm:$0xff]  ;;  %v427_v54 = vld [vmem:[%s6625_s24 + $0x70] sm:$0xff] }
  0x1d   : > { %468 = vadd.xlane.f32.xlu0 %v467_v18  ;;  %474 = vadd.xlane.f32.xlu1 %v473_v20  ;;  %v6695_v43 = vadd.f32 %v439_v39, %v423_v38  ;;  %v6699_v45 = vadd.f32 %v440_v41, %v424_v40  ;;  %v441_v47 = vld [vmem:[%s6631_s27 + $0x60] sm:$0xff]  ;;  %v442_v49 = vld [vmem:[%s6631_s27 + $0x68] sm:$0xff]  ;;  %v443_v55 = vld [vmem:[%s6631_s27 + $0x70] sm:$0xff] }
  0x1e   : > { %v491_v44 = vsel %vm463_vm0, %v6687_v37, 0.0  ;;  %v6707_v51 = vadd.f32 %v441_v47, %v425_v46  ;;  %v6711_v53 = vadd.f32 %v442_v49, %v426_v48  ;;  %v428_v56 = vld [vmem:[%s6625_s24 + $0x78] sm:$0xff]  ;;  %v6719_v59 = vadd.f32 %v443_v55, %v427_v54 }
  0x1f   : > { %v494_v50 = vsel %vm463_vm0, %v6695_v43, 0.0  ;;  %v497_v52 = vsel %vm463_vm0, %v6699_v45, 0.0  ;;  %v444_v57 = vld [vmem:[%s6631_s27 + $0x78] sm:$0xff]  ;;  %s6539_s27 = smov 80  }
  0x20   : > { %v500_v58 = vsel %vm463_vm0, %v6707_v51, 0.0  ;;  %v503_v60 = vsel %vm463_vm0, %v6711_v53, 0.0  ;;  %v6723_v61 = vadd.f32 %v444_v57, %v428_v56  ;;  %v506_v62 = vsel %vm463_vm0, %v6719_v59, 0.0 }
  0x21   : > { %477 = vadd.xlane.f32.xlu0 %v476_v26  ;;  %480 = vadd.xlane.f32.xlu1 %v479_v28 }
  0x22   : > { %v509_v63 = vsel %vm463_vm0, %v6723_v61, 0.0 }
  0x25   : > { %483 = vadd.xlane.f32.xlu0 %v482_v34  ;;  %486 = vadd.xlane.f32.xlu1 %v485_v36 }
  0x29   : > { %489 = vadd.xlane.f32.xlu0 %v488_v42  ;;  %492 = vadd.xlane.f32.xlu1 %v491_v44 }
  0x2d   : > { %495 = vadd.xlane.f32.xlu0 %v494_v50  ;;  %498 = vadd.xlane.f32.xlu1 %v497_v52 }
  0x31   : > { %501 = vadd.xlane.f32.xlu0 %v500_v58  ;;  %504 = vadd.xlane.f32.xlu1 %v503_v60 }
  0x35   : > { %507 = vadd.xlane.f32.xlu0 %v506_v62  ;;  %510 = vadd.xlane.f32.xlu1 %v509_v63 }
  0xa6   : > { %v466_v0 = vpop.xlane.xlu0 %465  ;;  %v472_v2 = vpop.xlane.xlu1 %471 }
  0xa7   : > { %v513_v1 = vmul.f32 0.03125, %v466_v0  ;;  %v515_v4 = vmul.f32 0.03125, %v472_v2 }
  0xa9   : > { %v6730_v5 = vsub.f32 %v6636_v3, %v513_v1  ;;  %v6733_v6 = vsub.f32 %v6641_v7, %v515_v4 }
  0xaa   : > { %v469_v9 = vpop.xlane.xlu0 %468  ;;  %v475_v11 = vpop.xlane.xlu1 %474 }
  0xab   : > { %v514_v10 = vmul.f32 0.03125, %v469_v9  ;;  %v545_v12 = vmul.f32 %v6730_v5, %v6730_v5  ;;  %v516_v14 = vmul.f32 0.03125, %v475_v11  ;;  %v547_v15 = vmul.f32 %v6733_v6, %v6733_v6 }
  0xad   : > { %v6740_v16 = vsub.f32 %v6643_v8, %v514_v10  ;;  %v561_v17 = vsel %vm463_vm0, %v545_v12, 0.0  ;;  %v6744_v3 = vsub.f32 %v6650_v13, %v516_v14  ;;  %v567_v22 = vsel %vm463_vm0, %v547_v15, 0.0 }
  0xae   : > { %562 = vadd.xlane.f32.xlu0 %v561_v17  ;;  %v478_v7 = vpop.xlane.xlu0 %477  ;;  %v481_v20 = vpop.xlane.xlu1 %480 }
  0xaf   : > { %v517_v18 = vmul.f32 0.03125, %v478_v7  ;;  %v546_v23 = vmul.f32 %v6740_v16, %v6740_v16  ;;  %v518_v24 = vmul.f32 0.03125, %v481_v20  ;;  %v548_v25 = vmul.f32 %v6744_v3, %v6744_v3 }
  0xb1   : > { %v6752_v8 = vsub.f32 %v6659_v19, %v517_v18  ;;  %v564_v26 = vsel %vm463_vm0, %v546_v23, 0.0  ;;  %v6756_v13 = vsub.f32 %v6663_v21, %v518_v24  ;;  %v570_v32 = vsel %vm463_vm0, %v548_v25, 0.0  ;;  %v718_v25 = vld [vmem:[%s8786_s3 + $0x8] sm:$0xff] }
  0xb2   : > { %568 = vadd.xlane.f32.xlu0 %v567_v22  ;;  %565 = vadd.xlane.f32.xlu1 %v564_v26  ;;  %v484_v28 = vpop.xlane.xlu0 %483  ;;  %v487_v31 = vpop.xlane.xlu1 %486 }
  0xb3   : > { %v519_v30 = vmul.f32 0.03125, %v484_v28  ;;  %v549_v33 = vmul.f32 %v6752_v8, %v6752_v8  ;;  %v520_v34 = vmul.f32 0.03125, %v487_v31  ;;  %v550_v19 = vmul.f32 %v6756_v13, %v6756_v13  ;;  %v719_v28 = vld [vmem:[%s8786_s3 + $0x10] sm:$0xff] }
  0xb5   : > { %v6764_v36 = vsub.f32 %v6671_v27, %v519_v30  ;;  %v573_v21 = vsel %vm463_vm0, %v549_v33, 0.0  ;;  %v6768_v38 = vsub.f32 %v6675_v29, %v520_v34  ;;  %v576_v42 = vsel %vm463_vm0, %v550_v19, 0.0  ;;  %v720_v30 = vld [vmem:[%s8786_s3 + $0x18] sm:$0xff] }
  0xb6   : > { %571 = vadd.xlane.f32.xlu1 %v570_v32  ;;  %574 = vadd.xlane.f32.xlu0 %v573_v21  ;;  %v490_v39 = vpop.xlane.xlu0 %489  ;;  %v493_v41 = vpop.xlane.xlu1 %492  ;;  %v5486_v31 = vpack.c.bf16 %v720_v30, %v719_v28 }
  0xb7   : > { %v521_v40 = vmul.f32 0.03125, %v490_v39  ;;  %v551_v44 = vmul.f32 %v6764_v36, %v6764_v36  ;;  %v522_v46 = vmul.f32 0.03125, %v493_v41  ;;  %v552_v27 = vmul.f32 %v6768_v38, %v6768_v38 }
  0xb9   : > { %v6776_v47 = vsub.f32 %v6683_v35, %v521_v40  ;;  %v579_v29 = vsel %vm463_vm0, %v551_v44, 0.0  ;;  %v6780_v48 = vsub.f32 %v6687_v37, %v522_v46  ;;  %v582_v54 = vsel %vm463_vm0, %v552_v27, 0.0 }
  0xba   : > { %577 = vadd.xlane.f32.xlu1 %v576_v42  ;;  %580 = vadd.xlane.f32.xlu0 %v579_v29  ;;  %v496_v49 = vpop.xlane.xlu0 %495  ;;  %v499_v52 = vpop.xlane.xlu1 %498 }
  0xbb   : > { %v523_v50 = vmul.f32 0.03125, %v496_v49  ;;  %v553_v55 = vmul.f32 %v6776_v47, %v6776_v47  ;;  %v524_v56 = vmul.f32 0.03125, %v499_v52  ;;  %v554_v35 = vmul.f32 %v6780_v48, %v6780_v48 }
  0xbd   : > { %v6788_v57 = vsub.f32 %v6695_v43, %v523_v50  ;;  %v585_v37 = vsel %vm463_vm0, %v553_v55, 0.0  ;;  %v6792_v58 = vsub.f32 %v6699_v45, %v524_v56  ;;  %v588_v0 = vsel %vm463_vm0, %v554_v35, 0.0 }
  0xbe   : > { %583 = vadd.xlane.f32.xlu1 %v582_v54  ;;  %586 = vadd.xlane.f32.xlu0 %v585_v37  ;;  %v502_v60 = vpop.xlane.xlu0 %501  ;;  %v505_v63 = vpop.xlane.xlu1 %504 }
  0xbf   : > { %v525_v62 = vmul.f32 0.03125, %v502_v60  ;;  %v555_v1 = vmul.f32 %v6788_v57, %v6788_v57  ;;  %v526_v2 = vmul.f32 0.03125, %v505_v63  ;;  %v556_v43 = vmul.f32 %v6792_v58, %v6792_v58 }
  0xc1   : > { %v6800_v4 = vsub.f32 %v6707_v51, %v525_v62  ;;  %v591_v45 = vsel %vm463_vm0, %v555_v1, 0.0  ;;  %v6804_v9 = vsub.f32 %v6711_v53, %v526_v2  ;;  %v594_v14 = vsel %vm463_vm0, %v556_v43, 0.0  ;;  %v6840_v62 = vld [vmem:[%s8787_s4] ss:$0 sm:$0xff] }
  0xc2   : > { %589 = vadd.xlane.f32.xlu1 %v588_v0  ;;  %592 = vadd.xlane.f32.xlu0 %v591_v45  ;;  %v508_v10 = vpop.xlane.xlu0 %507  ;;  %v511_v12 = vpop.xlane.xlu1 %510  ;;  %v6846_v45 = vld [vmem:[%s8788_s5] ss:$0 sm:$0xff] }
  0xc3   : > { %v527_v11 = vmul.f32 0.03125, %v508_v10  ;;  %v557_v15 = vmul.f32 %v6800_v4, %v6800_v4  ;;  %v528_v17 = vmul.f32 0.03125, %v511_v12  ;;  %v558_v51 = vmul.f32 %v6804_v9, %v6804_v9 }
  0xc5   : > { %v6812_v7 = vsub.f32 %v6719_v59, %v527_v11  ;;  %v597_v53 = vsel %vm463_vm0, %v557_v15, 0.0  ;;  %v6816_v18 = vsub.f32 %v6723_v61, %v528_v17  ;;  %v600_v20 = vsel %vm463_vm0, %v558_v51, 0.0  ;;  %v717_v61 = vld [vmem:[%s8786_s3] sm:$0xff] }
  0xc6   : > { %595 = vadd.xlane.f32.xlu1 %v594_v14  ;;  %598 = vadd.xlane.f32.xlu0 %v597_v53  ;;  %v5482_v26 = vpack.c.bf16 %v718_v25, %v717_v61 }
  0xc7   : > { %v559_v22 = vmul.f32 %v6812_v7, %v6812_v7  ;;  %v560_v23 = vmul.f32 %v6816_v18, %v6816_v18 }
  0xc8   : > { %5483 = vmatprep.subr.bf16.mxu0 %v5482_v26 }
  0xc9   : > { %v603_v24 = vsel %vm463_vm0, %v559_v22, 0.0  ;;  %v606_v59 = vsel %vm463_vm0, %v560_v23, 0.0  ;;  %5485 = vmatpush3.bf16.msra.mxu0 %v5482_v26 }
  0xca   : > { %601 = vadd.xlane.f32.xlu1 %v600_v20  ;;  %604 = vadd.xlane.f32.xlu0 %v603_v24 }
  0xcb   : > { %5487 = vmatprep.subr.bf16.mxu0 %v5486_v31 }
  0xcd   : > { %5489 = vmatpush3.bf16.msra.mxu0 %v5486_v31 }
  0xce   : > { %607 = vadd.xlane.f32.xlu1 %v606_v59 }
 0x13b   : > { %v563_v32 = vpop.xlane.xlu0 %562 }
 0x13c   : > { %v609_v33 = vmul.f32 0.03125, %v563_v32 }
 0x13e   : > { %v625_v34 = vadd.f32 1e-05, %v609_v33 }
 0x13f   : > { %v566_v19 = vpop.xlane.xlu1 %565  ;;  %v569_v21 = vpop.xlane.xlu0 %568 }
 0x140   : > { %6172 = vrsqrt.f32 %v625_v34  ;;  %v610_v39 = vmul.f32 0.03125, %v566_v19  ;;  %v611_v40 = vmul.f32 0.03125, %v569_v21 }
 0x142   : > { %v626_v41 = vadd.f32 1e-05, %v610_v39  ;;  %v627_v42 = vadd.f32 1e-05, %v611_v40 }
 0x143   : > { %v572_v44 = vpop.xlane.xlu1 %571  ;;  %v575_v46 = vpop.xlane.xlu0 %574 }
 0x144   : > { %6174 = vrsqrt.f32 %v626_v41  ;;  %v612_v27 = vmul.f32 0.03125, %v572_v44  ;;  %v613_v29 = vmul.f32 0.03125, %v575_v46 }
 0x145   : > { %6176 = vrsqrt.f32 %v627_v42 }
 0x146   : > { %v628_v49 = vadd.f32 1e-05, %v612_v27  ;;  %v629_v50 = vadd.f32 1e-05, %v613_v29 }
 0x147   : > { %v578_v52 = vpop.xlane.xlu1 %577  ;;  %v581_v54 = vpop.xlane.xlu0 %580 }
 0x148   : > { %6178 = vrsqrt.f32 %v628_v49  ;;  %v614_v55 = vmul.f32 0.03125, %v578_v52  ;;  %v615_v56 = vmul.f32 0.03125, %v581_v54 }
 0x149   : > { %6180 = vrsqrt.f32 %v629_v50 }
 0x14a   : > { %v6173_v35 = vpop.eup %6172  ;;  %v630_v37 = vadd.f32 1e-05, %v614_v55  ;;  %v631_v60 = vadd.f32 1e-05, %v615_v56 }
 0x14b   : > { %v584_v63 = vpop.xlane.xlu1 %583  ;;  %v587_v0 = vpop.xlane.xlu0 %586  ;;  %v657_v1 = vmul.f32 %v6173_v35, %v6730_v5 }
 0x14c   : > { %6182 = vrsqrt.f32 %v630_v37  ;;  %v616_v2 = vmul.f32 0.03125, %v584_v63  ;;  %v617_v43 = vmul.f32 0.03125, %v587_v0 }
 0x14d   : > { %6184 = vrsqrt.f32 %v631_v60  ;;  %v679_v10 = vmul.f32 %v6840_v62, %v657_v1 }
 0x14e   : > { %v6175_v11 = vpop.eup %6174  ;;  %v632_v12 = vadd.f32 1e-05, %v616_v2  ;;  %v633_v14 = vadd.f32 1e-05, %v617_v43 }
 0x14f   : > { %v6177_v15 = vpop.eup %6176  ;;  %v590_v17 = vpop.xlane.xlu1 %589  ;;  %v701_v53 = vadd.f32 %v6846_v45, %v679_v10  ;;  %v658_v5 = vmul.f32 %v6175_v11, %v6740_v16 }
 0x150   : > { %v593_v51 = vpop.xlane.xlu0 %592  ;;  %6186 = vrsqrt.f32 %v632_v12  ;;  %v618_v20 = vmul.f32 0.03125, %v590_v17  ;;  %v659_v23 = vmul.f32 %v6177_v15, %v6733_v6 }
 0x151   : > { %v619_v22 = vmul.f32 0.03125, %v593_v51  ;;  %6188 = vrsqrt.f32 %v633_v14  ;;  %4946 = vmatprep.mubr.msk.f32.mxu0 %vm463_vm0, %v701_v53  ;;  %v680_v24 = vmul.f32 %v6840_v62, %v658_v5 }
 0x152   : > { %v6179_v59 = vpop.eup %6178  ;;  %v634_v61 = vadd.f32 1e-05, %v618_v20  ;;  %v681_v26 = vmul.f32 %v6840_v62, %v659_v23 }
 0x153   : > { %v635_v25 = vadd.f32 1e-05, %v619_v22  ;;  %v6181_v28 = vpop.eup %6180  ;;  %v596_v30 = vpop.xlane.xlu1 %595  ;;  %v702_v16 = vadd.f32 %v6846_v45, %v680_v24  ;;  %v660_v32 = vmul.f32 %v6179_v59, %v6744_v3 }
 0x154   : > { %v599_v31 = vpop.xlane.xlu0 %598  ;;  %6190 = vrsqrt.f32 %v634_v61  ;;  %v620_v33 = vmul.f32 0.03125, %v596_v30  ;;  %v703_v34 = vadd.f32 %v6846_v45, %v681_v26  ;;  %v661_v21 = vmul.f32 %v6181_v28, %v6752_v8 }
 0x155   : > { %v621_v6 = vmul.f32 0.03125, %v599_v31  ;;  %6192 = vrsqrt.f32 %v635_v25  ;;  %4947 = vmatmul.mubr.msk.f32.vlgmr.msra.gmra.mrb[0].mxu0 %vm463_vm0, %v702_v16  ;;  %v682_v19 = vmul.f32 %v6840_v62, %v660_v32 }
 0x156   : > { %v6183_v39 = vpop.eup %6182  ;;  %v636_v40 = vadd.f32 1e-05, %v620_v33  ;;  %4949 = vmatprep.mubr.msk.f32.mxu0 %vm463_vm0, %v703_v34  ;;  %v683_v27 = vmul.f32 %v6840_v62, %v661_v21 }
 0x157   : > { %v637_v41 = vadd.f32 1e-05, %v621_v6  ;;  %v6185_v42 = vpop.eup %6184  ;;  %v602_v44 = vpop.xlane.xlu1 %601  ;;  %v704_v46 = vadd.f32 %v6846_v45, %v682_v19  ;;  %v662_v29 = vmul.f32 %v6183_v39, %v6756_v13 }
 0x158   : > { %v605_v3 = vpop.xlane.xlu0 %604  ;;  %6194 = vrsqrt.f32 %v636_v40  ;;  %v622_v49 = vmul.f32 0.03125, %v602_v44  ;;  %v663_v52 = vmul.f32 %v6185_v42, %v6764_v36  ;;  %v705_v8 = vadd.f32 %v6846_v45, %v683_v27 }
 0x159   : > { %v623_v50 = vmul.f32 0.03125, %v605_v3  ;;  %6196 = vrsqrt.f32 %v637_v41  ;;  %4950 = vmatmul.mubr.msk.f32.gmra.mrb[2].mxu0 %vm463_vm0, %v704_v46  ;;  %v684_v54 = vmul.f32 %v6840_v62, %v662_v29 }
 0x15a   : > { %v6187_v55 = vpop.eup %6186  ;;  %v638_v56 = vadd.f32 1e-05, %v622_v49  ;;  %v685_v37 = vmul.f32 %v6840_v62, %v663_v52  ;;  %4952 = vmatprep.mubr.msk.f32.mxu0 %vm463_vm0, %v705_v8 }
 0x15b   : > { %v639_v35 = vadd.f32 1e-05, %v623_v50  ;;  %v6189_v60 = vpop.eup %6188  ;;  %v608_v13 = vpop.xlane.xlu1 %607  ;;  %v706_v63 = vadd.f32 %v6846_v45, %v684_v54  ;;  %v664_v36 = vmul.f32 %v6187_v55, %v6768_v38 }
 0x15c   : > { %6198 = vrsqrt.f32 %v638_v56  ;;  %v624_v0 = vmul.f32 0.03125, %v608_v13  ;;  %v707_v1 = vadd.f32 %v6846_v45, %v685_v37  ;;  %v665_v2 = vmul.f32 %v6189_v60, %v6776_v47 }
 0x15d   : > { %6200 = vrsqrt.f32 %v639_v35  ;;  %4953 = vmatmul.mubr.msk.f32.gmra.mrb[4].mxu0 %vm463_vm0, %v706_v63  ;;  %v686_v43 = vmul.f32 %v6840_v62, %v664_v36 }
 0x15e   : > { %v6191_v10 = vpop.eup %6190  ;;  %v640_v11 = vadd.f32 1e-05, %v624_v0  ;;  %4955 = vmatprep.mubr.msk.f32.mxu0 %vm463_vm0, %v707_v1  ;;  %v687_v12 = vmul.f32 %v6840_v62, %v665_v2 }
 0x15f   : > { %v6193_v14 = vpop.eup %6192  ;;  %v708_v38 = vadd.f32 %v6846_v45, %v686_v43  ;;  %v666_v15 = vmul.f32 %v6191_v10, %v6780_v48 }
 0x160   : > { %6202 = vrsqrt.f32 %v640_v11  ;;  %v709_v17 = vadd.f32 %v6846_v45, %v687_v12  ;;  %v667_v47 = vmul.f32 %v6193_v14, %v6788_v57 }
 0x161   : > { %4956 = vmatmul.mubr.msk.f32.gmra.mrb[6].mxu0 %vm463_vm0, %v708_v38  ;;  %v688_v51 = vmul.f32 %v6840_v62, %v666_v15 }
 0x162   : > { %v6195_v53 = vpop.eup %6194  ;;  %4958 = vmatprep.mubr.msk.f32.mxu0 %vm463_vm0, %v709_v17  ;;  %v689_v5 = vmul.f32 %v6840_v62, %v667_v47 }
 0x163   : > { %v6197_v20 = vpop.eup %6196  ;;  %v710_v22 = vadd.f32 %v6846_v45, %v688_v51  ;;  %v668_v23 = vmul.f32 %v6195_v53, %v6792_v58 }
 0x164   : > { %v711_v48 = vadd.f32 %v6846_v45, %v689_v5  ;;  %v669_v24 = vmul.f32 %v6197_v20, %v6800_v4 }
 0x165   : > { %4959 = vmatmul.mubr.msk.f32.gmra.mrb[8].mxu0 %vm463_vm0, %v710_v22  ;;  %v690_v57 = vmul.f32 %v6840_v62, %v668_v23 }
 0x166   : > { %v6199_v59 = vpop.eup %6198  ;;  %4961 = vmatprep.mubr.msk.f32.mxu0 %vm463_vm0, %v711_v48  ;;  %v691_v61 = vmul.f32 %v6840_v62, %v669_v24 }
 0x167   : > { %v6201_v25 = vpop.eup %6200  ;;  %v712_v26 = vadd.f32 %v6846_v45, %v690_v57  ;;  %v670_v28 = vmul.f32 %v6199_v59, %v6804_v9 }
 0x168   : > { %v713_v58 = vadd.f32 %v6846_v45, %v691_v61  ;;  %v671_v30 = vmul.f32 %v6201_v25, %v6812_v7 }
 0x169   : > { %4962 = vmatmul.mubr.msk.f32.gmra.mrb[10].mxu0 %vm463_vm0, %v712_v26  ;;  %v692_v4 = vmul.f32 %v6840_v62, %v670_v28 }
 0x16a   : > { %v6203_v31 = vpop.eup %6202  ;;  %4964 = vmatprep.mubr.msk.f32.mxu0 %vm463_vm0, %v713_v58  ;;  %v693_v16 = vmul.f32 %v6840_v62, %v671_v30 }
 0x16b   : > { %v714_v32 = vadd.f32 %v6846_v45, %v692_v4  ;;  %v672_v33 = vmul.f32 %v6203_v31, %v6816_v18 }
 0x16c   : > { %v715_v6 = vadd.f32 %v6846_v45, %v693_v16 }
 0x16d   : > { %4965 = vmatmul.mubr.msk.f32.gmra.mrb[12].mxu0 %vm463_vm0, %v714_v32  ;;  %v694_v9 = vmul.f32 %v6840_v62, %v672_v33 }
 0x16e   : > { %4967 = vmatprep.mubr.msk.f32.mxu0 %vm463_vm0, %v715_v6 }
 0x16f   : > { %v716_v7 = vadd.f32 %v6846_v45, %v694_v9 }
 0x171   : > { %4968 = vmatmul.mubr.msk.f32.gmra.mrb[14].mxu0 %vm463_vm0, %v716_v7 }
 0x228   : > { %v6911_v34 = vpop.f32.mrb[0].mxu0 }
 0x229   : > { %v6913_v19 = vpop.f32.mrb[1].mxu0 }
 0x22a   : > { %5002 = vmatprep.mubr.msk.f32.mxu1 %vm978_vm1, %v6913_v19  ;;  %v6919_v18 = vpack.i.bf16 %v6911_v34, %v6913_v19 }
 0x22c   : > { %8833 = vst [vmem:[#allocation4_spill] sm:$0xff] %v6919_v18  ;;  %5853 = vrot.lane.b32.xlu0 %v6919_v18, %s6534_s10  ;;  %v6923_v62 = vpop.f32.mrb[2].mxu0 }
 0x22d   : > { %v6925_v45 = vpop.f32.mrb[3].mxu0 }
 0x22e   : > { %v6929_v21 = vpack.i.bf16 %v6923_v62, %v6925_v45 }
 0x230   : > { %8834 = vst [vmem:[#allocation5_spill] sm:$0xff] %v6929_v21  ;;  %5858 = vrot.lane.b32.xlu1 %v6929_v21, %s6534_s10  ;;  %v6933_v39 = vpop.f32.mrb[4].mxu0 }
 0x231   : > { %v6935_v40 = vpop.f32.mrb[5].mxu0 }
 0x232   : > { %v6939_v41 = vpack.i.bf16 %v6933_v39, %v6935_v40 }
 0x234   : > { %8835 = vst [vmem:[#allocation6_spill] sm:$0xff] %v6939_v41  ;;  %5863 = vrot.lane.b32.xlu1 %v6939_v41, %s6534_s10  ;;  %v6943_v42 = vpop.f32.mrb[6].mxu0 }
 0x235   : > { %v6945_v44 = vpop.f32.mrb[7].mxu0 }
 0x236   : > { %v6949_v3 = vpack.i.bf16 %v6943_v42, %v6945_v44 }
 0x238   : > { %5868 = vrot.lane.b32.xlu1 %v6949_v3, %s6534_s10  ;;  %v6953_v46 = vpop.f32.mrb[8].mxu0 }
 0x239   : > { %v6955_v27 = vpop.f32.mrb[9].mxu0 }
 0x23a   : > { %v6959_v29 = vpack.i.bf16 %v6953_v46, %v6955_v27 }
 0x23c   : > { %5873 = vrot.lane.b32.xlu0 %v6959_v29, %s6534_s10  ;;  %v6963_v49 = vpop.f32.mrb[10].mxu0 }
 0x23d   : > { %v6965_v50 = vpop.f32.mrb[11].mxu0 }
 0x23e   : > { %v6969_v52 = vpack.i.bf16 %v6963_v49, %v6965_v50 }
 0x240   : > { %5878 = vrot.lane.b32.xlu1 %v6969_v52, %s6534_s10  ;;  %v6973_v8 = vpop.f32.mrb[12].mxu0 }
 0x241   : > { %v6975_v54 = vpop.f32.mrb[13].mxu0 }
 0x242   : > { %v6979_v55 = vpack.i.bf16 %v6973_v8, %v6975_v54 }
 0x244   : > { %5883 = vrot.lane.b32.xlu0 %v6979_v55, %s6534_s10  ;;  %v6983_v56 = vpop.f32.mrb[14].mxu0 }
 0x245   : > { %8836 = vst [vmem:[#allocation7_spill] sm:$0xff] %v6983_v56  ;;  %v6985_v35 = vpop.f32.mrb[15].mxu0 }
 0x246   : > { %8837 = vst [vmem:[#allocation8_spill] sm:$0xff] %v6985_v35  ;;  %v6989_v37 = vpack.i.bf16 %v6983_v56, %v6985_v35 }
 0x248   : > { %5893 = vrot.lane.b32.xlu0 %v6919_v18, %s6535_s23  ;;  %5888 = vrot.lane.b32.xlu1 %v6989_v37, %s6534_s10 }
 0x24c   : > { %5903 = vrot.lane.b32.xlu0 %v6939_v41, %s6535_s23  ;;  %5898 = vrot.lane.b32.xlu1 %v6929_v21, %s6535_s23 }
 0x250   : > { %5908 = vrot.lane.b32.xlu0 %v6949_v3, %s6535_s23  ;;  %5913 = vrot.lane.b32.xlu1 %v6959_v29, %s6535_s23 }
 0x254   : > { %5923 = vrot.lane.b32.xlu0 %v6979_v55, %s6535_s23  ;;  %5918 = vrot.lane.b32.xlu1 %v6969_v52, %s6535_s23 }
 0x258   : > { %5928 = vrot.lane.b32.xlu0 %v6919_v18, %s6536_s25  ;;  %5938 = vrot.lane.b32.xlu1 %v6939_v41, %s6536_s25 }
 0x25c   : > { %5933 = vrot.lane.b32.xlu0 %v6929_v21, %s6536_s25  ;;  %5943 = vrot.lane.b32.xlu1 %v6989_v37, %s6535_s23 }
 0x29e   : > { %v5854_v60 = vpop.permute.xlu0 %5853 }
 0x29f   : > { %v5856_v13 = vunpack.i.h.bf16 %v5854_v60  ;;  %v5855_v63 = vunpack.i.l.bf16 %v5854_v60 }
 0x2a1   : > { %v5490_v0 = vpack.c.bf16 %v5856_v13, %v5855_v63 }
 0x2a2   : > { %v5859_v1 = vpop.permute.xlu1 %5858 }
 0x2a3   : > { %v5861_v2 = vunpack.i.h.bf16 %v5859_v1  ;;  %v5860_v43 = vunpack.i.l.bf16 %v5859_v1  ;;  %5492 = vmatprep.subr.msk.bf16.mxu1 %vm7009_vm2, %v5490_v0 }
 0x2a4   : > { %5495 = vmatpush3.bf16.xpose.msk.msra.mxu1 %vm7009_vm2, %v5490_v0 }
 0x2a5   : > { %v5496_v10 = vpack.c.bf16 %v5861_v2, %v5860_v43 }
 0x2a6   : > { %v5864_v11 = vpop.permute.xlu1 %5863 }
 0x2a7   : > { %v5866_v12 = vunpack.i.h.bf16 %v5864_v11  ;;  %v5865_v14 = vunpack.i.l.bf16 %v5864_v11  ;;  %5498 = vmatprep.subr.msk.bf16.mxu1 %vm7009_vm2, %v5496_v10 }
 0x2a9   : > { %v5502_v38 = vpack.c.bf16 %v5866_v12, %v5865_v14 }
 0x2aa   : > { %v5869_v15 = vpop.permute.xlu1 %5868 }
 0x2ab   : > { %v5871_v17 = vunpack.i.h.bf16 %v5869_v15  ;;  %v5870_v47 = vunpack.i.l.bf16 %v5869_v15 }
 0x2ac   : > { %5501 = vmatpush3.bf16.xpose.msk.msra.mxu1 %vm7009_vm2, %v5496_v10 }
 0x2ad   : > { %5504 = vmatprep.subr.msk.bf16.mxu1 %vm7009_vm2, %v5502_v38  ;;  %v5508_v53 = vpack.c.bf16 %v5871_v17, %v5870_v47 }
 0x2ae   : > { %v5874_v51 = vpop.permute.xlu0 %5873 }
 0x2af   : > { %v5876_v22 = vunpack.i.h.bf16 %v5874_v51  ;;  %v5875_v23 = vunpack.i.l.bf16 %v5874_v51 }
 0x2b1   : > { %v5514_v57 = vpack.c.bf16 %v5876_v22, %v5875_v23 }
 0x2b2   : > { %v5879_v5 = vpop.permute.xlu1 %5878 }
 0x2b3   : > { %v5881_v26 = vunpack.i.h.bf16 %v5879_v5  ;;  %v5880_v28 = vunpack.i.l.bf16 %v5879_v5 }
 0x2b4   : > { %5507 = vmatpush3.bf16.xpose.msk.msra.mxu1 %vm7009_vm2, %v5502_v38 }
 0x2b5   : > { %5510 = vmatprep.subr.msk.bf16.mxu1 %vm7009_vm2, %v5508_v53  ;;  %v5520_v7 = vpack.c.bf16 %v5881_v26, %v5880_v28 }
 0x2b6   : > { %v5884_v20 = vpop.permute.xlu0 %5883 }
 0x2b7   : > { %v5886_v0 = vunpack.i.h.bf16 %v5884_v20  ;;  %v5885_v2 = vunpack.i.l.bf16 %v5884_v20 }
 0x2b9   : > { %v5526_v14 = vpack.c.bf16 %v5886_v0, %v5885_v2 }
 0x2ba   : > { %v5889_v48 = vpop.permute.xlu1 %5888  ;;  %v5894_v24 = vpop.permute.xlu0 %5893 }
 0x2bb   : > { %v5896_v59 = vunpack.i.h.bf16 %v5894_v24  ;;  %v5895_v61 = vunpack.i.l.bf16 %v5894_v24  ;;  %v5891_v51 = vunpack.i.h.bf16 %v5889_v48 }
 0x2bc   : > { %5513 = vmatpush3.bf16.xpose.msk.msra.mxu1 %vm7009_vm2, %v5508_v53  ;;  %v5890_v53 = vunpack.i.l.bf16 %v5889_v48 }
 0x2bd   : > { %5516 = vmatprep.subr.msk.bf16.mxu1 %vm7009_vm2, %v5514_v57  ;;  %v5538_v25 = vpack.c.bf16 %v5896_v59, %v5895_v61 }
 0x2be   : > { %v5899_v58 = vpop.permute.xlu1 %5898  ;;  %v5904_v30 = vpop.permute.xlu0 %5903  ;;  %v5532_v24 = vpack.c.bf16 %v5891_v51, %v5890_v53  ;;  %v7123_v53 = vld [vmem:[%s8785_s2 + $0x20] sm:$0xff] }
 0x2bf   : > { %v5901_v4 = vunpack.i.h.bf16 %v5899_v58  ;;  %v5900_v31 = vunpack.i.l.bf16 %v5899_v58  ;;  %v5906_v16 = vunpack.i.h.bf16 %v5904_v30  ;;  %v5905_v32 = vunpack.i.l.bf16 %v5904_v30  ;;  %5539 = vmatprep.subr.bf16.mxu0 %v5538_v25  ;;  %v7085_v30 = vld [vmem:[%s8785_s2 + $0x8] sm:$0xff] }
 0x2c0   : > { %5541 = vmatpush3.bf16.msra.mxu0 %v5538_v25 }
 0x2c1   : > { %v5542_v33 = vpack.c.bf16 %v5901_v4, %v5900_v31  ;;  %v5546_v63 = vpack.c.bf16 %v5906_v16, %v5905_v32  ;;  %v7090_v4 = vld [vmem:[%s8785_s2] sm:$0xff] }
 0x2c2   : > { %v5914_v6 = vpop.permute.xlu1 %5913  ;;  %v5909_v9 = vpop.permute.xlu0 %5908 }
 0x2c3   : > { %v5911_v60 = vunpack.i.h.bf16 %v5909_v9  ;;  %v5910_v13 = vunpack.i.l.bf16 %v5909_v9  ;;  %5543 = vmatprep.subr.bf16.mxu0 %v5542_v33  ;;  %v5916_v43 = vunpack.i.h.bf16 %v5914_v6  ;;  %v5915_v10 = vunpack.i.l.bf16 %v5914_v6 }
 0x2c4   : > { %5519 = vmatpush3.bf16.xpose.msk.msra.mxu1 %vm7009_vm2, %v5514_v57  ;;  %5545 = vmatpush3.bf16.msra.mxu0 %v5542_v33 }
 0x2c5   : > { %5522 = vmatprep.subr.msk.bf16.mxu1 %vm7009_vm2, %v5520_v7  ;;  %5547 = vmatprep.subr.bf16.mxu0 %v5546_v63  ;;  %v5550_v11 = vpack.c.bf16 %v5911_v60, %v5910_v13  ;;  %v5554_v17 = vpack.c.bf16 %v5916_v43, %v5915_v10 }
 0x2c6   : > { %v5919_v1 = vpop.permute.xlu1 %5918  ;;  %v5924_v47 = vpop.permute.xlu0 %5923 }
 0x2c7   : > { %v5921_v38 = vunpack.i.h.bf16 %v5919_v1  ;;  %v5920_v15 = vunpack.i.l.bf16 %v5919_v1  ;;  %v5926_v5 = vunpack.i.h.bf16 %v5924_v47  ;;  %v5925_v20 = vunpack.i.l.bf16 %v5924_v47 }
 0x2c8   : > { %5549 = vmatpush3.bf16.msra.mxu0 %v5546_v63 }
 0x2c9   : > { %5551 = vmatprep.subr.bf16.mxu0 %v5550_v11  ;;  %v5558_v22 = vpack.c.bf16 %v5921_v38, %v5920_v15  ;;  %v5562_v61 = vpack.c.bf16 %v5926_v5, %v5925_v20  ;;  %v7107_v15 = vld [vmem:[%s8785_s2 + $0x18] sm:$0xff]  ;;  %v7128_v5 = vld [vmem:[%s8785_s2 + $0x28] sm:$0xff] }
 0x2ca   : > { %v7035_v12 = vpop.permute.xlu1 %5938  ;;  %v5929_v25 = vpop.permute.xlu0 %5928 }
 0x2cb   : > { %v5931_v48 = vunpack.i.h.bf16 %v5929_v25  ;;  %v5930_v26 = vunpack.i.l.bf16 %v5929_v25 }
 0x2cc   : > { %5525 = vmatpush3.bf16.xpose.msk.msra.mxu1 %vm7009_vm2, %v5520_v7  ;;  %5553 = vmatpush3.bf16.msra.mxu0 %v5550_v11 }
 0x2cd   : > { %5528 = vmatprep.subr.msk.bf16.mxu1 %vm7009_vm2, %v5526_v14  ;;  %5555 = vmatprep.subr.bf16.mxu0 %v5554_v17  ;;  %v7045_v58 = vpack.c.bf16 %v5931_v48, %v5930_v26  ;;  %v7169_v48 = vld [vmem:[%s8785_s2 + $0x48] sm:$0xff] }
 0x2ce   : > { %v5944_v23 = vpop.permute.xlu1 %5943 }
 0x2cf   : > { %v5946_v57 = vunpack.i.h.bf16 %v5944_v23  ;;  %v5945_v59 = vunpack.i.l.bf16 %v5944_v23  ;;  %v7141_v23 = vld [vmem:[%s8785_s2 + $0x38] sm:$0xff] }
 0x2d0   : > { %5557 = vmatpush3.bf16.msra.mxu0 %v5554_v17  ;;  %v7112_v17 = vld [vmem:[%s8785_s2 + $0x10] sm:$0xff] }
 0x2d1   : > { %5559 = vmatprep.subr.bf16.mxu0 %v5558_v22  ;;  %v5566_v28 = vpack.c.bf16 %v5946_v57, %v5945_v59  ;;  %v7156_v59 = vld [vmem:[%s8785_s2 + $0x30] sm:$0xff] }
 0x2d4   : > { %5531 = vmatpush3.bf16.xpose.msk.msra.mxu1 %vm7009_vm2, %v5526_v14  ;;  %5561 = vmatpush3.bf16.msra.mxu0 %v5558_v22 }
 0x2d5   : > { %5534 = vmatprep.subr.msk.bf16.mxu1 %vm7009_vm2, %v5532_v24  ;;  %5563 = vmatprep.subr.bf16.mxu0 %v5562_v61 }
 0x2d8   : > { %5565 = vmatpush3.bf16.msra.mxu0 %v5562_v61 }
 0x2d9   : > { %5567 = vmatprep.subr.bf16.mxu0 %v5566_v28 }
 0x2dc   : > { %5537 = vmatpush3.bf16.xpose.msk.msra.mxu1 %vm7009_vm2, %v5532_v24  ;;  %5569 = vmatpush3.bf16.msra.mxu0 %v5566_v28  ;;  %v7146_v24 = vld [vmem:[%s8785_s2 + $0x60] sm:$0xff] }
 0x2dd   : > { %5572 = vmatprep.subr.msk.bf16.mxu0 %vm7009_vm2, %v7045_v58  ;;  %v7178_v28 = vld [vmem:[%s8785_s2 + $0x40] sm:$0xff] }
 0x2e3   : > { %5003 = vmatmul.mubr.msk.f32.vlgmr.msra.gmra.mrb[0].mxu1 %vm978_vm1, %v6911_v34 }
 0x2e4   : > { %5005 = vmatprep.mubr.msk.f32.mxu1 %vm978_vm1, %v6925_v45 }
 0x2e7   : > { %5006 = vmatmul.mubr.msk.f32.gmra.mrb[2].mxu1 %vm978_vm1, %v6923_v62 }
 0x2e8   : > { %5008 = vmatprep.mubr.msk.f32.mxu1 %vm978_vm1, %v6935_v40 }
 0x2eb   : > { %5009 = vmatmul.mubr.msk.f32.gmra.mrb[4].mxu1 %vm978_vm1, %v6933_v39 }
 0x2ec   : > { %5011 = vmatprep.mubr.msk.f32.mxu1 %vm978_vm1, %v6945_v44 }
 0x2ef   : > { %5012 = vmatmul.mubr.msk.f32.gmra.mrb[6].mxu1 %vm978_vm1, %v6943_v42 }
 0x2f0   : > { %5014 = vmatprep.mubr.msk.f32.mxu1 %vm978_vm1, %v6955_v27 }
 0x2f3   : > { %5015 = vmatmul.mubr.msk.f32.gmra.mrb[8].mxu1 %vm978_vm1, %v6953_v46 }
 0x2f4   : > { %5017 = vmatprep.mubr.msk.f32.mxu1 %vm978_vm1, %v6965_v50 }
 0x2f7   : > { %5018 = vmatmul.mubr.msk.f32.gmra.mrb[10].mxu1 %vm978_vm1, %v6963_v49 }
 0x2f8   : > { %5020 = vmatprep.mubr.msk.f32.mxu1 %vm978_vm1, %v6975_v54 }
 0x2fb   : > { %5021 = vmatmul.mubr.msk.f32.gmra.mrb[12].mxu1 %vm978_vm1, %v6973_v8 }
 0x2fc   : > { %5023 = vmatprep.mubr.msk.f32.mxu1 %vm978_vm1, %v6985_v35 }
 0x2ff   : > { %5024 = vmatmul.mubr.msk.f32.gmra.mrb[14].mxu1 %vm978_vm1, %v6983_v56 }
 0x3b6   : > { %v5004_v31 = vpop.f32.mrb[0].mxu1 }
 0x3b7   : > { %v7093_v16 = vadd.f32 %v5004_v31, %v7085_v30  ;;  %v1109_v32 = vpop.f32.mrb[1].mxu1 }
 0x3b8   : > { %v7096_v33 = vadd.f32 %v1109_v32, %v7090_v4  ;;  %v7187_v32 = vld [vmem:[%s8785_s2 + $0x58] sm:$0xff] }
 0x3b9   : > { %1190 = vmax.xlane.f32.xlu0 %v7093_v16 }
 0x3ba   : > { %v5007_v6 = vpop.f32.mrb[2].mxu1  ;;  %1188 = vmax.xlane.f32.xlu1 %v7096_v33 }
 0x3bb   : > { %v1119_v9 = vpop.f32.mrb[3].mxu1  ;;  %v7115_v47 = vadd.f32 %v5007_v6, %v7107_v15 }
 0x3bc   : > { %v7118_v51 = vadd.f32 %v1119_v9, %v7112_v17  ;;  %v7196_v9 = vld [vmem:[%s8785_s2 + $0x50] sm:$0xff] }
 0x3be   : > { %v5010_v7 = vpop.f32.mrb[4].mxu1 }
 0x3bf   : > { %v1129_v60 = vpop.f32.mrb[5].mxu1  ;;  %v7136_v22 = vadd.f32 %v5010_v7, %v7128_v5 }
 0x3c0   : > { %v7133_v20 = vadd.f32 %v1129_v60, %v7123_v53  ;;  %v7207_v60 = vld [vmem:[%s8785_s2 + $0x68] sm:$0xff] }
 0x3c2   : > { %v5013_v13 = vpop.f32.mrb[6].mxu1 }
 0x3c3   : > { %v1139_v63 = vpop.f32.mrb[7].mxu1  ;;  %v7151_v57 = vadd.f32 %v5013_v13, %v7141_v23 }
 0x3c4   : > { %v7164_v25 = vadd.f32 %v1139_v63, %v7156_v59  ;;  %v7218_v63 = vld [vmem:[%s8785_s2 + $0x70] sm:$0xff] }
 0x3c6   : > { %v5016_v0 = vpop.f32.mrb[8].mxu1 }
 0x3c7   : > { %v1149_v1 = vpop.f32.mrb[9].mxu1  ;;  %v7173_v26 = vadd.f32 %v5016_v0, %v7169_v48 }
 0x3c8   : > { %v7182_v31 = vadd.f32 %v1149_v1, %v7178_v28  ;;  %v7229_v1 = vld [vmem:[%s8785_s2 + $0x78] sm:$0xff] }
 0x3ca   : > { %v5019_v2 = vpop.f32.mrb[10].mxu1 }
 0x3cb   : > { %v1159_v43 = vpop.f32.mrb[11].mxu1  ;;  %5948 = vrot.lane.b32.xlu1 %v6949_v3, %s6536_s25  ;;  %v7191_v6 = vadd.f32 %v5019_v2, %v7187_v32 }
 0x3cc   : > { %v7200_v7 = vadd.f32 %v1159_v43, %v7196_v9  ;;  %v5934_v43 = vpop.permute.xlu0 %5933 }
 0x3ce   : > { %v5022_v10 = vpop.f32.mrb[12].mxu1 }
 0x3cf   : > { %5953 = vrot.lane.b32.xlu0 %v6959_v29, %s6536_s25  ;;  %v1169_v11 = vpop.f32.mrb[13].mxu1  ;;  %v7211_v13 = vadd.f32 %v5022_v10, %v7207_v60 }
 0x3d0   : > { %v7159_v61 = vadd.f32 %v1169_v11, %v7146_v24 }
 0x3d2   : > { %v5025_v14 = vpop.f32.mrb[14].mxu1 }
 0x3d3   : > { %v1179_v38 = vpop.f32.mrb[15].mxu1  ;;  %v7233_v2 = vadd.f32 %v5025_v14, %v7229_v1 }
 0x3d4   : > { %v7222_v0 = vadd.f32 %v1179_v38, %v7218_v63 }
 0x3ee   : > { %1194 = vmax.xlane.f32.xlu0 %v7115_v47 }
 0x3ef   : > { %1192 = vmax.xlane.f32.xlu1 %v7118_v51 }
 0x3f2   : > { %1196 = vmax.xlane.f32.xlu0 %v7133_v20 }
 0x3f3   : > { %1198 = vmax.xlane.f32.xlu1 %v7136_v22 }
 0x3f6   : > { %1202 = vmax.xlane.f32.xlu0 %v7151_v57 }
 0x3f7   : > { %1212 = vmax.xlane.f32.xlu1 %v7159_v61 }
 0x3fa   : > { %1200 = vmax.xlane.f32.xlu0 %v7164_v25 }
 0x3fe   : > { %1206 = vmax.xlane.f32.xlu0 %v7173_v26 }
 0x402   : > { %1204 = vmax.xlane.f32.xlu0 %v7182_v31 }
 0x406   : > { %1210 = vmax.xlane.f32.xlu0 %v7191_v6 }
 0x408   : > { %5958 = vrot.lane.b32.xlu1 %v6969_v52, %s6536_s25 }
 0x40a   : > { %1208 = vmax.xlane.f32.xlu0 %v7200_v7 }
 0x40c   : > { %5963 = vrot.lane.b32.xlu1 %v6979_v55, %s6536_s25 }
 0x40e   : > { %1214 = vmax.xlane.f32.xlu0 %v7211_v13 }
 0x410   : > { %5968 = vrot.lane.b32.xlu1 %v6989_v37, %s6536_s25  ;;  %s6538_s25 = smov 56  }
 0x412   : > { %1216 = vmax.xlane.f32.xlu0 %v7222_v0 }
 0x414   : > { %1541 = vrot.lane.b32.xlu1 %v6913_v19, %s6537_s26 }
 0x416   : > { %1218 = vmax.xlane.f32.xlu0 %v7233_v2 }
 0x418   : > { %1545 = vrot.lane.b32.xlu1 %v6925_v45, %s6537_s26 }
 0x41c   : > { %1547 = vrot.lane.b32.xlu1 %v6923_v62, %s6537_s26 }
 0x420   : > { %1549 = vrot.lane.b32.xlu1 %v6935_v40, %s6537_s26 }
 0x424   : > { %1551 = vrot.lane.b32.xlu1 %v6933_v39, %s6537_s26 }
 0x428   : > { %1553 = vrot.lane.b32.xlu1 %v6945_v44, %s6537_s26 }
 0x42c   : > { %1543 = vrot.lane.b32.xlu0 %v6911_v34, %s6537_s26  ;;  %1555 = vrot.lane.b32.xlu1 %v6943_v42, %s6537_s26 }
 0x430   : > { %1557 = vrot.lane.b32.xlu0 %v6955_v27, %s6537_s26  ;;  %1559 = vrot.lane.b32.xlu1 %v6953_v46, %s6537_s26 }
 0x434   : > { %1561 = vrot.lane.b32.xlu0 %v6965_v50, %s6537_s26  ;;  %1563 = vrot.lane.b32.xlu1 %v6963_v49, %s6537_s26 }
 0x438   : > { %1565 = vrot.lane.b32.xlu0 %v6975_v54, %s6537_s26  ;;  %1567 = vrot.lane.b32.xlu1 %v6973_v8, %s6537_s26 }
 0x43c   : > { %1569 = vrot.lane.b32.xlu0 %v6985_v35, %s6537_s26  ;;  %1571 = vrot.lane.b32.xlu1 %v6983_v56, %s6537_s26 }
 0x440   : > { %5973 = vrot.lane.b32.xlu0 %v6919_v18, %s6538_s25  ;;  %5978 = vrot.lane.b32.xlu1 %v6929_v21, %s6538_s25 }
 0x444   : > { %5983 = vrot.lane.b32.xlu0 %v6939_v41, %s6538_s25  ;;  %5993 = vrot.lane.b32.xlu1 %v6959_v29, %s6538_s25 }
 0x446   : > { %v1191_v10 = vpop.xlane.xlu0 %1190 }
 0x447   : > { %v1221_v11 = vsub.f32 %v7093_v16, %v1191_v10  ;;  %v1189_v14 = vpop.xlane.xlu1 %1188  ;;  %v5936_v16 = vunpack.i.h.bf16 %v5934_v43 }
 0x448   : > { %v1220_v38 = vsub.f32 %v7096_v33, %v1189_v14  ;;  %5988 = vrot.lane.b32.xlu0 %v6949_v3, %s6538_s25  ;;  %5998 = vrot.lane.b32.xlu1 %v6969_v52, %s6538_s25  ;;  %v5935_v33 = vunpack.i.l.bf16 %v5934_v43  ;;  %v5940_v43 = vunpack.i.l.bf16 %v7035_v12 }
 0x449   : > { %v1238_v56 = vmul.f32 1.442695, %v1221_v11 }
 0x44a   : > { %v1236_v35 = vmul.f32 1.442695, %v1220_v38  ;;  %v5576_v11 = vpack.c.bf16 %v5936_v16, %v5935_v33 }
 0x44b   : > { %v5949_v38 = vpop.permute.xlu1 %5948 }
 0x44c   : > { %6204 = vpow2.f32 %v1236_v35  ;;  %6003 = vrot.lane.b32.xlu0 %v6979_v55, %s6538_s25  ;;  %6008 = vrot.lane.b32.xlu1 %v6989_v37, %s6538_s25  ;;  %v5951_v16 = vunpack.i.h.bf16 %v5949_v38  ;;  %v5950_v33 = vunpack.i.l.bf16 %v5949_v38  ;;  %s8746_s25 = scalar_lea.vmem %s8794_s11, %s6619_s22 }
 0x44d   : > { %6206 = vpow2.f32 %v1238_v56  ;;  %v5941_v56 = vunpack.i.h.bf16 %v7035_v12 }
 0x44f   : > { %v5582_v14 = vpack.c.bf16 %v5941_v56, %v5940_v43 }
 0x450   : > { %6013 = vrot.lane.b32.xlu0 %v6919_v18, %s6539_s27  ;;  %6023 = vrot.lane.b32.xlu1 %v6939_v41, %s6539_s27 }
 0x454   : > { %6018 = vrot.lane.b32.xlu0 %v6929_v21, %s6539_s27 }
 0x456   : > { %v7268_v10 = vpop.eup %6204 }
 0x457   : > { %8840 = vst [vmem:[#allocation9_spill] sm:$0xff] %v7268_v10  ;;  %v7270_v35 = vpop.eup %6206  ;;  %5058 = vmatprep.mubr.f32.mxu0 %v7268_v10  ;;  %v5954_v10 = vpop.permute.xlu0 %5953 }
 0x458   : > { %8841 = vst [vmem:[#allocation10_spill] sm:$0xff] %v7270_v35  ;;  %5059 = vmatmul.mubr.f32.vlgmr.msra.gmra.mrb[16].mxu0 %v7270_v35  ;;  %v5588_v35 = vpack.c.bf16 %v5951_v16, %v5950_v33  ;;  %v5955_v12 = vunpack.i.l.bf16 %v5954_v10 }
 0x459   : > { %5575 = vmatpush3.bf16.xpose.msk.msra.mxu0 %vm7009_vm2, %v7045_v58  ;;  %v5956_v58 = vunpack.i.h.bf16 %v5954_v10 }
 0x45a   : > { %5578 = vmatprep.subr.msk.bf16.mxu0 %vm7009_vm2, %v5576_v11 }
 0x45b   : > { %v5594_v56 = vpack.c.bf16 %v5956_v58, %v5955_v12 }
 0x461   : > { %5581 = vmatpush3.bf16.xpose.msk.msra.mxu0 %vm7009_vm2, %v5576_v11 }
 0x462   : > { %5584 = vmatprep.subr.msk.bf16.mxu0 %vm7009_vm2, %v5582_v14 }
 0x469   : > { %5587 = vmatpush3.bf16.xpose.msk.msra.mxu0 %vm7009_vm2, %v5582_v14 }
 0x46a   : > { %5590 = vmatprep.subr.msk.bf16.mxu0 %vm7009_vm2, %v5588_v35 }
 0x471   : > { %5593 = vmatpush3.bf16.xpose.msk.msra.mxu0 %vm7009_vm2, %v5588_v35 }
 0x472   : > { %5596 = vmatprep.subr.msk.bf16.mxu0 %vm7009_vm2, %v5594_v56 }
 0x479   : > { %5599 = vmatpush3.bf16.xpose.msk.msra.mxu0 %vm7009_vm2, %v5594_v56 }
 0x47b   : > { %v1195_v11 = vpop.xlane.xlu0 %1194 }
 0x47c   : > { %v1223_v43 = vsub.f32 %v7115_v47, %v1195_v11  ;;  %v1193_v38 = vpop.xlane.xlu1 %1192 }
 0x47d   : > { %v1222_v14 = vsub.f32 %v7118_v51, %v1193_v38 }
 0x47e   : > { %v1242_v16 = vmul.f32 1.442695, %v1223_v43 }
 0x47f   : > { %v1240_v33 = vmul.f32 1.442695, %v1222_v14  ;;  %v1197_v41 = vpop.xlane.xlu0 %1196 }
 0x480   : > { %v1224_v10 = vsub.f32 %v7133_v20, %v1197_v41  ;;  %v1199_v58 = vpop.xlane.xlu1 %1198 }
 0x481   : > { %6208 = vpow2.f32 %v1240_v33  ;;  %v1225_v35 = vsub.f32 %v7136_v22, %v1199_v58 }
 0x482   : > { %6210 = vpow2.f32 %v1242_v16  ;;  %v1244_v12 = vmul.f32 1.442695, %v1224_v10 }
 0x483   : > { %v1246_v21 = vmul.f32 1.442695, %v1225_v35  ;;  %v1203_v18 = vpop.xlane.xlu0 %1202 }
 0x484   : > { %6212 = vpow2.f32 %v1244_v12  ;;  %v1213_v56 = vpop.xlane.xlu1 %1212  ;;  %v1227_v47 = vsub.f32 %v7151_v57, %v1203_v18 }
 0x485   : > { %6214 = vpow2.f32 %v1246_v21 }
 0x486   : > { %v1250_v38 = vmul.f32 1.442695, %v1227_v47 }
 0x487   : > { %v1201_v11 = vpop.xlane.xlu0 %1200 }
 0x488   : > { %v1226_v51 = vsub.f32 %v7164_v25, %v1201_v11  ;;  %v5959_v43 = vpop.permute.xlu1 %5958 }
 0x489   : > { %v5961_v14 = vunpack.i.h.bf16 %v5959_v43  ;;  %v5960_v41 = vunpack.i.l.bf16 %v5959_v43 }
 0x48a   : > { %v1248_v20 = vmul.f32 1.442695, %v1226_v51 }
 0x48b   : > { %v7301_v33 = vpop.eup %6208  ;;  %v5600_v22 = vpack.c.bf16 %v5961_v14, %v5960_v41  ;;  %v1207_v16 = vpop.xlane.xlu0 %1206 }
 0x48c   : > { %8842 = vst [vmem:[#allocation11_spill] sm:$0xff] %v7301_v33  ;;  %v7303_v10 = vpop.eup %6210  ;;  %6216 = vpow2.f32 %v1248_v20  ;;  %5061 = vmatprep.mubr.f32.mxu0 %v7301_v33  ;;  %v5964_v21 = vpop.permute.xlu1 %5963  ;;  %v1229_v18 = vsub.f32 %v7173_v26, %v1207_v16  ;;  %v7729_v33 = vld [vmem:[%s8785_s2 + $0x38] sm:$0xff] }
 0x48d   : > { %8843 = vst [vmem:[#allocation12_spill] sm:$0xff] %v7303_v10  ;;  %6218 = vpow2.f32 %v1250_v38  ;;  %v5966_v57 = vunpack.i.h.bf16 %v5964_v21  ;;  %v5965_v25 = vunpack.i.l.bf16 %v5964_v21  ;;  %5062 = vmatmul.mubr.f32.gmra.mrb[18].mxu0 %v7303_v10  ;;  %5602 = vmatprep.subr.msk.bf16.mxu0 %vm7009_vm2, %v5600_v22 }
 0x48e   : > { %v7310_v58 = vpop.eup %6212  ;;  %5605 = vmatpush3.bf16.xpose.msk.msra.mxu0 %vm7009_vm2, %v5600_v22  ;;  %v1254_v51 = vmul.f32 1.442695, %v1229_v18 }
 0x48f   : > { %8844 = vst [vmem:[#allocation13_spill] sm:$0xff] %v7310_v58  ;;  %v7314_v35 = vpop.eup %6214  ;;  %v5606_v12 = vpack.c.bf16 %v5966_v57, %v5965_v25  ;;  %v1205_v47 = vpop.xlane.xlu0 %1204  ;;  %5064 = vmatprep.mubr.f32.mxu0 %v7310_v58 }
 0x490   : > { %8845 = vst [vmem:[#allocation14_spill] sm:$0xff] %v7314_v35  ;;  %v1228_v26 = vsub.f32 %v7182_v31, %v1205_v47  ;;  %v5969_v11 = vpop.permute.xlu1 %5968  ;;  %v1232_v31 = vsub.f32 %v7159_v61, %v1213_v56 }
 0x491   : > { %v5971_v43 = vunpack.i.h.bf16 %v5969_v11  ;;  %v5970_v38 = vunpack.i.l.bf16 %v5969_v11  ;;  %5065 = vmatmul.mubr.f32.gmra.mrb[20].mxu0 %v7314_v35  ;;  %5608 = vmatprep.subr.msk.bf16.mxu0 %vm7009_vm2, %v5606_v12 }
 0x492   : > { %v1252_v14 = vmul.f32 1.442695, %v1228_v26  ;;  %v1260_v26 = vmul.f32 1.442695, %v1232_v31 }
 0x493   : > { %v1211_v41 = vpop.xlane.xlu0 %1210  ;;  %v5612_v22 = vpack.c.bf16 %v5971_v43, %v5970_v38 }
 0x494   : > { %6220 = vpow2.f32 %v1252_v14  ;;  %v1542_v20 = vpop.permute.xlu1 %1541  ;;  %v1231_v16 = vsub.f32 %v7191_v6, %v1211_v41 }
 0x495   : > { %6222 = vpow2.f32 %v1254_v51 }
 0x496   : > { %v7322_v21 = vpop.eup %6216  ;;  %5611 = vmatpush3.bf16.xpose.msk.msra.mxu0 %vm7009_vm2, %v5606_v12  ;;  %v1258_v47 = vmul.f32 1.442695, %v1231_v16 }
 0x497   : > { %8846 = vst [vmem:[#allocation15_spill] sm:$0xff] %v7322_v21  ;;  %v7327_v18 = vpop.eup %6218  ;;  %v1209_v57 = vpop.xlane.xlu0 %1208  ;;  %5067 = vmatprep.mubr.f32.mxu0 %v7322_v21  ;;  %5614 = vmatprep.subr.msk.bf16.mxu0 %vm7009_vm2, %v5612_v22 }
 0x498   : > { %8847 = vst [vmem:[#allocation16_spill] sm:$0xff] %v7327_v18  ;;  %v1230_v25 = vsub.f32 %v7200_v7, %v1209_v57  ;;  %5068 = vmatmul.mubr.f32.gmra.mrb[22].mxu0 %v7327_v18  ;;  %v1546_v6 = vpop.permute.xlu1 %1545 }
 0x49a   : > { %v1256_v11 = vmul.f32 1.442695, %v1230_v25 }
 0x49b   : > { %v1215_v61 = vpop.xlane.xlu0 %1214 }
 0x49c   : > { %6224 = vpow2.f32 %v1256_v11  ;;  %v1233_v56 = vsub.f32 %v7211_v13, %v1215_v61  ;;  %v1548_v12 = vpop.permute.xlu1 %1547 }
 0x49d   : > { %6226 = vpow2.f32 %v1258_v47 }
 0x49e   : > { %v7335_v51 = vpop.eup %6220  ;;  %6228 = vpow2.f32 %v1260_v26  ;;  %v1262_v43 = vmul.f32 1.442695, %v1233_v56  ;;  %5617 = vmatpush3.bf16.xpose.msk.msra.mxu0 %vm7009_vm2, %v5612_v22 }
 0x49f   : > { %8848 = vst [vmem:[#allocation17_spill] sm:$0xff] %v7335_v51  ;;  %v7339_v7 = vpop.eup %6222  ;;  %v1217_v38 = vpop.xlane.xlu0 %1216  ;;  %5070 = vmatprep.mubr.f32.mxu0 %v7335_v51 }
 0x4a0   : > { %8849 = vst [vmem:[#allocation18_spill] sm:$0xff] %v7339_v7  ;;  %6230 = vpow2.f32 %v1262_v43  ;;  %v1234_v14 = vsub.f32 %v7222_v0, %v1217_v38  ;;  %5071 = vmatmul.mubr.f32.gmra.mrb[24].mxu0 %v7339_v7  ;;  %v1550_v13 = vpop.permute.xlu1 %1549 }
 0x4a2   : > { %v1264_v41 = vmul.f32 1.442695, %v1234_v14 }
 0x4a3   : > { %v1219_v16 = vpop.xlane.xlu0 %1218 }
 0x4a4   : > { %6232 = vpow2.f32 %v1264_v41  ;;  %v1235_v31 = vsub.f32 %v7233_v2, %v1219_v16  ;;  %v1552_v57 = vpop.permute.xlu1 %1551 }
 0x4a6   : > { %v7345_v25 = vpop.eup %6224  ;;  %v1266_v22 = vmul.f32 1.442695, %v1235_v31 }
 0x4a7   : > { %8850 = vst [vmem:[#allocation19_spill] sm:$0xff] %v7345_v25  ;;  %v7347_v47 = vpop.eup %6226  ;;  %v1544_v26 = vpop.permute.xlu0 %1543  ;;  %5073 = vmatprep.mubr.f32.mxu0 %v7345_v25 }
 0x4a8   : > { %8851 = vst [vmem:[#allocation20_spill] sm:$0xff] %v7347_v47  ;;  %v7350_v11 = vpop.eup %6228  ;;  %6234 = vpow2.f32 %v1266_v22  ;;  %5074 = vmatmul.mubr.f32.gmra.mrb[26].mxu0 %v7347_v47  ;;  %v1554_v0 = vpop.permute.xlu1 %1553 }
 0x4a9   : > { %8852 = vst [vmem:[#allocation21_spill] sm:$0xff] %v7350_v11  ;;  %5076 = vmatprep.mubr.f32.mxu0 %v7350_v11 }
 0x4aa   : > { %v7354_v61 = vpop.eup %6230 }
 0x4ab   : > { %8853 = vst [vmem:[#allocation22_spill] sm:$0xff] %v7354_v61  ;;  %v1558_v2 = vpop.permute.xlu0 %1557 }
 0x4ac   : > { %5077 = vmatmul.mubr.f32.gmra.mrb[28].mxu0 %v7354_v61  ;;  %v1556_v56 = vpop.permute.xlu1 %1555 }
 0x4ae   : > { %v7357_v43 = vpop.eup %6232 }
 0x4af   : > { %8854 = vst [vmem:[#allocation23_spill] sm:$0xff] %v7357_v43  ;;  %v1562_v38 = vpop.permute.xlu0 %1561  ;;  %5079 = vmatprep.mubr.f32.mxu0 %v7357_v43 }
 0x4b0   : > { %v1560_v14 = vpop.permute.xlu1 %1559 }
 0x4b2   : > { %v7360_v41 = vpop.eup %6234 }
 0x4b3   : > { %8855 = vst [vmem:[#allocation24_spill] sm:$0xff] %v7360_v41  ;;  %v1566_v16 = vpop.permute.xlu0 %1565  ;;  %5080 = vmatmul.mubr.f32.gmra.mrb[30].mxu0 %v7360_v41 }
 0x4b4   : > { %5114 = vmatprep.mubr.msk.f32.mxu0 %vm978_vm1, %v1542_v20  ;;  %v1564_v31 = vpop.permute.xlu1 %1563 }
 0x4b7   : > { %v1570_v22 = vpop.permute.xlu0 %1569  ;;  %5115 = vmatmul.mubr.msk.f32.vlgmr.msra.gmra.mrb[32].mxu0 %vm978_vm1, %v1544_v26 }
 0x4b8   : > { %v1568_v47 = vpop.permute.xlu1 %1567  ;;  %5117 = vmatprep.mubr.msk.f32.mxu0 %vm978_vm1, %v1546_v6 }
 0x4bb   : > { %v5974_v61 = vpop.permute.xlu0 %5973  ;;  %5118 = vmatmul.mubr.msk.f32.gmra.mrb[34].mxu0 %vm978_vm1, %v1548_v12 }
 0x4bc   : > { %v5976_v7 = vunpack.i.h.bf16 %v5974_v61  ;;  %v5975_v18 = vunpack.i.l.bf16 %v5974_v61  ;;  %v1572_v35 = vpop.permute.xlu1 %1571  ;;  %5120 = vmatprep.mubr.msk.f32.mxu0 %vm978_vm1, %v1550_v13 }
 0x4be   : > { %v5618_v10 = vpack.c.bf16 %v5976_v7, %v5975_v18 }
 0x4bf   : > { %v5984_v43 = vpop.permute.xlu0 %5983  ;;  %5121 = vmatmul.mubr.msk.f32.gmra.mrb[36].mxu0 %vm978_vm1, %v1552_v57 }
 0x4c0   : > { %5619 = vmatprep.subr.bf16.mxu1 %v5618_v10  ;;  %v5979_v20 = vpop.permute.xlu1 %5978  ;;  %5123 = vmatprep.mubr.msk.f32.mxu0 %vm978_vm1, %v1554_v0  ;;  %v5986_v26 = vunpack.i.h.bf16 %v5984_v43  ;;  %v5985_v41 = vunpack.i.l.bf16 %v5984_v43 }
 0x4c1   : > { %v5981_v11 = vunpack.i.h.bf16 %v5979_v20  ;;  %v5980_v6 = vunpack.i.l.bf16 %v5979_v20  ;;  %5621 = vmatpush3.bf16.msra.mxu1 %v5618_v10 }
 0x4c2   : > { %v5626_v13 = vpack.c.bf16 %v5986_v26, %v5985_v41 }
 0x4c3   : > { %v5989_v25 = vpop.permute.xlu0 %5988  ;;  %5124 = vmatmul.mubr.msk.f32.gmra.mrb[38].mxu0 %vm978_vm1, %v1556_v56  ;;  %v5622_v12 = vpack.c.bf16 %v5981_v11, %v5980_v6 }
 0x4c4   : > { %v5994_v61 = vpop.permute.xlu1 %5993  ;;  %5126 = vmatprep.mubr.msk.f32.mxu0 %vm978_vm1, %v1558_v2  ;;  %v5991_v18 = vunpack.i.h.bf16 %v5989_v25  ;;  %v5990_v7 = vunpack.i.l.bf16 %v5989_v25 }
 0x4c5   : > { %5623 = vmatprep.subr.bf16.mxu1 %v5622_v12  ;;  %v5996_v57 = vunpack.i.h.bf16 %v5994_v61  ;;  %v5995_v0 = vunpack.i.l.bf16 %v5994_v61 }
 0x4c6   : > { %5625 = vmatpush3.bf16.msra.mxu1 %v5622_v12  ;;  %v5630_v10 = vpack.c.bf16 %v5991_v18, %v5990_v7 }
 0x4c7   : > { %5127 = vmatmul.mubr.msk.f32.gmra.mrb[40].mxu0 %vm978_vm1, %v1560_v14  ;;  %5627 = vmatprep.subr.bf16.mxu1 %v5626_v13  ;;  %v5634_v2 = vpack.c.bf16 %v5996_v57, %v5995_v0  ;;  %v6004_v56 = vpop.permute.xlu0 %6003 }
 0x4c8   : > { %5129 = vmatprep.mubr.msk.f32.mxu0 %vm978_vm1, %v1562_v38  ;;  %v5999_v43 = vpop.permute.xlu1 %5998  ;;  %v6006_v38 = vunpack.i.h.bf16 %v6004_v56  ;;  %v6005_v14 = vunpack.i.l.bf16 %v6004_v56 }
 0x4c9   : > { %v6001_v11 = vunpack.i.h.bf16 %v5999_v43  ;;  %v6000_v25 = vunpack.i.l.bf16 %v5999_v43 }
 0x4ca   : > { %5629 = vmatpush3.bf16.msra.mxu1 %v5626_v13  ;;  %v5642_v26 = vpack.c.bf16 %v6006_v38, %v6005_v14 }
 0x4cb   : > { %5130 = vmatmul.mubr.msk.f32.gmra.mrb[42].mxu0 %vm978_vm1, %v1564_v31  ;;  %5631 = vmatprep.subr.bf16.mxu1 %v5630_v10  ;;  %v5638_v41 = vpack.c.bf16 %v6001_v11, %v6000_v25  ;;  %v6014_v6 = vpop.permute.xlu0 %6013 }
 0x4cc   : > { %5132 = vmatprep.mubr.msk.f32.mxu0 %vm978_vm1, %v1566_v16  ;;  %v6009_v20 = vpop.permute.xlu1 %6008  ;;  %v6016_v12 = vunpack.i.h.bf16 %v6014_v6  ;;  %v6015_v61 = vunpack.i.l.bf16 %v6014_v6 }
 0x4cd   : > { %v6011_v31 = vunpack.i.h.bf16 %v6009_v20  ;;  %v6010_v16 = vunpack.i.l.bf16 %v6009_v20 }
 0x4ce   : > { %5633 = vmatpush3.bf16.msra.mxu1 %v5630_v10 }
 0x4cf   : > { %5133 = vmatmul.mubr.msk.f32.gmra.mrb[44].mxu0 %vm978_vm1, %v1568_v47  ;;  %5635 = vmatprep.subr.bf16.mxu1 %v5634_v2  ;;  %v5646_v47 = vpack.c.bf16 %v6011_v31, %v6010_v16 }
 0x4d0   : > { %5135 = vmatprep.mubr.msk.f32.mxu0 %vm978_vm1, %v1570_v22  ;;  %v7379_v22 = vpack.c.bf16 %v6016_v12, %v6015_v61 }
 0x4d2   : > { %5637 = vmatpush3.bf16.msra.mxu1 %v5634_v2 }
 0x4d3   : > { %5136 = vmatmul.mubr.msk.f32.gmra.mrb[46].mxu0 %vm978_vm1, %v1572_v35  ;;  %5639 = vmatprep.subr.bf16.mxu1 %v5638_v41 }
 0x4d6   : > { %5641 = vmatpush3.bf16.msra.mxu1 %v5638_v41 }
 0x4d7   : > { %5643 = vmatprep.subr.bf16.mxu1 %v5642_v26 }
 0x4da   : > { %5645 = vmatpush3.bf16.msra.mxu1 %v5642_v26 }
 0x4db   : > { %5647 = vmatprep.subr.bf16.mxu1 %v5646_v47 }
 0x4de   : > { %5649 = vmatpush3.bf16.msra.mxu1 %v5646_v47 }
 0x4df   : > { %5652 = vmatprep.subr.msk.bf16.mxu1 %vm7009_vm2, %v7379_v22 }
 0x52b   : > { %v7384_v35 = vpop.f32.mrb[16].mxu0 }
 0x52c   : > { %8856 = vst [vmem:[#allocation25_spill] sm:$0xff] %v7384_v35  ;;  %v7386_v18 = vpop.f32.mrb[17].mxu0 }
 0x52d   : > { %8857 = vst [vmem:[#allocation26_spill] sm:$0xff] %v7386_v18 }
 0x560   : > { %v7388_v7 = vpop.f32.mrb[18].mxu0 }
 0x561   : > { %8858 = vst [vmem:[#allocation27_spill] sm:$0xff] %v7388_v7  ;;  %v7390_v13 = vpop.f32.mrb[19].mxu0 }
 0x562   : > { %8859 = vst [vmem:[#allocation28_spill] sm:$0xff] %v7390_v13 }
 0x564   : > { %v7392_v57 = vpop.f32.mrb[20].mxu0 }
 0x565   : > { %8860 = vst [vmem:[#allocation29_spill] sm:$0xff] %v7392_v57  ;;  %v7394_v0 = vpop.f32.mrb[21].mxu0 }
 0x566   : > { %8861 = vst [vmem:[#allocation30_spill] sm:$0xff] %v7394_v0 }
 0x56b   : > { %v7396_v10 = vpop.f32.mrb[22].mxu0 }
 0x56c   : > { %8862 = vst [vmem:[#allocation31_spill] sm:$0xff] %v7396_v10  ;;  %v7398_v43 = vpop.f32.mrb[23].mxu0 }
 0x56d   : > { %8863 = vst [vmem:[#allocation32_spill] sm:$0xff] %v7398_v43 }
 0x573   : > { %v7400_v11 = vpop.f32.mrb[24].mxu0 }
 0x574   : > { %8864 = vst [vmem:[#allocation33_spill] sm:$0xff] %v7400_v11  ;;  %v7402_v25 = vpop.f32.mrb[25].mxu0 }
 0x575   : > { %8865 = vst [vmem:[#allocation34_spill] sm:$0xff] %v7402_v25 }
 0x57b   : > { %v7404_v2 = vpop.f32.mrb[26].mxu0 }
 0x57c   : > { %8866 = vst [vmem:[#allocation35_spill] sm:$0xff] %v7404_v2  ;;  %v7406_v56 = vpop.f32.mrb[27].mxu0 }
 0x57d   : > { %8867 = vst [vmem:[#allocation36_spill] sm:$0xff] %v7406_v56 }
 0x57f   : > { %v7408_v38 = vpop.f32.mrb[28].mxu0 }
 0x580   : > { %8868 = vst [vmem:[#allocation37_spill] sm:$0xff] %v7408_v38  ;;  %v7410_v14 = vpop.f32.mrb[29].mxu0 }
 0x581   : > { %8869 = vst [vmem:[#allocation38_spill] sm:$0xff] %v7410_v14 }
 0x586   : > { %v7412_v41 = vpop.f32.mrb[30].mxu0 }
 0x587   : > { %8870 = vst [vmem:[#allocation39_spill] sm:$0xff] %v7412_v41  ;;  %v7414_v20 = vpop.f32.mrb[31].mxu0 }
 0x588   : > { %8871 = vst [vmem:[#allocation40_spill] sm:$0xff] %v7414_v20 }
 0x58a   : > { %v5116_v31 = vpop.f32.mrb[32].mxu0 }
 0x58b   : > { %v7417_v16 = vadd.f32 %v5116_v31, %v7085_v30  ;;  %v1735_v26 = vpop.f32.mrb[33].mxu0 }
 0x58c   : > { %v7420_v6 = vadd.f32 %v1735_v26, %v7090_v4 }
 0x58d   : > { %1816 = vmax.xlane.f32.xlu0 %v7417_v16 }
 0x58e   : > { %v5119_v12 = vpop.f32.mrb[34].mxu0  ;;  %1814 = vmax.xlane.f32.xlu1 %v7420_v6 }
 0x58f   : > { %v1745_v61 = vpop.f32.mrb[35].mxu0  ;;  %v7429_v35 = vadd.f32 %v5119_v12, %v7107_v15 }
 0x590   : > { %v7432_v20 = vadd.f32 %v1745_v61, %v7112_v17 }
 0x592   : > { %v5122_v47 = vpop.f32.mrb[36].mxu0 }
 0x593   : > { %v1755_v38 = vpop.f32.mrb[37].mxu0  ;;  %v7440_v56 = vadd.f32 %v5122_v47, %v7128_v5 }
 0x594   : > { %v7437_v14 = vadd.f32 %v1755_v38, %v7123_v53 }
 0x596   : > { %v5125_v2 = vpop.f32.mrb[38].mxu0 }
 0x597   : > { %v1765_v11 = vpop.f32.mrb[39].mxu0  ;;  %v7445_v15 = vadd.f32 %v5125_v2, %v7141_v23 }
 0x598   : > { %v7453_v53 = vadd.f32 %v1765_v11, %v7156_v59 }
 0x59a   : > { %v5128_v10 = vpop.f32.mrb[40].mxu0 }
 0x59b   : > { %v1775_v57 = vpop.f32.mrb[41].mxu0  ;;  %v7457_v5 = vadd.f32 %v5128_v10, %v7169_v48  ;;  %v8876_v10 = vld [vmem:[#allocation6_spill] sm:$0xff] }
 0x59c   : > { %v7461_v23 = vadd.f32 %v1775_v57, %v7178_v28  ;;  %v6024_v57 = vpop.permute.xlu1 %6023 }
 0x59e   : > { %v5131_v7 = vpop.f32.mrb[42].mxu0 }
 0x59f   : > { %v1785_v41 = vpop.f32.mrb[43].mxu0  ;;  %6028 = vrot.lane.b32.xlu1 %v6949_v3, %s6539_s27 }
 0x5a0   : > { %v7469_v59 = vadd.f32 %v1785_v41, %v7196_v9  ;;  %v8872_v9 = vld [vmem:[#allocation8_spill] sm:$0xff] }
 0x5a2   : > { %v5134_v30 = vpop.f32.mrb[44].mxu0 }
 0x5a3   : > { %6033 = vrot.lane.b32.xlu0 %v6959_v29, %s6539_s27  ;;  %v1795_v4 = vpop.f32.mrb[45].mxu0  ;;  %v7475_v48 = vadd.f32 %v5134_v30, %v7207_v60  ;;  %v8873_v60 = vld [vmem:[#allocation7_spill] sm:$0xff] }
 0x5a4   : > { %v7448_v17 = vadd.f32 %v1795_v4, %v7146_v24  ;;  %v7465_v24 = vadd.f32 %v5131_v7, %v7187_v32  ;;  %v6019_v7 = vpop.permute.xlu0 %6018 }
 0x5a6   : > { %v5137_v31 = vpop.f32.mrb[46].mxu0 }
 0x5a7   : > { %v1805_v26 = vpop.f32.mrb[47].mxu0  ;;  %v7487_v32 = vadd.f32 %v5137_v31, %v7229_v1  ;;  %v8875_v1 = vld [vmem:[#allocation5_spill] sm:$0xff]  ;;  %v6026_v31 = vunpack.i.h.bf16 %v6024_v57 }
 0x5a8   : > { %v7481_v28 = vadd.f32 %v1805_v26, %v7218_v63  ;;  %v8874_v63 = vld [vmem:[#allocation4_spill] sm:$0xff]  ;;  %v6025_v26 = vunpack.i.l.bf16 %v6024_v57 }
 0x5c2   : > { %1820 = vmax.xlane.f32.xlu0 %v7429_v35 }
 0x5c3   : > { %1818 = vmax.xlane.f32.xlu1 %v7432_v20 }
 0x5c6   : > { %1822 = vmax.xlane.f32.xlu0 %v7437_v14 }
 0x5c7   : > { %1824 = vmax.xlane.f32.xlu1 %v7440_v56 }
 0x5ca   : > { %1828 = vmax.xlane.f32.xlu0 %v7445_v15 }
 0x5cb   : > { %1838 = vmax.xlane.f32.xlu1 %v7448_v17 }
 0x5ce   : > { %1826 = vmax.xlane.f32.xlu0 %v7453_v53 }
 0x5d2   : > { %1832 = vmax.xlane.f32.xlu0 %v7457_v5 }
 0x5d6   : > { %1830 = vmax.xlane.f32.xlu0 %v7461_v23 }
 0x5da   : > { %1836 = vmax.xlane.f32.xlu0 %v7465_v24 }
 0x5dc   : > { %6038 = vrot.lane.b32.xlu1 %v6969_v52, %s6539_s27 }
 0x5de   : > { %1834 = vmax.xlane.f32.xlu0 %v7469_v59 }
 0x5e0   : > { %6043 = vrot.lane.b32.xlu1 %v6979_v55, %s6539_s27 }
 0x5e2   : > { %1840 = vmax.xlane.f32.xlu0 %v7475_v48 }
 0x5e4   : > { %6048 = vrot.lane.b32.xlu1 %v6989_v37, %s6539_s27 }
 0x5e6   : > { %1842 = vmax.xlane.f32.xlu0 %v7481_v28 }
 0x5e8   : > { %2232 = vrot.lane.b32.xlu1 %v6913_v19, %s6540_s28 }
 0x5ea   : > { %1844 = vmax.xlane.f32.xlu0 %v7487_v32 }
 0x5ec   : > { %2236 = vrot.lane.b32.xlu1 %v6925_v45, %s6540_s28 }
 0x5f0   : > { %2238 = vrot.lane.b32.xlu1 %v6923_v62, %s6540_s28 }
 0x5f4   : > { %2240 = vrot.lane.b32.xlu1 %v6935_v40, %s6540_s28 }
 0x5f8   : > { %2242 = vrot.lane.b32.xlu1 %v6933_v39, %s6540_s28 }
 0x5fc   : > { %2244 = vrot.lane.b32.xlu1 %v6945_v44, %s6540_s28 }
 0x600   : > { %2234 = vrot.lane.b32.xlu0 %v6911_v34, %s6540_s28  ;;  %2246 = vrot.lane.b32.xlu1 %v6943_v42, %s6540_s28 }
 0x604   : > { %2248 = vrot.lane.b32.xlu0 %v6955_v27, %s6540_s28  ;;  %2250 = vrot.lane.b32.xlu1 %v6953_v46, %s6540_s28 }
 0x608   : > { %2252 = vrot.lane.b32.xlu0 %v6965_v50, %s6540_s28  ;;  %2254 = vrot.lane.b32.xlu1 %v6963_v49, %s6540_s28 }
 0x60c   : > { %2256 = vrot.lane.b32.xlu0 %v6975_v54, %s6540_s28  ;;  %2258 = vrot.lane.b32.xlu1 %v6973_v8, %s6540_s28 }
 0x610   : > { %2260 = vrot.lane.b32.xlu0 %v8872_v9, %s6540_s28  ;;  %2262 = vrot.lane.b32.xlu1 %v8873_v60, %s6540_s28 }
 0x614   : > { %6053 = vrot.lane.b32.xlu0 %v8874_v63, %s6541_s29  ;;  %6058 = vrot.lane.b32.xlu1 %v8875_v1, %s6541_s29 }
 0x618   : > { %6063 = vrot.lane.b32.xlu0 %v8876_v10, %s6541_s29  ;;  %6073 = vrot.lane.b32.xlu1 %v6959_v29, %s6541_s29 }
 0x61a   : > { %v1817_v11 = vpop.xlane.xlu0 %1816 }
 0x61b   : > { %v1847_v2 = vsub.f32 %v7417_v16, %v1817_v11  ;;  %v1815_v38 = vpop.xlane.xlu1 %1814  ;;  %v6021_v16 = vunpack.i.h.bf16 %v6019_v7 }
 0x61c   : > { %v1846_v41 = vsub.f32 %v7420_v6, %v1815_v38  ;;  %6068 = vrot.lane.b32.xlu0 %v6949_v3, %s6541_s29  ;;  %6078 = vrot.lane.b32.xlu1 %v6969_v52, %s6541_s29  ;;  %v6020_v6 = vunpack.i.l.bf16 %v6019_v7  ;;  %v5662_v7 = vpack.c.bf16 %v6026_v31, %v6025_v26 }
 0x61d   : > { %v1864_v12 = vmul.f32 1.442695, %v1847_v2 }
 0x61e   : > { %v1862_v61 = vmul.f32 1.442695, %v1846_v41  ;;  %v5656_v4 = vpack.c.bf16 %v6021_v16, %v6020_v6 }
 0x61f   : > { %v6029_v11 = vpop.permute.xlu1 %6028 }
 0x620   : > { %6236 = vpow2.f32 %v1862_v61  ;;  %6083 = vrot.lane.b32.xlu0 %v6979_v55, %s6541_s29  ;;  %6088 = vrot.lane.b32.xlu1 %v6989_v37, %s6541_s29  ;;  %v6031_v2 = vunpack.i.h.bf16 %v6029_v11  ;;  %v6030_v38 = vunpack.i.l.bf16 %v6029_v11 }
 0x621   : > { %6238 = vpow2.f32 %v1864_v12  ;;  %v6034_v12 = vpop.permute.xlu0 %6033 }
 0x622   : > { %v5668_v41 = vpack.c.bf16 %v6031_v2, %v6030_v38  ;;  %v6035_v57 = vunpack.i.l.bf16 %v6034_v12 }
 0x624   : > { %6093 = vrot.lane.b32.xlu0 %v8874_v63, %s6542_s30  ;;  %6103 = vrot.lane.b32.xlu1 %v8876_v10, %s6542_s30 }
 0x628   : > { %6098 = vrot.lane.b32.xlu0 %v8875_v1, %s6542_s30 }
 0x62a   : > { %v7522_v47 = vpop.eup %6236 }
 0x62b   : > { %v7524_v30 = vpop.eup %6238  ;;  %5170 = vmatprep.mubr.f32.mxu1 %v7522_v47 }
 0x62c   : > { %5171 = vmatmul.mubr.f32.vlgmr.msra.gmra.mrb[16].mxu1 %v7524_v30 }
 0x62d   : > { %5655 = vmatpush3.bf16.xpose.msk.msra.mxu1 %vm7009_vm2, %v7379_v22  ;;  %v6036_v22 = vunpack.i.h.bf16 %v6034_v12 }
 0x62e   : > { %5658 = vmatprep.subr.msk.bf16.mxu1 %vm7009_vm2, %v5656_v4 }
 0x62f   : > { %v5674_v61 = vpack.c.bf16 %v6036_v22, %v6035_v57 }
 0x635   : > { %5661 = vmatpush3.bf16.xpose.msk.msra.mxu1 %vm7009_vm2, %v5656_v4 }
 0x636   : > { %5664 = vmatprep.subr.msk.bf16.mxu1 %vm7009_vm2, %v5662_v7 }
 0x63d   : > { %5667 = vmatpush3.bf16.xpose.msk.msra.mxu1 %vm7009_vm2, %v5662_v7 }
 0x63e   : > { %5670 = vmatprep.subr.msk.bf16.mxu1 %vm7009_vm2, %v5668_v41 }
 0x645   : > { %5673 = vmatpush3.bf16.xpose.msk.msra.mxu1 %vm7009_vm2, %v5668_v41 }
 0x646   : > { %5676 = vmatprep.subr.msk.bf16.mxu1 %vm7009_vm2, %v5674_v61 }
 0x64d   : > { %5679 = vmatpush3.bf16.xpose.msk.msra.mxu1 %vm7009_vm2, %v5674_v61 }
 0x64f   : > { %v1821_v16 = vpop.xlane.xlu0 %1820 }
 0x650   : > { %v1849_v6 = vsub.f32 %v7429_v35, %v1821_v16  ;;  %v1819_v4 = vpop.xlane.xlu1 %1818 }
 0x651   : > { %v1848_v31 = vsub.f32 %v7432_v20, %v1819_v4 }
 0x652   : > { %v1868_v26 = vmul.f32 1.442695, %v1849_v6 }
 0x653   : > { %v1866_v7 = vmul.f32 1.442695, %v1848_v31  ;;  %v1823_v11 = vpop.xlane.xlu0 %1822 }
 0x654   : > { %v1850_v2 = vsub.f32 %v7437_v14, %v1823_v11  ;;  %v1825_v38 = vpop.xlane.xlu1 %1824 }
 0x655   : > { %6240 = vpow2.f32 %v1866_v7  ;;  %v1851_v41 = vsub.f32 %v7440_v56, %v1825_v38 }
 0x656   : > { %6242 = vpow2.f32 %v1868_v26  ;;  %v1870_v12 = vmul.f32 1.442695, %v1850_v2 }
 0x657   : > { %v1872_v22 = vmul.f32 1.442695, %v1851_v41  ;;  %v1829_v57 = vpop.xlane.xlu0 %1828 }
 0x658   : > { %6244 = vpow2.f32 %v1870_v12  ;;  %v1839_v61 = vpop.xlane.xlu1 %1838  ;;  %v1853_v35 = vsub.f32 %v7445_v15, %v1829_v57 }
 0x659   : > { %6246 = vpow2.f32 %v1872_v22 }
 0x65a   : > { %v1876_v4 = vmul.f32 1.442695, %v1853_v35 }
 0x65b   : > { %v1827_v16 = vpop.xlane.xlu0 %1826 }
 0x65c   : > { %v1852_v20 = vsub.f32 %v7453_v53, %v1827_v16  ;;  %v6039_v6 = vpop.permute.xlu1 %6038 }
 0x65d   : > { %v6041_v31 = vunpack.i.h.bf16 %v6039_v6  ;;  %v6040_v14 = vunpack.i.l.bf16 %v6039_v6 }
 0x65e   : > { %v1874_v11 = vmul.f32 1.442695, %v1852_v20 }
 0x65f   : > { %v7553_v7 = vpop.eup %6240  ;;  %v5680_v56 = vpack.c.bf16 %v6041_v31, %v6040_v14  ;;  %v1833_v26 = vpop.xlane.xlu0 %1832 }
 0x660   : > { %8877 = vst [vmem:[#allocation8_spill] sm:$0xff] %v7553_v7  ;;  %v7555_v2 = vpop.eup %6242  ;;  %6248 = vpow2.f32 %v1874_v11  ;;  %5173 = vmatprep.mubr.f32.mxu1 %v7553_v7  ;;  %v6044_v38 = vpop.permute.xlu1 %6043  ;;  %v1855_v15 = vsub.f32 %v7457_v5, %v1833_v26 }
 0x661   : > { %8878 = vst [vmem:[#allocation7_spill] sm:$0xff] %v7555_v2  ;;  %6250 = vpow2.f32 %v1876_v4  ;;  %v6046_v41 = vunpack.i.h.bf16 %v6044_v38  ;;  %v6045_v53 = vunpack.i.l.bf16 %v6044_v38  ;;  %5174 = vmatmul.mubr.f32.gmra.mrb[18].mxu1 %v7555_v2  ;;  %5682 = vmatprep.subr.msk.bf16.mxu1 %vm7009_vm2, %v5680_v56 }
 0x662   : > { %v7562_v12 = vpop.eup %6244  ;;  %5685 = vmatpush3.bf16.xpose.msk.msra.mxu1 %vm7009_vm2, %v5680_v56  ;;  %v1880_v20 = vmul.f32 1.442695, %v1855_v15 }
 0x663   : > { %v7566_v22 = vpop.eup %6246  ;;  %v5686_v57 = vpack.c.bf16 %v6046_v41, %v6045_v53  ;;  %v1831_v35 = vpop.xlane.xlu0 %1830  ;;  %5176 = vmatprep.mubr.f32.mxu1 %v7562_v12 }
 0x664   : > { %8879 = vst [vmem:[#allocation4_spill] sm:$0xff] %v7566_v22  ;;  %v1854_v5 = vsub.f32 %v7461_v23, %v1831_v35  ;;  %v6049_v16 = vpop.permute.xlu1 %6048  ;;  %v1858_v23 = vsub.f32 %v7448_v17, %v1839_v61 }
 0x665   : > { %v6051_v6 = vunpack.i.h.bf16 %v6049_v16  ;;  %v6050_v4 = vunpack.i.l.bf16 %v6049_v16  ;;  %5177 = vmatmul.mubr.f32.gmra.mrb[20].mxu1 %v7566_v22  ;;  %5688 = vmatprep.subr.msk.bf16.mxu1 %vm7009_vm2, %v5686_v57  ;;  %v7774_v22 = vld [vmem:[%s8785_s2 + $0x58] sm:$0xff] }
 0x666   : > { %v1878_v31 = vmul.f32 1.442695, %v1854_v5  ;;  %v1886_v5 = vmul.f32 1.442695, %v1858_v23 }
 0x667   : > { %v1837_v14 = vpop.xlane.xlu0 %1836  ;;  %v5692_v56 = vpack.c.bf16 %v6051_v6, %v6050_v4 }
 0x668   : > { %6252 = vpow2.f32 %v1878_v31  ;;  %v2233_v11 = vpop.permute.xlu1 %2232  ;;  %v1857_v26 = vsub.f32 %v7465_v24, %v1837_v14 }
 0x669   : > { %6254 = vpow2.f32 %v1880_v20 }
 0x66a   : > { %v7574_v38 = vpop.eup %6248  ;;  %5691 = vmatpush3.bf16.xpose.msk.msra.mxu1 %vm7009_vm2, %v5686_v57  ;;  %v1884_v35 = vmul.f32 1.442695, %v1857_v26 }
 0x66b   : > { %v7579_v15 = vpop.eup %6250  ;;  %v1835_v41 = vpop.xlane.xlu0 %1834  ;;  %5179 = vmatprep.mubr.f32.mxu1 %v7574_v38  ;;  %5694 = vmatprep.subr.msk.bf16.mxu1 %vm7009_vm2, %v5692_v56 }
 0x66c   : > { %8880 = vst [vmem:[#allocation5_spill] sm:$0xff] %v7579_v15  ;;  %v1856_v53 = vsub.f32 %v7469_v59, %v1835_v41  ;;  %5180 = vmatmul.mubr.f32.gmra.mrb[22].mxu1 %v7579_v15  ;;  %v2237_v24 = vpop.permute.xlu1 %2236  ;;  %v7756_v15 = vld [vmem:[%s8785_s2 + $0x48] sm:$0xff] }
 0x66e   : > { %v1882_v16 = vmul.f32 1.442695, %v1856_v53 }
 0x66f   : > { %v1841_v17 = vpop.xlane.xlu0 %1840 }
 0x670   : > { %6256 = vpow2.f32 %v1882_v16  ;;  %v1859_v61 = vsub.f32 %v7475_v48, %v1841_v17  ;;  %v2239_v57 = vpop.permute.xlu1 %2238 }
 0x671   : > { %6258 = vpow2.f32 %v1884_v35 }
 0x672   : > { %v7587_v20 = vpop.eup %6252  ;;  %6260 = vpow2.f32 %v1886_v5  ;;  %v1888_v6 = vmul.f32 1.442695, %v1859_v61  ;;  %5697 = vmatpush3.bf16.xpose.msk.msra.mxu1 %vm7009_vm2, %v5692_v56 }
 0x673   : > { %8881 = vst [vmem:[#allocation6_spill] sm:$0xff] %v7587_v20  ;;  %v7591_v59 = vpop.eup %6254  ;;  %v1843_v4 = vpop.xlane.xlu0 %1842  ;;  %5182 = vmatprep.mubr.f32.mxu1 %v7587_v20 }
 0x674   : > { %8882 = vst [vmem:[#allocation41_spill] sm:$0xff] %v7591_v59  ;;  %6262 = vpow2.f32 %v1888_v6  ;;  %v1860_v31 = vsub.f32 %v7481_v28, %v1843_v4  ;;  %5183 = vmatmul.mubr.f32.gmra.mrb[24].mxu1 %v7591_v59  ;;  %v2241_v48 = vpop.permute.xlu1 %2240  ;;  %v7737_v59 = vld [vmem:[%s8785_s2 + $0x60] sm:$0xff] }
 0x676   : > { %v1890_v14 = vmul.f32 1.442695, %v1860_v31 }
 0x677   : > { %v1845_v26 = vpop.xlane.xlu0 %1844 }
 0x678   : > { %6264 = vpow2.f32 %v1890_v14  ;;  %v1861_v23 = vsub.f32 %v7487_v32, %v1845_v26  ;;  %v2243_v41 = vpop.permute.xlu1 %2242 }
 0x67a   : > { %v7597_v53 = vpop.eup %6256  ;;  %v1892_v56 = vmul.f32 1.442695, %v1861_v23 }
 0x67b   : > { %8883 = vst [vmem:[#allocation42_spill] sm:$0xff] %v7597_v53  ;;  %v7599_v35 = vpop.eup %6258  ;;  %v2235_v5 = vpop.permute.xlu0 %2234  ;;  %5185 = vmatprep.mubr.f32.mxu1 %v7597_v53  ;;  %v7783_v53 = vld [vmem:[%s8785_s2 + $0x50] sm:$0xff] }
 0x67c   : > { %8884 = vst [vmem:[#allocation43_spill] sm:$0xff] %v7599_v35  ;;  %v7602_v16 = vpop.eup %6260  ;;  %6266 = vpow2.f32 %v1892_v56  ;;  %5186 = vmatmul.mubr.f32.gmra.mrb[26].mxu1 %v7599_v35  ;;  %v2245_v28 = vpop.permute.xlu1 %2244  ;;  %v7719_v35 = vld [vmem:[%s8785_s2 + $0x28] sm:$0xff] }
 0x67d   : > { %8885 = vst [vmem:[#allocation44_spill] sm:$0xff] %v7602_v16  ;;  %5188 = vmatprep.mubr.f32.mxu1 %v7602_v16  ;;  %v7765_v16 = vld [vmem:[%s8785_s2 + $0x40] sm:$0xff] }
 0x67e   : > { %v7606_v17 = vpop.eup %6262 }
 0x67f   : > { %8886 = vst [vmem:[#allocation45_spill] sm:$0xff] %v7606_v17  ;;  %v2249_v32 = vpop.permute.xlu0 %2248 }
 0x680   : > { %5189 = vmatmul.mubr.f32.gmra.mrb[28].mxu1 %v7606_v17  ;;  %v2247_v61 = vpop.permute.xlu1 %2246 }
 0x682   : > { %v7609_v6 = vpop.eup %6264 }
 0x683   : > { %8887 = vst [vmem:[#allocation46_spill] sm:$0xff] %v7609_v6  ;;  %v2253_v4 = vpop.permute.xlu0 %2252  ;;  %5191 = vmatprep.mubr.f32.mxu1 %v7609_v6  ;;  %v7747_v6 = vld [vmem:[%s8785_s2 + $0x30] sm:$0xff] }
 0x684   : > { %v2251_v31 = vpop.permute.xlu1 %2250 }
 0x686   : > { %v7612_v14 = vpop.eup %6266 }
 0x687   : > { %8888 = vst [vmem:[#allocation47_spill] sm:$0xff] %v7612_v14  ;;  %v2257_v26 = vpop.permute.xlu0 %2256  ;;  %5192 = vmatmul.mubr.f32.gmra.mrb[30].mxu1 %v7612_v14 }
 0x688   : > { %5226 = vmatprep.mubr.msk.f32.mxu1 %vm978_vm1, %v2233_v11  ;;  %v2255_v23 = vpop.permute.xlu1 %2254 }
 0x68b   : > { %v2261_v56 = vpop.permute.xlu0 %2260  ;;  %5227 = vmatmul.mubr.msk.f32.vlgmr.msra.gmra.mrb[32].mxu1 %vm978_vm1, %v2235_v5 }
 0x68c   : > { %v2259_v25 = vpop.permute.xlu1 %2258  ;;  %5229 = vmatprep.mubr.msk.f32.mxu1 %vm978_vm1, %v2237_v24 }
 0x68f   : > { %v6054_v43 = vpop.permute.xlu0 %6053  ;;  %5230 = vmatmul.mubr.msk.f32.gmra.mrb[34].mxu1 %vm978_vm1, %v2239_v57 }
 0x690   : > { %v6056_v0 = vunpack.i.h.bf16 %v6054_v43  ;;  %v6055_v13 = vunpack.i.l.bf16 %v6054_v43  ;;  %v2263_v18 = vpop.permute.xlu1 %2262  ;;  %5232 = vmatprep.mubr.msk.f32.mxu1 %vm978_vm1, %v2241_v48 }
 0x692   : > { %v5698_v51 = vpack.c.bf16 %v6056_v0, %v6055_v13 }
 0x693   : > { %v6064_v17 = vpop.permute.xlu0 %6063  ;;  %5233 = vmatmul.mubr.msk.f32.gmra.mrb[36].mxu1 %vm978_vm1, %v2243_v41 }
 0x694   : > { %5699 = vmatprep.subr.bf16.mxu0 %v5698_v51  ;;  %v6059_v11 = vpop.permute.xlu1 %6058  ;;  %5235 = vmatprep.mubr.msk.f32.mxu1 %vm978_vm1, %v2245_v28  ;;  %v6066_v5 = vunpack.i.h.bf16 %v6064_v17  ;;  %v6065_v14 = vunpack.i.l.bf16 %v6064_v17 }
 0x695   : > { %v6061_v21 = vunpack.i.h.bf16 %v6059_v11  ;;  %v6060_v24 = vunpack.i.l.bf16 %v6059_v11  ;;  %5701 = vmatpush3.bf16.msra.mxu0 %v5698_v51 }
 0x696   : > { %v5706_v48 = vpack.c.bf16 %v6066_v5, %v6065_v14 }
 0x697   : > { %v6069_v58 = vpop.permute.xlu0 %6068  ;;  %5236 = vmatmul.mubr.msk.f32.gmra.mrb[38].mxu1 %vm978_vm1, %v2247_v61  ;;  %v5702_v43 = vpack.c.bf16 %v6061_v21, %v6060_v24 }
 0x698   : > { %v6074_v57 = vpop.permute.xlu1 %6073  ;;  %5238 = vmatprep.mubr.msk.f32.mxu1 %vm978_vm1, %v2249_v32  ;;  %v6071_v13 = vunpack.i.h.bf16 %v6069_v58  ;;  %v6070_v0 = vunpack.i.l.bf16 %v6069_v58 }
 0x699   : > { %5703 = vmatprep.subr.bf16.mxu0 %v5702_v43  ;;  %v6076_v41 = vunpack.i.h.bf16 %v6074_v57  ;;  %v6075_v28 = vunpack.i.l.bf16 %v6074_v57 }
 0x69a   : > { %5705 = vmatpush3.bf16.msra.mxu0 %v5702_v43  ;;  %v5710_v51 = vpack.c.bf16 %v6071_v13, %v6070_v0 }
 0x69b   : > { %5239 = vmatmul.mubr.msk.f32.gmra.mrb[40].mxu1 %vm978_vm1, %v2251_v31  ;;  %5707 = vmatprep.subr.bf16.mxu0 %v5706_v48  ;;  %v5714_v32 = vpack.c.bf16 %v6076_v41, %v6075_v28  ;;  %v6084_v61 = vpop.permute.xlu0 %6083 }
 0x69c   : > { %5241 = vmatprep.mubr.msk.f32.mxu1 %vm978_vm1, %v2253_v4  ;;  %v6079_v17 = vpop.permute.xlu1 %6078  ;;  %v6086_v4 = vunpack.i.h.bf16 %v6084_v61  ;;  %v6085_v31 = vunpack.i.l.bf16 %v6084_v61 }
 0x69d   : > { %v6081_v21 = vunpack.i.h.bf16 %v6079_v17  ;;  %v6080_v58 = vunpack.i.l.bf16 %v6079_v17 }
 0x69e   : > { %5709 = vmatpush3.bf16.msra.mxu0 %v5706_v48  ;;  %v5722_v5 = vpack.c.bf16 %v6086_v4, %v6085_v31 }
 0x69f   : > { %5242 = vmatmul.mubr.msk.f32.gmra.mrb[42].mxu1 %vm978_vm1, %v2255_v23  ;;  %5711 = vmatprep.subr.bf16.mxu0 %v5710_v51  ;;  %v5718_v14 = vpack.c.bf16 %v6081_v21, %v6080_v58  ;;  %v6094_v24 = vpop.permute.xlu0 %6093 }
 0x6a0   : > { %5244 = vmatprep.mubr.msk.f32.mxu1 %vm978_vm1, %v2257_v26  ;;  %v6089_v11 = vpop.permute.xlu1 %6088  ;;  %v6096_v43 = vunpack.i.h.bf16 %v6094_v24  ;;  %v6095_v57 = vunpack.i.l.bf16 %v6094_v24 }
 0x6a1   : > { %v6091_v23 = vunpack.i.h.bf16 %v6089_v11  ;;  %v6090_v26 = vunpack.i.l.bf16 %v6089_v11 }
 0x6a2   : > { %5713 = vmatpush3.bf16.msra.mxu0 %v5710_v51 }
 0x6a3   : > { %5245 = vmatmul.mubr.msk.f32.gmra.mrb[44].mxu1 %vm978_vm1, %v2259_v25  ;;  %5715 = vmatprep.subr.bf16.mxu0 %v5714_v32  ;;  %v5726_v25 = vpack.c.bf16 %v6091_v23, %v6090_v26  ;;  %v7671_v26 = vld [vmem:[%s8785_s2 + $0x8] sm:$0xff] }
 0x6a4   : > { %5247 = vmatprep.mubr.msk.f32.mxu1 %vm978_vm1, %v2261_v56  ;;  %v7631_v56 = vpack.c.bf16 %v6096_v43, %v6095_v57  ;;  %v7679_v43 = vld [vmem:[%s8785_s2] sm:$0xff] }
 0x6a6   : > { %5717 = vmatpush3.bf16.msra.mxu0 %v5714_v32 }
 0x6a7   : > { %5248 = vmatmul.mubr.msk.f32.gmra.mrb[46].mxu1 %vm978_vm1, %v2263_v18  ;;  %5719 = vmatprep.subr.bf16.mxu0 %v5718_v14 }
 0x6aa   : > { %5721 = vmatpush3.bf16.msra.mxu0 %v5718_v14 }
 0x6ab   : > { %5723 = vmatprep.subr.bf16.mxu0 %v5722_v5 }
 0x6ae   : > { %5725 = vmatpush3.bf16.msra.mxu0 %v5722_v5 }
 0x6af   : > { %5727 = vmatprep.subr.bf16.mxu0 %v5726_v25 }
 0x6b2   : > { %5729 = vmatpush3.bf16.msra.mxu0 %v5726_v25 }
 0x6b3   : > { %5732 = vmatprep.subr.msk.bf16.mxu0 %vm7009_vm2, %v7631_v56 }
 0x6ff   : > { %v7636_v18 = vpop.f32.mrb[16].mxu1 }
 0x700   : > { %8889 = vst [vmem:[#allocation48_spill] sm:$0xff] %v7636_v18  ;;  %v7638_v13 = vpop.f32.mrb[17].mxu1 }
 0x701   : > { %8890 = vst [vmem:[#allocation49_spill] sm:$0xff] %v7638_v13  ;;  %v7711_v13 = vld [vmem:[%s8785_s2 + $0x20] sm:$0xff] }
 0x734   : > { %v7640_v0 = vpop.f32.mrb[18].mxu1 }
 0x735   : > { %8891 = vst [vmem:[#allocation50_spill] sm:$0xff] %v7640_v0  ;;  %v7642_v48 = vpop.f32.mrb[19].mxu1 }
 0x736   : > { %8892 = vst [vmem:[#allocation51_spill] sm:$0xff] %v7642_v48  ;;  %v7701_v48 = vld [vmem:[%s8785_s2 + $0x10] sm:$0xff] }
 0x738   : > { %v7644_v41 = vpop.f32.mrb[20].mxu1 }
 0x739   : > { %8893 = vst [vmem:[#allocation52_spill] sm:$0xff] %v7644_v41  ;;  %v7646_v28 = vpop.f32.mrb[21].mxu1 }
 0x73a   : > { %8894 = vst [vmem:[#allocation53_spill] sm:$0xff] %v7646_v28  ;;  %v7693_v28 = vld [vmem:[%s8785_s2 + $0x18] sm:$0xff] }
 0x73f   : > { %v7648_v51 = vpop.f32.mrb[22].mxu1 }
 0x740   : > { %8895 = vst [vmem:[#allocation54_spill] sm:$0xff] %v7648_v51  ;;  %v7650_v17 = vpop.f32.mrb[23].mxu1 }
 0x741   : > { %8896 = vst [vmem:[#allocation55_spill] sm:$0xff] %v7650_v17 }
 0x747   : > { %v7652_v21 = vpop.f32.mrb[24].mxu1 }
 0x748   : > { %8897 = vst [vmem:[#allocation56_spill] sm:$0xff] %v7652_v21  ;;  %v7654_v58 = vpop.f32.mrb[25].mxu1 }
 0x749   : > { %8898 = vst [vmem:[#allocation57_spill] sm:$0xff] %v7654_v58 }
 0x74f   : > { %v7656_v32 = vpop.f32.mrb[26].mxu1 }
 0x750   : > { %8899 = vst [vmem:[#allocation58_spill] sm:$0xff] %v7656_v32  ;;  %v7658_v61 = vpop.f32.mrb[27].mxu1 }
 0x751   : > { %8900 = vst [vmem:[#allocation59_spill] sm:$0xff] %v7658_v61 }
 0x753   : > { %v7660_v4 = vpop.f32.mrb[28].mxu1 }
 0x754   : > { %8901 = vst [vmem:[#allocation60_spill] sm:$0xff] %v7660_v4  ;;  %v7662_v31 = vpop.f32.mrb[29].mxu1 }
 0x755   : > { %8902 = vst [vmem:[#allocation61_spill] sm:$0xff] %v7662_v31 }
 0x75a   : > { %v7664_v14 = vpop.f32.mrb[30].mxu1 }
 0x75b   : > { %8903 = vst [vmem:[#allocation62_spill] sm:$0xff] %v7664_v14  ;;  %v7666_v11 = vpop.f32.mrb[31].mxu1 }
 0x75c   : > { %8904 = vst [vmem:[#allocation63_spill] sm:$0xff] %v7666_v11 }
 0x75e   : > { %v5228_v23 = vpop.f32.mrb[32].mxu1 }
 0x75f   : > { %v7674_v5 = vadd.f32 %v7671_v26, %v5228_v23  ;;  %v2426_v24 = vpop.f32.mrb[33].mxu1 }
 0x760   : > { %v7682_v57 = vadd.f32 %v7679_v43, %v2426_v24 }
 0x761   : > { %2507 = vmax.xlane.f32.xlu0 %v7674_v5 }
 0x762   : > { %v5231_v25 = vpop.f32.mrb[34].mxu1  ;;  %2505 = vmax.xlane.f32.xlu1 %v7682_v57 }
 0x763   : > { %v2436_v14 = vpop.f32.mrb[35].mxu1  ;;  %v7696_v0 = vadd.f32 %v7693_v28, %v5231_v25 }
 0x764   : > { %v7704_v18 = vadd.f32 %v7701_v48, %v2436_v14 }
 0x766   : > { %v5234_v4 = vpop.f32.mrb[36].mxu1 }
 0x767   : > { %v2446_v32 = vpop.f32.mrb[37].mxu1  ;;  %v7722_v14 = vadd.f32 %v7719_v35, %v5234_v4 }
 0x768   : > { %v7714_v25 = vadd.f32 %v7711_v13, %v2446_v32 }
 0x76a   : > { %v5237_v11 = vpop.f32.mrb[38].mxu1 }
 0x76b   : > { %v2456_v23 = vpop.f32.mrb[39].mxu1  ;;  %v7732_v32 = vadd.f32 %v7729_v33, %v5237_v11 }
 0x76c   : > { %v7750_v11 = vadd.f32 %v7747_v6, %v2456_v23 }
 0x76e   : > { %v5240_v31 = vpop.f32.mrb[40].mxu1 }
 0x76f   : > { %v2466_v61 = vpop.f32.mrb[41].mxu1 }
 0x770   : > { %v7768_v23 = vadd.f32 %v7765_v16, %v2466_v61 }
 0x772   : > { %v5243_v21 = vpop.f32.mrb[42].mxu1 }
 0x773   : > { %v2476_v58 = vpop.f32.mrb[43].mxu1  ;;  %6108 = vrot.lane.b32.xlu1 %v6949_v3, %s6542_s30 }
 0x774   : > { %v7786_v61 = vadd.f32 %v7783_v53, %v2476_v58  ;;  %v7805_v58 = vld [vmem:[%s8785_s2 + $0x70] sm:$0xff] }
 0x776   : > { %v5246_v51 = vpop.f32.mrb[44].mxu1 }
 0x777   : > { %6113 = vrot.lane.b32.xlu0 %v6959_v29, %s6542_s30  ;;  %v2486_v24 = vpop.f32.mrb[45].mxu1 }
 0x778   : > { %v7740_v4 = vadd.f32 %v7737_v59, %v2486_v24  ;;  %v7759_v24 = vadd.f32 %v7756_v15, %v5240_v31  ;;  %v7777_v31 = vadd.f32 %v7774_v22, %v5243_v21  ;;  %v7794_v21 = vld [vmem:[%s8785_s2 + $0x68] sm:$0xff] }
 0x779   : > { %v7797_v2 = vadd.f32 %v7794_v21, %v5246_v51  ;;  %v7816_v51 = vld [vmem:[%s8785_s2 + $0x78] sm:$0xff] }
 0x77a   : > { %v5249_v17 = vpop.f32.mrb[46].mxu1 }
 0x77b   : > { %v2496_v41 = vpop.f32.mrb[47].mxu1  ;;  %v7819_v20 = vadd.f32 %v7816_v51, %v5249_v17 }
 0x77c   : > { %v7808_v7 = vadd.f32 %v7805_v58, %v2496_v41 }
 0x796   : > { %2511 = vmax.xlane.f32.xlu0 %v7696_v0 }
 0x797   : > { %2509 = vmax.xlane.f32.xlu1 %v7704_v18 }
 0x79a   : > { %2513 = vmax.xlane.f32.xlu0 %v7714_v25 }
 0x79b   : > { %2515 = vmax.xlane.f32.xlu1 %v7722_v14 }
 0x79e   : > { %2519 = vmax.xlane.f32.xlu0 %v7732_v32 }
 0x79f   : > { %2529 = vmax.xlane.f32.xlu1 %v7740_v4 }
 0x7a2   : > { %2517 = vmax.xlane.f32.xlu0 %v7750_v11 }
 0x7a6   : > { %2523 = vmax.xlane.f32.xlu0 %v7759_v24 }
 0x7aa   : > { %2521 = vmax.xlane.f32.xlu0 %v7768_v23 }
 0x7ae   : > { %2527 = vmax.xlane.f32.xlu0 %v7777_v31 }
 0x7b0   : > { %6118 = vrot.lane.b32.xlu1 %v6969_v52, %s6542_s30 }
 0x7b2   : > { %2525 = vmax.xlane.f32.xlu0 %v7786_v61 }
 0x7b4   : > { %6123 = vrot.lane.b32.xlu1 %v6979_v55, %s6542_s30 }
 0x7b6   : > { %2531 = vmax.xlane.f32.xlu0 %v7797_v2 }
 0x7b8   : > { %6128 = vrot.lane.b32.xlu1 %v6989_v37, %s6542_s30  ;;  %s6544_s30 = smov 40  }
 0x7ba   : > { %2533 = vmax.xlane.f32.xlu0 %v7808_v7 }
 0x7bc   : > { %2923 = vrot.lane.b32.xlu1 %v6913_v19, %s6543_s12  ;;  %v6104_v19 = vpop.permute.xlu1 %6103 }
 0x7be   : > { %2535 = vmax.xlane.f32.xlu0 %v7819_v20 }
 0x7c0   : > { %2927 = vrot.lane.b32.xlu1 %v6925_v45, %s6543_s12 }
 0x7c4   : > { %2929 = vrot.lane.b32.xlu1 %v6923_v62, %s6543_s12 }
 0x7c8   : > { %2931 = vrot.lane.b32.xlu1 %v6935_v40, %s6543_s12 }
 0x7cc   : > { %2933 = vrot.lane.b32.xlu1 %v6933_v39, %s6543_s12 }
 0x7d0   : > { %2935 = vrot.lane.b32.xlu1 %v6945_v44, %s6543_s12 }
 0x7d4   : > { %2925 = vrot.lane.b32.xlu0 %v6911_v34, %s6543_s12  ;;  %2937 = vrot.lane.b32.xlu1 %v6943_v42, %s6543_s12  ;;  %v6099_v34 = vpop.permute.xlu0 %6098 }
 0x7d8   : > { %2939 = vrot.lane.b32.xlu0 %v6955_v27, %s6543_s12  ;;  %2941 = vrot.lane.b32.xlu1 %v6953_v46, %s6543_s12  ;;  %v6101_v46 = vunpack.i.h.bf16 %v6099_v34  ;;  %v6100_v27 = vunpack.i.l.bf16 %v6099_v34 }
 0x7dc   : > { %2943 = vrot.lane.b32.xlu0 %v6965_v50, %s6543_s12  ;;  %2945 = vrot.lane.b32.xlu1 %v6963_v49, %s6543_s12  ;;  %v5736_v50 = vpack.c.bf16 %v6101_v46, %v6100_v27 }
 0x7e0   : > { %2947 = vrot.lane.b32.xlu0 %v6975_v54, %s6543_s12  ;;  %2949 = vrot.lane.b32.xlu1 %v6973_v8, %s6543_s12 }
 0x7e4   : > { %2951 = vrot.lane.b32.xlu0 %v8872_v9, %s6543_s12  ;;  %2953 = vrot.lane.b32.xlu1 %v8873_v60, %s6543_s12 }
 0x7e8   : > { %6133 = vrot.lane.b32.xlu0 %v8874_v63, %s6544_s30  ;;  %6143 = vrot.lane.b32.xlu1 %v8876_v10, %s6544_s30 }
 0x7ec   : > { %6138 = vrot.lane.b32.xlu0 %v8875_v1, %s6544_s30  ;;  %6153 = vrot.lane.b32.xlu1 %v6959_v29, %s6544_s30 }
 0x7ee   : > { %v2508_v62 = vpop.xlane.xlu0 %2507 }
 0x7ef   : > { %v2538_v45 = vsub.f32 %v7674_v5, %v2508_v62  ;;  %v2506_v39 = vpop.xlane.xlu1 %2505 }
 0x7f0   : > { %v2537_v40 = vsub.f32 %v7682_v57, %v2506_v39  ;;  %6148 = vrot.lane.b32.xlu0 %v6949_v3, %s6544_s30  ;;  %6158 = vrot.lane.b32.xlu1 %v6969_v52, %s6544_s30  ;;  %v6106_v3 = vunpack.i.h.bf16 %v6104_v19  ;;  %v6105_v52 = vunpack.i.l.bf16 %v6104_v19 }
 0x7f1   : > { %v2555_v42 = vmul.f32 1.442695, %v2538_v45 }
 0x7f2   : > { %v2553_v44 = vmul.f32 1.442695, %v2537_v40  ;;  %v5742_v8 = vpack.c.bf16 %v6106_v3, %v6105_v52  ;;  %v6114_v60 = vpop.permute.xlu0 %6113 }
 0x7f3   : > { %v6109_v54 = vpop.permute.xlu1 %6108  ;;  %v6116_v63 = vunpack.i.h.bf16 %v6114_v60  ;;  %v6115_v1 = vunpack.i.l.bf16 %v6114_v60 }
 0x7f4   : > { %6268 = vpow2.f32 %v2553_v44  ;;  %6163 = vrot.lane.b32.xlu0 %v6979_v55, %s6544_s30  ;;  %6168 = vrot.lane.b32.xlu1 %v6989_v37, %s6544_s30  ;;  %v6111_v55 = vunpack.i.h.bf16 %v6109_v54  ;;  %v6110_v37 = vunpack.i.l.bf16 %v6109_v54 }
 0x7f5   : > { %6270 = vpow2.f32 %v2555_v42  ;;  %v5754_v10 = vpack.c.bf16 %v6116_v63, %v6115_v1 }
 0x7f6   : > { %v5748_v9 = vpack.c.bf16 %v6111_v55, %v6110_v37 }
 0x7fe   : > { %v7848_v29 = vpop.eup %6268 }
 0x7ff   : > { %v7850_v49 = vpop.eup %6270  ;;  %5282 = vmatprep.mubr.f32.mxu0 %v7848_v29 }
 0x800   : > { %5283 = vmatmul.mubr.f32.vlgmr.msra.gmra.mrb[48].mxu0 %v7850_v49 }
 0x801   : > { %5735 = vmatpush3.bf16.xpose.msk.msra.mxu0 %vm7009_vm2, %v7631_v56 }
 0x802   : > { %5738 = vmatprep.subr.msk.bf16.mxu0 %vm7009_vm2, %v5736_v50 }
 0x809   : > { %5741 = vmatpush3.bf16.xpose.msk.msra.mxu0 %vm7009_vm2, %v5736_v50 }
 0x80a   : > { %5744 = vmatprep.subr.msk.bf16.mxu0 %vm7009_vm2, %v5742_v8 }
 0x811   : > { %5747 = vmatpush3.bf16.xpose.msk.msra.mxu0 %vm7009_vm2, %v5742_v8 }
 0x812   : > { %5750 = vmatprep.subr.msk.bf16.mxu0 %vm7009_vm2, %v5748_v9 }
 0x813   : > { %1894 = vadd.xlane.f32.xlu0 %v7522_v47 }
 0x819   : > { %5753 = vmatpush3.bf16.xpose.msk.msra.mxu0 %vm7009_vm2, %v5748_v9 }
 0x81a   : > { %5756 = vmatprep.subr.msk.bf16.mxu0 %vm7009_vm2, %v5754_v10 }
 0x821   : > { %5759 = vmatpush3.bf16.xpose.msk.msra.mxu0 %vm7009_vm2, %v5754_v10 }
 0x823   : > { %v2512_v56 = vpop.xlane.xlu0 %2511 }
 0x824   : > { %v2540_v41 = vsub.f32 %v7696_v0, %v2512_v56  ;;  %v2510_v17 = vpop.xlane.xlu1 %2509 }
 0x825   : > { %v2539_v5 = vsub.f32 %v7704_v18, %v2510_v17 }
 0x826   : > { %v2559_v57 = vmul.f32 1.442695, %v2540_v41 }
 0x827   : > { %v2557_v47 = vmul.f32 1.442695, %v2539_v5  ;;  %v2514_v34 = vpop.xlane.xlu0 %2513 }
 0x828   : > { %v2541_v19 = vsub.f32 %v7714_v25, %v2514_v34  ;;  %v2516_v62 = vpop.xlane.xlu1 %2515 }
 0x829   : > { %6272 = vpow2.f32 %v2557_v47  ;;  %v2542_v45 = vsub.f32 %v7722_v14, %v2516_v62 }
 0x82a   : > { %6274 = vpow2.f32 %v2559_v57  ;;  %v2561_v39 = vmul.f32 1.442695, %v2541_v19 }
 0x82b   : > { %v2563_v40 = vmul.f32 1.442695, %v2542_v45  ;;  %v2520_v42 = vpop.xlane.xlu0 %2519 }
 0x82c   : > { %6276 = vpow2.f32 %v2561_v39  ;;  %v2530_v44 = vpop.xlane.xlu1 %2529  ;;  %v2544_v0 = vsub.f32 %v7732_v32, %v2520_v42 }
 0x82d   : > { %6278 = vpow2.f32 %v2563_v40 }
 0x82e   : > { %v2567_v50 = vmul.f32 1.442695, %v2544_v0 }
 0x82f   : > { %v2518_v46 = vpop.xlane.xlu0 %2517 }
 0x830   : > { %v2543_v18 = vsub.f32 %v7750_v11, %v2518_v46  ;;  %v6119_v27 = vpop.permute.xlu1 %6118 }
 0x831   : > { %v6121_v3 = vunpack.i.h.bf16 %v6119_v27  ;;  %v6120_v25 = vunpack.i.l.bf16 %v6119_v27 }
 0x832   : > { %v2565_v52 = vmul.f32 1.442695, %v2543_v18 }
 0x833   : > { %v7880_v8 = vpop.eup %6272  ;;  %v5760_v14 = vpack.c.bf16 %v6121_v3, %v6120_v25  ;;  %v2524_v54 = vpop.xlane.xlu0 %2523 }
 0x834   : > { %v7882_v55 = vpop.eup %6274  ;;  %6280 = vpow2.f32 %v2565_v52  ;;  %5285 = vmatprep.mubr.f32.mxu0 %v7880_v8  ;;  %v6124_v37 = vpop.permute.xlu1 %6123  ;;  %v2546_v32 = vsub.f32 %v7759_v24, %v2524_v54 }
 0x835   : > { %6282 = vpow2.f32 %v2567_v50  ;;  %v6126_v9 = vunpack.i.h.bf16 %v6124_v37  ;;  %v6125_v11 = vunpack.i.l.bf16 %v6124_v37  ;;  %5286 = vmatmul.mubr.f32.gmra.mrb[50].mxu0 %v7882_v55  ;;  %5762 = vmatprep.subr.msk.bf16.mxu0 %vm7009_vm2, %v5760_v14 }
 0x836   : > { %v7889_v60 = vpop.eup %6276  ;;  %5765 = vmatpush3.bf16.xpose.msk.msra.mxu0 %vm7009_vm2, %v5760_v14  ;;  %v2571_v41 = vmul.f32 1.442695, %v2546_v32 }
 0x837   : > { %v7893_v63 = vpop.eup %6278  ;;  %v5766_v1 = vpack.c.bf16 %v6126_v9, %v6125_v11  ;;  %v2522_v10 = vpop.xlane.xlu0 %2521  ;;  %5288 = vmatprep.mubr.f32.mxu0 %v7889_v60 }
 0x838   : > { %v2545_v24 = vsub.f32 %v7768_v23, %v2522_v10  ;;  %v6129_v56 = vpop.permute.xlu1 %6128  ;;  %v2549_v23 = vsub.f32 %v7740_v4, %v2530_v44 }
 0x839   : > { %v6131_v17 = vunpack.i.h.bf16 %v6129_v56  ;;  %v6130_v5 = vunpack.i.l.bf16 %v6129_v56  ;;  %5289 = vmatmul.mubr.f32.gmra.mrb[52].mxu0 %v7893_v63  ;;  %5768 = vmatprep.subr.msk.bf16.mxu0 %vm7009_vm2, %v5766_v1 }
 0x83a   : > { %v2569_v57 = vmul.f32 1.442695, %v2545_v24  ;;  %v2577_v46 = vmul.f32 1.442695, %v2549_v23 }
 0x83b   : > { %v2528_v47 = vpop.xlane.xlu0 %2527  ;;  %v5772_v19 = vpack.c.bf16 %v6131_v17, %v6130_v5 }
 0x83c   : > { %6284 = vpow2.f32 %v2569_v57  ;;  %v2924_v34 = vpop.permute.xlu1 %2923  ;;  %v2548_v62 = vsub.f32 %v7777_v31, %v2528_v47 }
 0x83d   : > { %6286 = vpow2.f32 %v2571_v41 }
 0x83e   : > { %v7901_v45 = vpop.eup %6280  ;;  %5771 = vmatpush3.bf16.xpose.msk.msra.mxu0 %vm7009_vm2, %v5766_v1  ;;  %v2575_v0 = vmul.f32 1.442695, %v2548_v62 }
 0x83f   : > { %v7906_v39 = vpop.eup %6282  ;;  %v2526_v40 = vpop.xlane.xlu0 %2525  ;;  %5291 = vmatprep.mubr.f32.mxu0 %v7901_v45  ;;  %5774 = vmatprep.subr.msk.bf16.mxu0 %vm7009_vm2, %v5772_v19 }
 0x840   : > { %v2547_v42 = vsub.f32 %v7786_v61, %v2526_v40  ;;  %5292 = vmatmul.mubr.f32.gmra.mrb[54].mxu0 %v7906_v39  ;;  %v2928_v31 = vpop.permute.xlu1 %2927 }
 0x842   : > { %v2573_v18 = vmul.f32 1.442695, %v2547_v42 }
 0x843   : > { %v2532_v4 = vpop.xlane.xlu0 %2531 }
 0x844   : > { %6288 = vpow2.f32 %v2573_v18  ;;  %v2550_v44 = vsub.f32 %v7797_v2, %v2532_v4  ;;  %v2930_v27 = vpop.permute.xlu1 %2929 }
 0x845   : > { %6290 = vpow2.f32 %v2575_v0 }
 0x846   : > { %v7914_v50 = vpop.eup %6284  ;;  %6292 = vpow2.f32 %v2577_v46  ;;  %v2579_v3 = vmul.f32 1.442695, %v2550_v44  ;;  %5777 = vmatpush3.bf16.xpose.msk.msra.mxu0 %vm7009_vm2, %v5772_v19 }
 0x847   : > { %v7918_v61 = vpop.eup %6286  ;;  %v2534_v25 = vpop.xlane.xlu0 %2533  ;;  %5294 = vmatprep.mubr.f32.mxu0 %v7914_v50 }
 0x848   : > { %6294 = vpow2.f32 %v2579_v3  ;;  %v2551_v52 = vsub.f32 %v7808_v7, %v2534_v25  ;;  %5295 = vmatmul.mubr.f32.gmra.mrb[56].mxu0 %v7918_v61  ;;  %v2932_v2 = vpop.permute.xlu1 %2931 }
 0x84a   : > { %v2581_v14 = vmul.f32 1.442695, %v2551_v52 }
 0x84b   : > { %v2536_v54 = vpop.xlane.xlu0 %2535 }
 0x84c   : > { %6296 = vpow2.f32 %v2581_v14  ;;  %v2552_v37 = vsub.f32 %v7819_v20, %v2536_v54  ;;  %v2934_v32 = vpop.permute.xlu1 %2933 }
 0x84e   : > { %v7924_v9 = vpop.eup %6288  ;;  %v2583_v36 = vmul.f32 1.442695, %v2552_v37 }
 0x84f   : > { %v7926_v11 = vpop.eup %6290  ;;  %v2926_v1 = vpop.permute.xlu0 %2925  ;;  %5297 = vmatprep.mubr.f32.mxu0 %v7924_v9 }
 0x850   : > { %v7929_v10 = vpop.eup %6292  ;;  %6298 = vpow2.f32 %v2583_v36  ;;  %5298 = vmatmul.mubr.f32.gmra.mrb[58].mxu0 %v7926_v11  ;;  %v2936_v7 = vpop.permute.xlu1 %2935 }
 0x851   : > { %5300 = vmatprep.mubr.f32.mxu0 %v7929_v10 }
 0x852   : > { %v7933_v24 = vpop.eup %6294 }
 0x853   : > { %v2940_v20 = vpop.permute.xlu0 %2939 }
 0x854   : > { %5301 = vmatmul.mubr.f32.gmra.mrb[60].mxu0 %v7933_v24  ;;  %v2938_v56 = vpop.permute.xlu1 %2937 }
 0x856   : > { %v7936_v41 = vpop.eup %6296 }
 0x857   : > { %v2944_v17 = vpop.permute.xlu0 %2943  ;;  %5303 = vmatprep.mubr.f32.mxu0 %v7936_v41 }
 0x858   : > { %v2942_v5 = vpop.permute.xlu1 %2941 }
 0x85a   : > { %v7939_v57 = vpop.eup %6298 }
 0x85b   : > { %v2948_v47 = vpop.permute.xlu0 %2947  ;;  %5304 = vmatmul.mubr.f32.gmra.mrb[62].mxu0 %v7939_v57 }
 0x85c   : > { %5338 = vmatprep.mubr.msk.f32.mxu0 %vm978_vm1, %v2924_v34  ;;  %v2946_v19 = vpop.permute.xlu1 %2945 }
 0x85f   : > { %v2952_v62 = vpop.permute.xlu0 %2951  ;;  %5339 = vmatmul.mubr.msk.f32.vlgmr.msra.gmra.mrb[64].mxu0 %vm978_vm1, %v2926_v1 }
 0x860   : > { %v2950_v23 = vpop.permute.xlu1 %2949  ;;  %5341 = vmatprep.mubr.msk.f32.mxu0 %vm978_vm1, %v2928_v31 }
 0x863   : > { %v6134_v40 = vpop.permute.xlu0 %6133  ;;  %5342 = vmatmul.mubr.msk.f32.gmra.mrb[66].mxu0 %vm978_vm1, %v2930_v27 }
 0x864   : > { %v6136_v42 = vunpack.i.h.bf16 %v6134_v40  ;;  %v6135_v0 = vunpack.i.l.bf16 %v6134_v40  ;;  %v2954_v46 = vpop.permute.xlu1 %2953  ;;  %5344 = vmatprep.mubr.msk.f32.mxu0 %vm978_vm1, %v2932_v2 }
 0x866   : > { %v5778_v18 = vpack.c.bf16 %v6136_v42, %v6135_v0 }
 0x867   : > { %v6139_v4 = vpop.permute.xlu0 %6138  ;;  %5345 = vmatmul.mubr.msk.f32.gmra.mrb[68].mxu0 %vm978_vm1, %v2934_v32 }
 0x868   : > { %v6141_v34 = vunpack.i.h.bf16 %v6139_v4  ;;  %v6140_v44 = vunpack.i.l.bf16 %v6139_v4  ;;  %5779 = vmatprep.subr.bf16.mxu1 %v5778_v18  ;;  %v6144_v3 = vpop.permute.xlu1 %6143  ;;  %5347 = vmatprep.mubr.msk.f32.mxu0 %vm978_vm1, %v2936_v7 }
 0x869   : > { %v6146_v25 = vunpack.i.h.bf16 %v6144_v3  ;;  %v6145_v31 = vunpack.i.l.bf16 %v6144_v3  ;;  %5781 = vmatpush3.bf16.msra.mxu1 %v5778_v18 }
 0x86a   : > { %v5782_v52 = vpack.c.bf16 %v6141_v34, %v6140_v44 }
 0x86b   : > { %v6149_v27 = vpop.permute.xlu0 %6148  ;;  %5348 = vmatmul.mubr.msk.f32.gmra.mrb[70].mxu0 %vm978_vm1, %v2938_v56  ;;  %v5786_v14 = vpack.c.bf16 %v6146_v25, %v6145_v31 }
 0x86c   : > { %v6151_v54 = vunpack.i.h.bf16 %v6149_v27  ;;  %v6150_v2 = vunpack.i.l.bf16 %v6149_v27  ;;  %5783 = vmatprep.subr.bf16.mxu1 %v5782_v52  ;;  %v6154_v37 = vpop.permute.xlu1 %6153  ;;  %5350 = vmatprep.mubr.msk.f32.mxu0 %vm978_vm1, %v2940_v20 }
 0x86d   : > { %5785 = vmatpush3.bf16.msra.mxu1 %v5782_v52  ;;  %v6156_v32 = vunpack.i.h.bf16 %v6154_v37  ;;  %v6155_v36 = vunpack.i.l.bf16 %v6154_v37 }
 0x86e   : > { %5787 = vmatprep.subr.bf16.mxu1 %v5786_v14  ;;  %v5790_v1 = vpack.c.bf16 %v6151_v54, %v6150_v2 }
 0x86f   : > { %5351 = vmatmul.mubr.msk.f32.gmra.mrb[72].mxu0 %vm978_vm1, %v2942_v5  ;;  %v5794_v42 = vpack.c.bf16 %v6156_v32, %v6155_v36  ;;  %v6164_v20 = vpop.permute.xlu0 %6163 }
 0x870   : > { %5353 = vmatprep.mubr.msk.f32.mxu0 %vm978_vm1, %v2944_v17  ;;  %v6159_v7 = vpop.permute.xlu1 %6158  ;;  %v6166_v5 = vunpack.i.h.bf16 %v6164_v20  ;;  %v6165_v0 = vunpack.i.l.bf16 %v6164_v20 }
 0x871   : > { %5789 = vmatpush3.bf16.msra.mxu1 %v5786_v14  ;;  %v6161_v56 = vunpack.i.h.bf16 %v6159_v7  ;;  %v6160_v40 = vunpack.i.l.bf16 %v6159_v7 }
 0x872   : > { %5791 = vmatprep.subr.bf16.mxu1 %v5790_v1  ;;  %v5802_v34 = vpack.c.bf16 %v6166_v5, %v6165_v0 }
 0x873   : > { %5354 = vmatmul.mubr.msk.f32.gmra.mrb[74].mxu0 %vm978_vm1, %v2946_v19  ;;  %v5798_v17 = vpack.c.bf16 %v6161_v56, %v6160_v40 }
 0x874   : > { %5356 = vmatprep.mubr.msk.f32.mxu0 %vm978_vm1, %v2948_v47  ;;  %v6169_v18 = vpop.permute.xlu1 %6168 }
 0x875   : > { %5793 = vmatpush3.bf16.msra.mxu1 %v5790_v1  ;;  %v6171_v19 = vunpack.i.h.bf16 %v6169_v18  ;;  %v6170_v4 = vunpack.i.l.bf16 %v6169_v18 }
 0x876   : > { %5795 = vmatprep.subr.bf16.mxu1 %v5794_v42 }
 0x877   : > { %5357 = vmatmul.mubr.msk.f32.gmra.mrb[76].mxu0 %vm978_vm1, %v2950_v23  ;;  %v5806_v47 = vpack.c.bf16 %v6171_v19, %v6170_v4 }
 0x878   : > { %5359 = vmatprep.mubr.msk.f32.mxu0 %vm978_vm1, %v2952_v62 }
 0x879   : > { %5797 = vmatpush3.bf16.msra.mxu1 %v5794_v42 }
 0x87a   : > { %5799 = vmatprep.subr.bf16.mxu1 %v5798_v17 }
 0x87b   : > { %5360 = vmatmul.mubr.msk.f32.gmra.mrb[78].mxu0 %vm978_vm1, %v2954_v46 }
 0x87d   : > { %5801 = vmatpush3.bf16.msra.mxu1 %v5798_v17 }
 0x87e   : > { %5803 = vmatprep.subr.bf16.mxu1 %v5802_v34 }
 0x881   : > { %5805 = vmatpush3.bf16.msra.mxu1 %v5802_v34 }
 0x882   : > { %5807 = vmatprep.subr.bf16.mxu1 %v5806_v47 }
 0x885   : > { %5809 = vmatpush3.bf16.msra.mxu1 %v5806_v47 }
 0x8d3   : > { %v7958_v23 = vpop.f32.mrb[48].mxu0 }
 0x8d4   : > { %v7960_v44 = vpop.f32.mrb[49].mxu0 }
 0x908   : > { %v7962_v62 = vpop.f32.mrb[50].mxu0 }
 0x909   : > { %v7964_v3 = vpop.f32.mrb[51].mxu0 }
 0x90c   : > { %v7966_v25 = vpop.f32.mrb[52].mxu0 }
 0x90d   : > { %v7968_v46 = vpop.f32.mrb[53].mxu0 }
 0x913   : > { %v7970_v31 = vpop.f32.mrb[54].mxu0 }
 0x914   : > { %v7972_v52 = vpop.f32.mrb[55].mxu0 }
 0x91b   : > { %v7974_v27 = vpop.f32.mrb[56].mxu0 }
 0x91c   : > { %v7976_v14 = vpop.f32.mrb[57].mxu0 }
 0x923   : > { %v7978_v54 = vpop.f32.mrb[58].mxu0 }
 0x924   : > { %v7980_v2 = vpop.f32.mrb[59].mxu0 }
 0x927   : > { %v7982_v37 = vpop.f32.mrb[60].mxu0 }
 0x928   : > { %v7984_v32 = vpop.f32.mrb[61].mxu0 }
 0x92e   : > { %v7986_v36 = vpop.f32.mrb[62].mxu0 }
 0x92f   : > { %v7988_v1 = vpop.f32.mrb[63].mxu0 }
 0x932   : > { %v5340_v7 = vpop.f32.mrb[64].mxu0 }
 0x933   : > { %v7991_v56 = vadd.f32 %v7671_v26, %v5340_v7  ;;  %v3117_v40 = vpop.f32.mrb[65].mxu0 }
 0x934   : > { %v7994_v42 = vadd.f32 %v7679_v43, %v3117_v40 }
 0x935   : > { %3198 = vmax.xlane.f32.xlu0 %v7991_v56 }
 0x936   : > { %v5343_v20 = vpop.f32.mrb[66].mxu0  ;;  %3196 = vmax.xlane.f32.xlu1 %v7994_v42 }
 0x937   : > { %v7999_v5 = vadd.f32 %v7693_v28, %v5343_v20  ;;  %v3127_v0 = vpop.f32.mrb[67].mxu0 }
 0x938   : > { %v8003_v18 = vadd.f32 %v7701_v48, %v3127_v0 }
 0x939   : > { %3202 = vmax.xlane.f32.xlu0 %v7999_v5 }
 0x93a   : > { %v5346_v17 = vpop.f32.mrb[68].mxu0 }
 0x93b   : > { %v8006_v26 = vadd.f32 %v7719_v35, %v5346_v17  ;;  %v3137_v43 = vpop.f32.mrb[69].mxu0 }
 0x93c   : > { %v8011_v4 = vadd.f32 %v7711_v13, %v3137_v43 }
 0x93d   : > { %3200 = vmax.xlane.f32.xlu0 %v8003_v18  ;;  %3206 = vmax.xlane.f32.xlu1 %v8006_v26 }
 0x93e   : > { %v5349_v19 = vpop.f32.mrb[70].mxu0 }
 0x93f   : > { %v3147_v28 = vpop.f32.mrb[71].mxu0  ;;  %v8015_v47 = vadd.f32 %v7729_v33, %v5349_v19  ;;  %v8924_v19 = vld [vmem:[#allocation23_spill] sm:$0xff] }
 0x940   : > { %v8019_v7 = vadd.f32 %v7747_v6, %v3147_v28  ;;  %v8925_v28 = vld [vmem:[#allocation10_spill] sm:$0xff] }
 0x941   : > { %3204 = vmax.xlane.f32.xlu0 %v8011_v4 }
 0x942   : > { %v5352_v34 = vpop.f32.mrb[72].mxu0 }
 0x943   : > { %v3157_v48 = vpop.f32.mrb[73].mxu0  ;;  %v8027_v0 = vadd.f32 %v7756_v15, %v5352_v34  ;;  %v8927_v34 = vld [vmem:[#allocation12_spill] sm:$0xff] }
 0x945   : > { %3210 = vmax.xlane.f32.xlu0 %v8015_v47 }
 0x946   : > { %v5355_v35 = vpop.f32.mrb[74].mxu0 }
 0x947   : > { %v3167_v40 = vpop.f32.mrb[75].mxu0  ;;  %v8040_v15 = vadd.f32 %v7774_v22, %v5355_v35  ;;  %v8929_v35 = vld [vmem:[#allocation16_spill] sm:$0xff] }
 0x948   : > { %v8022_v20 = vadd.f32 %v7783_v53, %v3167_v40  ;;  %v8035_v53 = vadd.f32 %v7765_v16, %v3157_v48  ;;  %v8928_v48 = vld [vmem:[#allocation14_spill] sm:$0xff]  ;;  %v8931_v40 = vld [vmem:[#allocation20_spill] sm:$0xff] }
 0x949   : > { %3208 = vmax.xlane.f32.xlu0 %v8019_v7 }
 0x94a   : > { %v5358_v13 = vpop.f32.mrb[76].mxu0  ;;  %3216 = vmax.xlane.f32.xlu1 %v8022_v20 }
 0x94b   : > { %v3177_v33 = vpop.f32.mrb[77].mxu0 }
 0x94c   : > { %v8030_v17 = vadd.f32 %v7737_v59, %v3177_v33  ;;  %v8045_v59 = vadd.f32 %v7794_v21, %v5358_v13  ;;  %v8906_v21 = vld [vmem:[#allocation8_spill] sm:$0xff]  ;;  %v1895_v13 = vpop.xlane.xlu0 %1894  ;;  %v8932_v33 = vld [vmem:[#allocation22_spill] sm:$0xff] }
 0x94d   : > { %3214 = vmax.xlane.f32.xlu0 %v8027_v0  ;;  %6300 = vrcp.f32 %v1895_v13 }
 0x94e   : > { %v5361_v6 = vpop.f32.mrb[78].mxu0  ;;  %3220 = vmax.xlane.f32.xlu1 %v8030_v17 }
 0x94f   : > { %v3187_v43 = vpop.f32.mrb[79].mxu0  ;;  %v8050_v16 = vadd.f32 %v7816_v51, %v5361_v6  ;;  %v8909_v51 = vld [vmem:[#allocation4_spill] sm:$0xff] }
 0x950   : > { %v8061_v22 = vadd.f32 %v7805_v58, %v3187_v43  ;;  %v8911_v58 = vld [vmem:[#allocation5_spill] sm:$0xff] }
 0x951   : > { %3212 = vmax.xlane.f32.xlu0 %v8035_v53 }
 0x952   : > { %2589 = vadd.xlane.f32.xlu1 %v7880_v8  ;;  %v8913_v8 = vld [vmem:[#allocation41_spill] sm:$0xff] }
 0x955   : > { %3218 = vmax.xlane.f32.xlu0 %v8040_v15 }
 0x956   : > { %1902 = vadd.xlane.f32.xlu1 %v7562_v12  ;;  %v8905_v12 = vld [vmem:[#allocation6_spill] sm:$0xff] }
 0x959   : > { %3222 = vmax.xlane.f32.xlu0 %v8045_v59 }
 0x95a   : > { %2593 = vadd.xlane.f32.xlu1 %v7889_v60  ;;  %v8915_v60 = vld [vmem:[#allocation11_spill] sm:$0xff] }
 0x95d   : > { %3226 = vmax.xlane.f32.xlu0 %v8050_v16 }
 0x95e   : > { %1906 = vadd.xlane.f32.xlu1 %v7574_v38  ;;  %v8907_v38 = vld [vmem:[#allocation7_spill] sm:$0xff] }
 0x961   : > { %1896 = vadd.xlane.f32.xlu0 %v7524_v30  ;;  %v8908_v30 = vld [vmem:[#allocation42_spill] sm:$0xff] }
 0x962   : > { %2597 = vadd.xlane.f32.xlu1 %v7901_v45  ;;  %v8916_v45 = vld [vmem:[#allocation43_spill] sm:$0xff] }
 0x965   : > { %2585 = vadd.xlane.f32.xlu0 %v7848_v29  ;;  %v8910_v29 = vld [vmem:[#allocation44_spill] sm:$0xff] }
 0x966   : > { %1910 = vadd.xlane.f32.xlu1 %v8905_v12 }
 0x969   : > { %2587 = vadd.xlane.f32.xlu0 %v7850_v49  ;;  %v8912_v49 = vld [vmem:[#allocation46_spill] sm:$0xff] }
 0x96a   : > { %2601 = vadd.xlane.f32.xlu1 %v7914_v50  ;;  %v8918_v50 = vld [vmem:[#allocation15_spill] sm:$0xff] }
 0x96d   : > { %1898 = vadd.xlane.f32.xlu0 %v8906_v21 }
 0x96e   : > { %3224 = vmax.xlane.f32.xlu1 %v8061_v22 }
 0x971   : > { %1900 = vadd.xlane.f32.xlu0 %v8907_v38 }
 0x972   : > { %1914 = vadd.xlane.f32.xlu1 %v8908_v30 }
 0x975   : > { %2591 = vadd.xlane.f32.xlu0 %v7882_v55  ;;  %v8914_v55 = vld [vmem:[#allocation9_spill] sm:$0xff] }
 0x976   : > { %2605 = vadd.xlane.f32.xlu1 %v7924_v9  ;;  %v8919_v9 = vld [vmem:[#allocation45_spill] sm:$0xff] }
 0x979   : > { %1904 = vadd.xlane.f32.xlu0 %v8909_v51 }
 0x97a   : > { %1918 = vadd.xlane.f32.xlu1 %v8910_v29 }
 0x97d   : > { %2595 = vadd.xlane.f32.xlu0 %v7893_v63  ;;  %v8917_v63 = vld [vmem:[#allocation13_spill] sm:$0xff] }
 0x97e   : > { %2609 = vadd.xlane.f32.xlu1 %v7929_v10  ;;  %v8921_v10 = vld [vmem:[#allocation19_spill] sm:$0xff] }
 0x981   : > { %1908 = vadd.xlane.f32.xlu0 %v8911_v58 }
 0x982   : > { %1922 = vadd.xlane.f32.xlu1 %v8912_v49 }
 0x985   : > { %2599 = vadd.xlane.f32.xlu0 %v7906_v39  ;;  %v8920_v39 = vld [vmem:[#allocation17_spill] sm:$0xff] }
 0x986   : > { %2613 = vadd.xlane.f32.xlu1 %v7936_v41  ;;  %v8922_v41 = vld [vmem:[#allocation47_spill] sm:$0xff] }
 0x989   : > { %1912 = vadd.xlane.f32.xlu0 %v8913_v8 }
 0x98a   : > { %1268 = vadd.xlane.f32.xlu1 %v8914_v55 }
 0x98d   : > { %2603 = vadd.xlane.f32.xlu0 %v7918_v61  ;;  %v8923_v61 = vld [vmem:[#allocation21_spill] sm:$0xff] }
 0x98e   : > { %1272 = vadd.xlane.f32.xlu1 %v8915_v60 }
 0x991   : > { %1916 = vadd.xlane.f32.xlu0 %v8916_v45 }
 0x992   : > { %1276 = vadd.xlane.f32.xlu1 %v8917_v63  ;;  %v6301_v63 = vpop.eup %6300 }
 0x995   : > { %2607 = vadd.xlane.f32.xlu0 %v7926_v11  ;;  %v8926_v11 = vld [vmem:[#allocation24_spill] sm:$0xff] }
 0x996   : > { %1280 = vadd.xlane.f32.xlu1 %v8918_v50 }
 0x999   : > { %1920 = vadd.xlane.f32.xlu0 %v8919_v9 }
 0x99a   : > { %1284 = vadd.xlane.f32.xlu1 %v8920_v39 }
 0x99d   : > { %2611 = vadd.xlane.f32.xlu0 %v7933_v24  ;;  %v8930_v24 = vld [vmem:[#allocation18_spill] sm:$0xff] }
 0x99e   : > { %1288 = vadd.xlane.f32.xlu1 %v8921_v10 }
 0x9a1   : > { %1924 = vadd.xlane.f32.xlu0 %v8922_v41 }
 0x9a2   : > { %1292 = vadd.xlane.f32.xlu1 %v8923_v61 }
 0x9a5   : > { %2615 = vadd.xlane.f32.xlu0 %v7939_v57 }
 0x9a6   : > { %1296 = vadd.xlane.f32.xlu1 %v8924_v19 }
 0x9a9   : > { %1270 = vadd.xlane.f32.xlu0 %v8925_v28 }
 0x9aa   : > { %1298 = vadd.xlane.f32.xlu1 %v8926_v11 }
 0x9ad   : > { %1274 = vadd.xlane.f32.xlu0 %v8927_v34 }
 0x9b1   : > { %1278 = vadd.xlane.f32.xlu0 %v8928_v48 }
 0x9b5   : > { %1282 = vadd.xlane.f32.xlu0 %v8929_v35 }
 0x9b9   : > { %1286 = vadd.xlane.f32.xlu0 %v8930_v24 }
 0x9bd   : > { %1290 = vadd.xlane.f32.xlu0 %v8931_v40 }
 0x9c1   : > { %1294 = vadd.xlane.f32.xlu0 %v8932_v33 }
 0x9c2   : > { %v3199_v57 = vpop.xlane.xlu0 %3198 }
 0x9c3   : > { %v3229_v6 = vsub.f32 %v7991_v56, %v3199_v57  ;;  %v3197_v43 = vpop.xlane.xlu1 %3196 }
 0x9c4   : > { %v3228_v12 = vsub.f32 %v7994_v42, %v3197_v43 }
 0x9c5   : > { %v3246_v21 = vmul.f32 1.442695, %v3229_v6 }
 0x9c6   : > { %v3244_v38 = vmul.f32 1.442695, %v3228_v12  ;;  %v3203_v30 = vpop.xlane.xlu0 %3202 }
 0x9c7   : > { %v3231_v51 = vsub.f32 %v7999_v5, %v3203_v30 }
 0x9c8   : > { %6302 = vpow2.f32 %v3244_v38 }
 0x9c9   : > { %6304 = vpow2.f32 %v3246_v21  ;;  %v3250_v8 = vmul.f32 1.442695, %v3231_v51 }
 0x9ca   : > { %v3201_v29 = vpop.xlane.xlu0 %3200  ;;  %v3207_v58 = vpop.xlane.xlu1 %3206 }
 0x9cb   : > { %v3230_v49 = vsub.f32 %v8003_v18, %v3201_v29  ;;  %v3233_v55 = vsub.f32 %v8006_v26, %v3207_v58  ;;  %v8933_v26 = vld [vmem:[#allocation49_spill] sm:$0xff] }
 0x9cc   : > { %v2135_v10 = vmul.f32 %v6301_v63, %v8933_v26 }
 0x9cd   : > { %v3248_v60 = vmul.f32 1.442695, %v3230_v49  ;;  %v3254_v45 = vmul.f32 1.442695, %v3233_v55 }
 0x9ce   : > { %v3205_v56 = vpop.xlane.xlu0 %3204 }
 0x9cf   : > { %6306 = vpow2.f32 %v3248_v60  ;;  %v3232_v42 = vsub.f32 %v8011_v4, %v3205_v56 }
 0x9d0   : > { %6308 = vpow2.f32 %v3250_v8 }
 0x9d1   : > { %v3252_v50 = vmul.f32 1.442695, %v3232_v42 }
 0x9d2   : > { %v8107_v9 = vpop.eup %6302  ;;  %v3211_v5 = vpop.xlane.xlu0 %3210 }
 0x9d3   : > { %v8109_v39 = vpop.eup %6304  ;;  %6310 = vpow2.f32 %v3252_v50  ;;  %5394 = vmatprep.mubr.f32.mxu1 %v8107_v9  ;;  %v3235_v18 = vsub.f32 %v8015_v47, %v3211_v5 }
 0x9d4   : > { %6312 = vpow2.f32 %v3254_v45  ;;  %5395 = vmatmul.mubr.f32.vlgmr.msra.gmra.mrb[48].mxu1 %v8109_v39 }
 0x9d5   : > { %v3258_v19 = vmul.f32 1.442695, %v3235_v18 }
 0x9d6   : > { %v3209_v4 = vpop.xlane.xlu0 %3208 }
 0x9d7   : > { %v3234_v41 = vsub.f32 %v8019_v7, %v3209_v4  ;;  %2167 = vrot.lane.b32.xlu0 %v2135_v10, %s6545_s13  ;;  %v3217_v61 = vpop.xlane.xlu1 %3216 }
 0x9d8   : > { %v3238_v24 = vsub.f32 %v8022_v20, %v3217_v61 }
 0x9d9   : > { %v8117_v28 = vpop.eup %6306  ;;  %v3256_v11 = vmul.f32 1.442695, %v3234_v41 }
 0x9da   : > { %v8119_v34 = vpop.eup %6308  ;;  %v3215_v48 = vpop.xlane.xlu0 %3214  ;;  %5397 = vmatprep.mubr.f32.mxu1 %v8117_v28  ;;  %v3264_v43 = vmul.f32 1.442695, %v3238_v24 }
 0x9db   : > { %6314 = vpow2.f32 %v3256_v11  ;;  %5398 = vmatmul.mubr.f32.gmra.mrb[50].mxu1 %v8119_v34  ;;  %v3221_v47 = vpop.xlane.xlu1 %3220  ;;  %v3237_v7 = vsub.f32 %v8027_v0, %v3215_v48  ;;  %v8934_v48 = vld [vmem:[#allocation48_spill] sm:$0xff] }
 0x9dc   : > { %6316 = vpow2.f32 %v3258_v19  ;;  %v3240_v12 = vsub.f32 %v8030_v17, %v3221_v47 }
 0x9dd   : > { %v8124_v35 = vpop.eup %6310  ;;  %v3262_v6 = vmul.f32 1.442695, %v3237_v7 }
 0x9de   : > { %v8127_v40 = vpop.eup %6312  ;;  %v3213_v13 = vpop.xlane.xlu0 %3212  ;;  %5400 = vmatprep.mubr.f32.mxu1 %v8124_v35  ;;  %v3268_v51 = vmul.f32 1.442695, %v3240_v12 }
 0x9df   : > { %v3236_v33 = vsub.f32 %v8035_v53, %v3213_v13  ;;  %5401 = vmatmul.mubr.f32.gmra.mrb[52].mxu1 %v8127_v40  ;;  %v2590_v57 = vpop.xlane.xlu1 %2589 }
 0x9e1   : > { %v3260_v21 = vmul.f32 1.442695, %v3236_v33 }
 0x9e2   : > { %v3219_v0 = vpop.xlane.xlu0 %3218 }
 0x9e3   : > { %6318 = vpow2.f32 %v3260_v21  ;;  %v3239_v38 = vsub.f32 %v8040_v15, %v3219_v0  ;;  %v1903_v20 = vpop.xlane.xlu1 %1902 }
 0x9e4   : > { %6320 = vpow2.f32 %v3262_v6 }
 0x9e5   : > { %v8134_v30 = vpop.eup %6314  ;;  %6322 = vpow2.f32 %v3264_v43  ;;  %v3266_v29 = vmul.f32 1.442695, %v3239_v38  ;;  %v8935_v38 = vld [vmem:[#allocation51_spill] sm:$0xff] }
 0x9e6   : > { %v8136_v53 = vpop.eup %6316  ;;  %v3223_v58 = vpop.xlane.xlu0 %3222  ;;  %5403 = vmatprep.mubr.f32.mxu1 %v8134_v30 }
 0x9e7   : > { %6324 = vpow2.f32 %v3266_v29  ;;  %v3241_v17 = vsub.f32 %v8045_v59, %v3223_v58  ;;  %5404 = vmatmul.mubr.f32.gmra.mrb[54].mxu1 %v8136_v53  ;;  %v2594_v49 = vpop.xlane.xlu1 %2593 }
 0x9e8   : > { %6326 = vpow2.f32 %v3268_v51 }
 0x9e9   : > { %v3270_v15 = vmul.f32 1.442695, %v3241_v17 }
 0x9ea   : > { %v3227_v8 = vpop.xlane.xlu0 %3226 }
 0x9eb   : > { %6328 = vpow2.f32 %v3270_v15  ;;  %v1907_v55 = vpop.xlane.xlu1 %1906  ;;  %v3243_v61 = vsub.f32 %v8050_v16, %v3227_v8  ;;  %v8936_v15 = vld [vmem:[#allocation50_spill] sm:$0xff] }
 0x9ed   : > { %v8141_v60 = vpop.eup %6318  ;;  %v3274_v13 = vmul.f32 1.442695, %v3243_v61  ;;  %v8937_v61 = vld [vmem:[#allocation53_spill] sm:$0xff] }
 0x9ee   : > { %v8143_v56 = vpop.eup %6320  ;;  %v1897_v42 = vpop.xlane.xlu0 %1896  ;;  %5406 = vmatprep.mubr.f32.mxu1 %v8141_v60 }
 0x9ef   : > { %v8146_v45 = vpop.eup %6322  ;;  %5407 = vmatmul.mubr.f32.gmra.mrb[56].mxu1 %v8143_v56  ;;  %v8149_v59 = vpop.xlane.xlu1 %2597  ;;  %6330 = vrcp.f32 %v1897_v42 }
 0x9f0   : > { %5409 = vmatprep.mubr.f32.mxu1 %v8146_v45 }
 0x9f1   : > { %v8152_v63 = vpop.eup %6324 }
 0x9f2   : > { %v2586_v50 = vpop.xlane.xlu0 %2585  ;;  %v8154_v5 = vpop.eup %6326 }
 0x9f3   : > { %6332 = vrcp.f32 %v2586_v50  ;;  %5410 = vmatmul.mubr.f32.gmra.mrb[58].mxu1 %v8152_v63  ;;  %v8157_v18 = vpop.xlane.xlu1 %1910 }
 0x9f4   : > { %5412 = vmatprep.mubr.f32.mxu1 %v8154_v5 }
 0x9f5   : > { %v8160_v26 = vpop.eup %6328 }
 0x9f6   : > { %v2588_v10 = vpop.xlane.xlu0 %2587 }
 0x9f7   : > { %6334 = vrcp.f32 %v2588_v10  ;;  %5413 = vmatmul.mubr.f32.gmra.mrb[60].mxu1 %v8160_v26  ;;  %v8163_v4 = vpop.xlane.xlu1 %2601 }
 0x9f9   : > { %v6331_v41 = vpop.eup %6330 }
 0x9fa   : > { %v1899_v19 = vpop.xlane.xlu0 %1898  ;;  %v2136_v47 = vmul.f32 %v6331_v41, %v8934_v48 }
 0x9fb   : > { %6336 = vrcp.f32 %v1899_v19  ;;  %v3225_v11 = vpop.xlane.xlu1 %3224 }
 0x9fc   : > { %v3242_v7 = vsub.f32 %v8061_v22, %v3225_v11  ;;  %6338 = vrcp.f32 %v2590_v57  ;;  %2169 = vrot.lane.b32.xlu1 %v2136_v47, %s6545_s13 }
 0x9fd   : > { %v6333_v24 = vpop.eup %6332 }
 0x9fe   : > { %v3272_v33 = vmul.f32 1.442695, %v3242_v7  ;;  %v1901_v6 = vpop.xlane.xlu0 %1900  ;;  %v2826_v43 = vmul.f32 %v6333_v24, %v7960_v44 }
 0x9ff   : > { %6340 = vrcp.f32 %v1901_v6  ;;  %v8170_v12 = vpop.xlane.xlu1 %1914 }
 0xa00   : > { %6342 = vpow2.f32 %v3272_v33  ;;  %2858 = vrot.lane.b32.xlu0 %v2826_v43, %s6546_s14 }
 0xa01   : > { %v6335_v16 = vpop.eup %6334  ;;  %6344 = vrcp.f32 %v1903_v20 }
 0xa02   : > { %6346 = vpow2.f32 %v3274_v13  ;;  %v2592_v22 = vpop.xlane.xlu0 %2591  ;;  %v2827_v57 = vmul.f32 %v6335_v16, %v7958_v23 }
 0xa03   : > { %6348 = vrcp.f32 %v2592_v22  ;;  %v8174_v21 = vpop.xlane.xlu1 %2605  ;;  %v8939_v22 = vld [vmem:[#allocation55_spill] sm:$0xff] }
 0xa04   : > { %2860 = vrot.lane.b32.xlu1 %v2827_v57, %s6546_s14  ;;  %6350 = vrcp.f32 %v2594_v49 }
 0xa05   : > { %v6337_v0 = vpop.eup %6336 }
 0xa06   : > { %v1905_v44 = vpop.xlane.xlu0 %1904  ;;  %v2137_v51 = vmul.f32 %v6337_v0, %v8935_v38  ;;  %v6339_v29 = vpop.eup %6338  ;;  %v8940_v38 = vld [vmem:[#allocation54_spill] sm:$0xff] }
 0xa07   : > { %6352 = vrcp.f32 %v1905_v44  ;;  %v8178_v58 = vpop.xlane.xlu1 %1918  ;;  %v2828_v42 = vmul.f32 %v6339_v29, %v7964_v3 }
 0xa08   : > { %2171 = vrot.lane.b32.xlu0 %v2137_v51, %s6545_s13  ;;  %6354 = vrcp.f32 %v1907_v55 }
 0xa09   : > { %v6341_v20 = vpop.eup %6340 }
 0xa0a   : > { %v8181_v17 = vpop.eup %6342  ;;  %v2596_v23 = vpop.xlane.xlu0 %2595  ;;  %v2138_v8 = vmul.f32 %v6341_v20, %v8936_v15 }
 0xa0b   : > { %v6345_v50 = vpop.eup %6344  ;;  %6356 = vrcp.f32 %v2596_v23  ;;  %5415 = vmatprep.mubr.f32.mxu1 %v8181_v17  ;;  %v8186_v49 = vpop.xlane.xlu1 %2609 }
 0xa0c   : > { %v8188_v10 = vpop.eup %6346  ;;  %2173 = vrot.lane.b32.xlu1 %v2138_v8, %s6545_s13  ;;  %2862 = vrot.lane.b32.xlu0 %v2828_v42, %s6546_s14  ;;  %6358 = vrcp.f32 %v8149_v59  ;;  %v2139_v19 = vmul.f32 %v6345_v50, %v8937_v61  ;;  %v8938_v59 = vld [vmem:[#allocation52_spill] sm:$0xff]  ;;  %v8941_v42 = vld [vmem:[#allocation57_spill] sm:$0xff] }
 0xa0d   : > { %v6349_v55 = vpop.eup %6348  ;;  %5416 = vmatmul.mubr.f32.gmra.mrb[62].mxu1 %v8188_v10  ;;  %v8942_v61 = vld [vmem:[#allocation56_spill] sm:$0xff] }
 0xa0e   : > { %v1909_v41 = vpop.xlane.xlu0 %1908  ;;  %v2829_v3 = vmul.f32 %v6349_v55, %v7962_v62  ;;  %v6351_v11 = vpop.eup %6350 }
 0xa0f   : > { %6360 = vrcp.f32 %v1909_v41  ;;  %v8196_v48 = vpop.xlane.xlu1 %1922  ;;  %v2830_v13 = vmul.f32 %v6351_v11, %v7968_v46 }
 0xa10   : > { %2864 = vrot.lane.b32.xlu1 %v2829_v3, %s6546_s14  ;;  %2175 = vrot.lane.b32.xlu0 %v2139_v19, %s6545_s13  ;;  %6362 = vrcp.f32 %v8157_v18 }
 0xa11   : > { %v6353_v47 = vpop.eup %6352 }
 0xa12   : > { %v2600_v7 = vpop.xlane.xlu0 %2599  ;;  %v2140_v24 = vmul.f32 %v6353_v47, %v8938_v59  ;;  %v6355_v33 = vpop.eup %6354  ;;  %v8943_v47 = vld [vmem:[#allocation26_spill] sm:$0xff] }
 0xa13   : > { %6364 = vrcp.f32 %v2600_v7  ;;  %v8203_v62 = vpop.xlane.xlu1 %2613  ;;  %v2141_v57 = vmul.f32 %v6355_v33, %v8939_v22  ;;  %v8945_v22 = vld [vmem:[#allocation30_spill] sm:$0xff] }
 0xa14   : > { %2177 = vrot.lane.b32.xlu1 %v2140_v24, %s6545_s13  ;;  %2866 = vrot.lane.b32.xlu0 %v2830_v13, %s6546_s14  ;;  %v8944_v13 = vld [vmem:[#allocation28_spill] sm:$0xff] }
 0xa15   : > { %v6357_v6 = vpop.eup %6356 }
 0xa16   : > { %v1913_v43 = vpop.xlane.xlu0 %1912  ;;  %v2831_v16 = vmul.f32 %v6357_v6, %v7966_v25  ;;  %v6359_v18 = vpop.eup %6358 }
 0xa17   : > { %6366 = vrcp.f32 %v1913_v43  ;;  %v1269_v0 = vpop.xlane.xlu1 %1268  ;;  %v2832_v29 = vmul.f32 %v6359_v18, %v7972_v52 }
 0xa18   : > { %6368 = vrcp.f32 %v1269_v0  ;;  %2868 = vrot.lane.b32.xlu1 %v2831_v16, %s6546_s14  ;;  %2179 = vrot.lane.b32.xlu0 %v2141_v57, %s6545_s13 }
 0xa19   : > { %v6361_v46 = vpop.eup %6360 }
 0xa1a   : > { %v8211_v44 = vpop.xlane.xlu0 %2603  ;;  %v2142_v51 = vmul.f32 %v6361_v46, %v8940_v38  ;;  %v6363_v20 = vpop.eup %6362  ;;  %v8946_v38 = vld [vmem:[#allocation32_spill] sm:$0xff] }
 0xa1b   : > { %v1273_v23 = vpop.xlane.xlu1 %1272  ;;  %v2143_v50 = vmul.f32 %v6363_v20, %v8941_v42 }
 0xa1c   : > { %6370 = vrcp.f32 %v1273_v23  ;;  %2181 = vrot.lane.b32.xlu1 %v2142_v51, %s6545_s13  ;;  %2870 = vrot.lane.b32.xlu0 %v2832_v29, %s6546_s14 }
 0xa1d   : > { %v6365_v25 = vpop.eup %6364 }
 0xa1e   : > { %v8217_v15 = vpop.xlane.xlu0 %1916  ;;  %v2833_v8 = vmul.f32 %v6365_v25, %v7970_v31  ;;  %v8947_v25 = vld [vmem:[#allocation34_spill] sm:$0xff] }
 0xa1f   : > { %v1277_v55 = vpop.xlane.xlu1 %1276 }
 0xa20   : > { %6372 = vrcp.f32 %v1277_v55  ;;  %2872 = vrot.lane.b32.xlu1 %v2833_v8, %s6546_s14  ;;  %2183 = vrot.lane.b32.xlu0 %v2143_v50, %s6545_s13 }
 0xa21   : > { %v6367_v52 = vpop.eup %6366 }
 0xa22   : > { %v6369_v41 = vpop.eup %6368  ;;  %v8223_v3 = vpop.xlane.xlu0 %2607  ;;  %v2144_v19 = vmul.f32 %v6367_v52, %v8942_v61  ;;  %v8948_v52 = vld [vmem:[#allocation36_spill] sm:$0xff] }
 0xa23   : > { %v1281_v11 = vpop.xlane.xlu1 %1280  ;;  %v1509_v7 = vmul.f32 %v6369_v41, %v8943_v47 }
 0xa24   : > { %6374 = vrcp.f32 %v1281_v11  ;;  %2185 = vrot.lane.b32.xlu1 %v2144_v19, %s6545_s13  ;;  %v8949_v11 = vld [vmem:[#allocation38_spill] sm:$0xff] }
 0xa25   : > { %1525 = vst.msk [vmem:[#allocation2] sm:$0xff] %vm978_vm1, %v1509_v7 }
 0xa26   : > { %v6371_v31 = vpop.eup %6370  ;;  %v8229_v59 = vpop.xlane.xlu0 %1920 }
 0xa27   : > { %v1285_v24 = vpop.xlane.xlu1 %1284  ;;  %v1511_v33 = vmul.f32 %v6371_v31, %v8944_v13 }
 0xa28   : > { %6376 = vrcp.f32 %v1285_v24  ;;  %v8950_v24 = vld [vmem:[#allocation40_spill] sm:$0xff] }
 0xa29   : > { %1527 = vst.msk [vmem:[#allocation2 + $0x10] sm:$0xff] %vm978_vm1, %v1511_v33 }
 0xa2a   : > { %v6373_v6 = vpop.eup %6372  ;;  %v8233_v43 = vpop.xlane.xlu0 %2611 }
 0xa2b   : > { %v1289_v16 = vpop.xlane.xlu1 %1288  ;;  %v1513_v57 = vmul.f32 %v6373_v6, %v8945_v22  ;;  %v8951_v22 = vld [vmem:[#allocation25_spill] sm:$0xff] }
 0xa2c   : > { %6378 = vrcp.f32 %v1289_v16 }
 0xa2d   : > { %1529 = vst.msk [vmem:[#allocation2 + $0x20] sm:$0xff] %vm978_vm1, %v1513_v57 }
 0xa2e   : > { %v6375_v18 = vpop.eup %6374  ;;  %v8237_v0 = vpop.xlane.xlu0 %1924 }
 0xa2f   : > { %v1293_v46 = vpop.xlane.xlu1 %1292  ;;  %v1515_v51 = vmul.f32 %v6375_v18, %v8946_v38  ;;  %v8952_v18 = vld [vmem:[#allocation39_spill] sm:$0xff] }
 0xa30   : > { %6380 = vrcp.f32 %v1293_v46 }
 0xa31   : > { %1531 = vst.msk [vmem:[#allocation2 + $0x30] sm:$0xff] %vm978_vm1, %v1515_v51  ;;  %v8953_v51 = vld [vmem:[#allocation27_spill] sm:$0xff] }
 0xa32   : > { %v6377_v29 = vpop.eup %6376  ;;  %v8241_v20 = vpop.xlane.xlu0 %2615 }
 0xa33   : > { %v1297_v23 = vpop.xlane.xlu1 %1296  ;;  %v1517_v8 = vmul.f32 %v6377_v29, %v8947_v25 }
 0xa34   : > { %6382 = vrcp.f32 %v1297_v23 }
 0xa35   : > { %1533 = vst.msk [vmem:[#allocation2 + $0x40] sm:$0xff] %vm978_vm1, %v1517_v8 }
 0xa36   : > { %v6379_v42 = vpop.eup %6378  ;;  %v1271_v50 = vpop.xlane.xlu0 %1270 }
 0xa37   : > { %6384 = vrcp.f32 %v1271_v50  ;;  %v1299_v55 = vpop.xlane.xlu1 %1298  ;;  %v1519_v41 = vmul.f32 %v6379_v42, %v8948_v52 }
 0xa38   : > { %6386 = vrcp.f32 %v1299_v55  ;;  %v8955_v55 = vld [vmem:[#allocation31_spill] sm:$0xff] }
 0xa39   : > { %1535 = vst.msk [vmem:[#allocation2 + $0x50] sm:$0xff] %vm978_vm1, %v1519_v41  ;;  %v8956_v41 = vld [vmem:[#allocation33_spill] sm:$0xff] }
 0xa3a   : > { %v6381_v61 = vpop.eup %6380  ;;  %v1275_v19 = vpop.xlane.xlu0 %1274 }
 0xa3b   : > { %6388 = vrcp.f32 %v1275_v19  ;;  %v1521_v47 = vmul.f32 %v6381_v61, %v8949_v11  ;;  %v8957_v61 = vld [vmem:[#allocation35_spill] sm:$0xff]  ;;  %v8958_v19 = vld [vmem:[#allocation37_spill] sm:$0xff] }
 0xa3d   : > { %1537 = vst.msk [vmem:[#allocation2 + $0x60] sm:$0xff] %vm978_vm1, %v1521_v47 }
 0xa3e   : > { %v6383_v7 = vpop.eup %6382  ;;  %v1279_v31 = vpop.xlane.xlu0 %1278 }
 0xa3f   : > { %6390 = vrcp.f32 %v1279_v31  ;;  %3278 = vadd.xlane.f32.xlu0 %v8109_v39  ;;  %v1523_v13 = vmul.f32 %v6383_v7, %v8950_v24  ;;  %v8960_v7 = vld [vmem:[#allocation61_spill] sm:$0xff] }
 0xa41   : > { %v6385_v33 = vpop.eup %6384  ;;  %1539 = vst.msk [vmem:[#allocation2 + $0x70] sm:$0xff] %vm978_vm1, %v1523_v13 }
 0xa42   : > { %v6387_v6 = vpop.eup %6386  ;;  %v1283_v16 = vpop.xlane.xlu0 %1282  ;;  %v1510_v57 = vmul.f32 %v6385_v33, %v8951_v22 }
 0xa43   : > { %6392 = vrcp.f32 %v1283_v16  ;;  %3276 = vadd.xlane.f32.xlu0 %v8107_v9  ;;  %v1524_v46 = vmul.f32 %v6387_v6, %v8952_v18  ;;  %v8954_v9 = vld [vmem:[#allocation29_spill] sm:$0xff]  ;;  %v8961_v16 = vld [vmem:[#allocation63_spill] sm:$0xff] }
 0xa44   : > { %1526 = vst.msk [vmem:[#allocation2 + $0x8] sm:$0xff] %vm978_vm1, %v1510_v57 }
 0xa45   : > { %v6389_v38 = vpop.eup %6388  ;;  %1540 = vst.msk [vmem:[#allocation2 + $0x78] sm:$0xff] %vm978_vm1, %v1524_v46 }
 0xa46   : > { %v1287_v39 = vpop.xlane.xlu0 %1286  ;;  %v1512_v29 = vmul.f32 %v6389_v38, %v8953_v51 }
 0xa47   : > { %6394 = vrcp.f32 %v1287_v39  ;;  %3282 = vadd.xlane.f32.xlu0 %v8119_v34 }
 0xa48   : > { %3280 = vadd.xlane.f32.xlu1 %v8117_v28  ;;  %1528 = vst.msk [vmem:[#allocation2 + $0x18] sm:$0xff] %vm978_vm1, %v1512_v29 }
 0xa49   : > { %v6391_v23 = vpop.eup %6390 }
 0xa4a   : > { %v1291_v25 = vpop.xlane.xlu0 %1290  ;;  %v1514_v8 = vmul.f32 %v6391_v23, %v8954_v9 }
 0xa4b   : > { %6396 = vrcp.f32 %v1291_v25  ;;  %3286 = vadd.xlane.f32.xlu0 %v8127_v40  ;;  %v8962_v25 = vld [vmem:[#allocation58_spill] sm:$0xff] }
 0xa4c   : > { %3284 = vadd.xlane.f32.xlu1 %v8124_v35  ;;  %1530 = vst.msk [vmem:[#allocation2 + $0x28] sm:$0xff] %vm978_vm1, %v1514_v8 }
 0xa4d   : > { %v6393_v42 = vpop.eup %6392 }
 0xa4e   : > { %v1295_v50 = vpop.xlane.xlu0 %1294  ;;  %v1516_v52 = vmul.f32 %v6393_v42, %v8955_v55 }
 0xa4f   : > { %6398 = vrcp.f32 %v1295_v50  ;;  %3290 = vadd.xlane.f32.xlu0 %v8136_v53 }
 0xa50   : > { %3288 = vadd.xlane.f32.xlu1 %v8134_v30  ;;  %1532 = vst.msk [vmem:[#allocation2 + $0x38] sm:$0xff] %vm978_vm1, %v1516_v52  ;;  %6400 = vrcp.f32 %v8211_v44 }
 0xa51   : > { %v6395_v28 = vpop.eup %6394  ;;  %6402 = vrcp.f32 %v8163_v4 }
 0xa52   : > { %v2168_v34 = vpop.permute.xlu0 %2167  ;;  %v1518_v40 = vmul.f32 %v6395_v28, %v8956_v41  ;;  %6404 = vrcp.f32 %v8170_v12  ;;  %v8959_v12 = vld [vmem:[#allocation59_spill] sm:$0xff] }
 0xa53   : > { %2216 = vst.msk [vmem:[#allocation2] sm:$0xff] %vm2215_vm3, %v2168_v34  ;;  %3294 = vadd.xlane.f32.xlu0 %v8143_v56  ;;  %6406 = vrcp.f32 %v8174_v21 }
 0xa54   : > { %3292 = vadd.xlane.f32.xlu1 %v8141_v60  ;;  %1534 = vst.msk [vmem:[#allocation2 + $0x48] sm:$0xff] %vm978_vm1, %v1518_v40  ;;  %6408 = vrcp.f32 %v8178_v58 }
 0xa55   : > { %v6397_v35 = vpop.eup %6396  ;;  %6410 = vrcp.f32 %v8186_v49 }
 0xa56   : > { %v1520_v53 = vmul.f32 %v6397_v35, %v8957_v61  ;;  %6412 = vrcp.f32 %v8196_v48 }
 0xa57   : > { %3298 = vadd.xlane.f32.xlu0 %v8152_v63  ;;  %6414 = vrcp.f32 %v8203_v62 }
 0xa58   : > { %3296 = vadd.xlane.f32.xlu1 %v8146_v45  ;;  %1536 = vst.msk [vmem:[#allocation2 + $0x58] sm:$0xff] %vm978_vm1, %v1520_v53  ;;  %6416 = vrcp.f32 %v8217_v15 }
 0xa59   : > { %v6399_v30 = vpop.eup %6398  ;;  %6418 = vrcp.f32 %v8223_v3 }
 0xa5a   : > { %v1522_v11 = vmul.f32 %v6399_v30, %v8958_v19  ;;  %v6401_v60 = vpop.eup %6400  ;;  %6420 = vrcp.f32 %v8229_v59  ;;  %v8963_v59 = vld [vmem:[#allocation60_spill] sm:$0xff] }
 0xa5b   : > { %3302 = vadd.xlane.f32.xlu0 %v8160_v26  ;;  %v2835_v56 = vmul.f32 %v6401_v60, %v7974_v27  ;;  %v6403_v63 = vpop.eup %6402  ;;  %6422 = vrcp.f32 %v8233_v43 }
 0xa5c   : > { %3300 = vadd.xlane.f32.xlu1 %v8154_v5  ;;  %1538 = vst.msk [vmem:[#allocation2 + $0x68] sm:$0xff] %vm978_vm1, %v1522_v11  ;;  %v2834_v26 = vmul.f32 %v6403_v63, %v7976_v14  ;;  %v6405_v4 = vpop.eup %6404  ;;  %6424 = vrcp.f32 %v8237_v0 }
 0xa5d   : > { %v2145_v21 = vmul.f32 %v6405_v4, %v8959_v12  ;;  %6426 = vrcp.f32 %v8241_v20 }
 0xa5f   : > { %3306 = vadd.xlane.f32.xlu0 %v8188_v10  ;;  %v6407_v10 = vpop.eup %6406 }
 0xa60   : > { %v2836_v14 = vmul.f32 %v6407_v10, %v7980_v2  ;;  %v6409_v44 = vpop.eup %6408 }
 0xa61   : > { %v2147_v31 = vmul.f32 %v6409_v44, %v8960_v7  ;;  %v6411_v24 = vpop.eup %6410 }
 0xa62   : > { %v2838_v2 = vmul.f32 %v6411_v24, %v7984_v32  ;;  %v6413_v62 = vpop.eup %6412 }
 0xa63   : > { %v2149_v22 = vmul.f32 %v6413_v62, %v8961_v16  ;;  %v6415_v57 = vpop.eup %6414 }
 0xa64   : > { %v2840_v32 = vmul.f32 %v6415_v57, %v7988_v1  ;;  %v6417_v1 = vpop.eup %6416 }
 0xa65   : > { %v6419_v9 = vpop.eup %6418 }
 0xa66   : > { %v2837_v15 = vmul.f32 %v6419_v9, %v7978_v54  ;;  %v6421_v8 = vpop.eup %6420  ;;  %v8964_v54 = vld [vmem:[#allocation62_spill] sm:$0xff] }
 0xa67   : > { %v2148_v50 = vmul.f32 %v6421_v8, %v8963_v59  ;;  %v6423_v55 = vpop.eup %6422 }
 0xa68   : > { %v2839_v43 = vmul.f32 %v6423_v55, %v7982_v37  ;;  %v6425_v52 = vpop.eup %6424 }
 0xa69   : > { %v2150_v34 = vmul.f32 %v6425_v52, %v8964_v54  ;;  %v6427_v41 = vpop.eup %6426 }
 0xa6a   : > { %v2841_v35 = vmul.f32 %v6427_v41, %v7986_v36 }
 0xa6d   : > { %2876 = vrot.lane.b32.xlu1 %v2835_v56, %s6546_s14 }
 0xa6e   : > { %v2170_v45 = vpop.permute.xlu1 %2169 }
 0xa6f   : > { %2217 = vst.msk [vmem:[#allocation2 + $0x8] sm:$0xff] %vm2215_vm3, %v2170_v45 }
 0xa72   : > { %v2859_v5 = vpop.permute.xlu0 %2858 }
 0xa73   : > { %2907 = vst.msk [vmem:[#allocation2] sm:$0xff] %vm2906_vm4, %v2859_v5 }
 0xa75   : > { %2874 = vrot.lane.b32.xlu0 %v2834_v26, %s6546_s14 }
 0xa76   : > { %v2861_v27 = vpop.permute.xlu1 %2860 }
 0xa77   : > { %2908 = vst.msk [vmem:[#allocation2 + $0x8] sm:$0xff] %vm2906_vm4, %v2861_v27 }
 0xa79   : > { %2187 = vrot.lane.b32.xlu0 %v2145_v21, %s6545_s13 }
 0xa7a   : > { %v2172_v58 = vpop.permute.xlu0 %2171 }
 0xa7b   : > { %2218 = vst.msk [vmem:[#allocation2 + $0x10] sm:$0xff] %vm2215_vm3, %v2172_v58 }
 0xa7d   : > { %2878 = vrot.lane.b32.xlu0 %v2836_v14, %s6546_s14 }
 0xa7e   : > { %v2863_v49 = vpop.permute.xlu0 %2862  ;;  %v2174_v47 = vpop.permute.xlu1 %2173 }
 0xa7f   : > { %2909 = vst.msk [vmem:[#allocation2 + $0x10] sm:$0xff] %vm2906_vm4, %v2863_v49 }
 0xa80   : > { %2219 = vst.msk [vmem:[#allocation2 + $0x18] sm:$0xff] %vm2215_vm3, %v2174_v47 }
 0xa81   : > { %2191 = vrot.lane.b32.xlu0 %v2147_v31, %s6545_s13 }
 0xa82   : > { %v2176_v48 = vpop.permute.xlu0 %2175  ;;  %v2865_v13 = vpop.permute.xlu1 %2864 }
 0xa83   : > { %2220 = vst.msk [vmem:[#allocation2 + $0x20] sm:$0xff] %vm2215_vm3, %v2176_v48 }
 0xa84   : > { %2910 = vst.msk [vmem:[#allocation2 + $0x18] sm:$0xff] %vm2906_vm4, %v2865_v13 }
 0xa85   : > { %2882 = vrot.lane.b32.xlu0 %v2838_v2, %s6546_s14 }
 0xa86   : > { %v2867_v33 = vpop.permute.xlu0 %2866  ;;  %v2178_v6 = vpop.permute.xlu1 %2177 }
 0xa87   : > { %2911 = vst.msk [vmem:[#allocation2 + $0x20] sm:$0xff] %vm2906_vm4, %v2867_v33 }
 0xa88   : > { %2221 = vst.msk [vmem:[#allocation2 + $0x28] sm:$0xff] %vm2215_vm3, %v2178_v6 }
 0xa89   : > { %2195 = vrot.lane.b32.xlu0 %v2149_v22, %s6545_s13 }
 0xa8a   : > { %v2180_v18 = vpop.permute.xlu0 %2179  ;;  %v2869_v46 = vpop.permute.xlu1 %2868 }
 0xa8b   : > { %2222 = vst.msk [vmem:[#allocation2 + $0x30] sm:$0xff] %vm2215_vm3, %v2180_v18 }
 0xa8c   : > { %2912 = vst.msk [vmem:[#allocation2 + $0x28] sm:$0xff] %vm2906_vm4, %v2869_v46 }
 0xa8d   : > { %2886 = vrot.lane.b32.xlu0 %v2840_v32, %s6546_s14 }
 0xa8e   : > { %v2871_v38 = vpop.permute.xlu0 %2870  ;;  %v2182_v39 = vpop.permute.xlu1 %2181 }
 0xa8f   : > { %2913 = vst.msk [vmem:[#allocation2 + $0x30] sm:$0xff] %vm2906_vm4, %v2871_v38 }
 0xa90   : > { %2223 = vst.msk [vmem:[#allocation2 + $0x38] sm:$0xff] %vm2215_vm3, %v2182_v39 }
 0xa91   : > { %3304 = vadd.xlane.f32.xlu1 %v8181_v17  ;;  %v2146_v17 = vmul.f32 %v6417_v1, %v8962_v25 }
 0xa92   : > { %v2184_v51 = vpop.permute.xlu0 %2183  ;;  %v2873_v29 = vpop.permute.xlu1 %2872 }
 0xa93   : > { %2224 = vst.msk [vmem:[#allocation2 + $0x40] sm:$0xff] %vm2215_vm3, %v2184_v51 }
 0xa94   : > { %2914 = vst.msk [vmem:[#allocation2 + $0x38] sm:$0xff] %vm2906_vm4, %v2873_v29 }
 0xa96   : > { %v2186_v23 = vpop.permute.xlu1 %2185 }
 0xa97   : > { %2225 = vst.msk [vmem:[#allocation2 + $0x48] sm:$0xff] %vm2215_vm3, %v2186_v23 }
 0xaa2   : > { %2189 = vrot.lane.b32.xlu1 %v2146_v17, %s6545_s13 }
 0xaa6   : > { %2880 = vrot.lane.b32.xlu1 %v2837_v15, %s6546_s14 }
 0xaa7   : > { %v5396_v3 = vpop.f32.mrb[48].mxu1 }
 0xaa8   : > { %v3422_v42 = vpop.f32.mrb[49].mxu1 }
 0xaaa   : > { %2193 = vrot.lane.b32.xlu1 %v2148_v50, %s6545_s13 }
 0xaae   : > { %v5399_v28 = vpop.f32.mrb[50].mxu1  ;;  %2884 = vrot.lane.b32.xlu1 %v2839_v43, %s6546_s14 }
 0xaaf   : > { %v3432_v0 = vpop.f32.mrb[51].mxu1 }
 0xab2   : > { %v5402_v40 = vpop.f32.mrb[52].mxu1  ;;  %2197 = vrot.lane.b32.xlu1 %v2150_v34, %s6545_s13 }
 0xab3   : > { %v3442_v20 = vpop.f32.mrb[53].mxu1 }
 0xab6   : > { %2888 = vrot.lane.b32.xlu1 %v2841_v35, %s6546_s14 }
 0xaba   : > { %v5405_v61 = vpop.f32.mrb[54].mxu1 }
 0xabb   : > { %v3452_v53 = vpop.f32.mrb[55].mxu1 }
 0xac2   : > { %v8343_v30 = vpop.f32.mrb[56].mxu1 }
 0xac3   : > { %v8345_v37 = vpop.f32.mrb[57].mxu1 }
 0xac6   : > { %v8347_v19 = vpop.f32.mrb[58].mxu1 }
 0xac7   : > { %v8349_v11 = vpop.f32.mrb[59].mxu1 }
 0xaca   : > { %v8351_v60 = vpop.f32.mrb[60].mxu1 }
 0xacb   : > { %v8353_v56 = vpop.f32.mrb[61].mxu1 }
 0xacc   : > { %v3279_v45 = vpop.xlane.xlu0 %3278 }
 0xacd   : > { %6428 = vrcp.f32 %v3279_v45 }
 0xad0   : > { %v3277_v63 = vpop.xlane.xlu0 %3276 }
 0xad1   : > { %6430 = vrcp.f32 %v3277_v63 }
 0xad4   : > { %v3283_v36 = vpop.xlane.xlu0 %3282 }
 0xad5   : > { %6432 = vrcp.f32 %v3283_v36  ;;  %v3281_v5 = vpop.xlane.xlu1 %3280 }
 0xad6   : > { %6434 = vrcp.f32 %v3281_v5 }
 0xad7   : > { %v6429_v26 = vpop.eup %6428 }
 0xad8   : > { %v3287_v4 = vpop.xlane.xlu0 %3286  ;;  %v3518_v27 = vmul.f32 %v6429_v26, %v5396_v3 }
 0xad9   : > { %6436 = vrcp.f32 %v3287_v4  ;;  %v3285_v12 = vpop.xlane.xlu1 %3284  ;;  %v6508_v4 = vld [vmem:[%s6625_s24 + $0x8] sm:$0xff] }
 0xada   : > { %6438 = vrcp.f32 %v3285_v12  ;;  %3551 = vrot.lane.b32.xlu1 %v3518_v27, %s6547_s15 }
 0xadb   : > { %v6431_v21 = vpop.eup %6430 }
 0xadc   : > { %v3291_v10 = vpop.xlane.xlu0 %3290  ;;  %v3517_v58 = vmul.f32 %v6431_v21, %v3422_v42 }
 0xadd   : > { %6440 = vrcp.f32 %v3291_v10  ;;  %v3289_v14 = vpop.xlane.xlu1 %3288 }
 0xade   : > { %6442 = vrcp.f32 %v3289_v14  ;;  %3549 = vrot.lane.b32.xlu0 %v3517_v58, %s6547_s15  ;;  %v6509_v14 = vld [vmem:[%s6625_s24] sm:$0xff] }
 0xadf   : > { %v6433_v44 = vpop.eup %6432 }
 0xae0   : > { %v6435_v49 = vpop.eup %6434  ;;  %v5417_v47 = vpop.f32.mrb[62].mxu1  ;;  %v3520_v31 = vmul.f32 %v6433_v44, %v5399_v28 }
 0xae1   : > { %v3295_v7 = vpop.xlane.xlu0 %3294  ;;  %v8357_v24 = vpop.f32.mrb[63].mxu1  ;;  %v3519_v13 = vmul.f32 %v6435_v49, %v3432_v0 }
 0xae2   : > { %6444 = vrcp.f32 %v3295_v7  ;;  %v3293_v48 = vpop.xlane.xlu1 %3292  ;;  %3555 = vrot.lane.b32.xlu1 %v3520_v31, %s6547_s15 }
 0xae3   : > { %6446 = vrcp.f32 %v3293_v48  ;;  %v6437_v2 = vpop.eup %6436  ;;  %3553 = vrot.lane.b32.xlu0 %v3519_v13, %s6547_s15  ;;  %v6510_v48 = vld [vmem:[%s6625_s24 + $0x10] sm:$0xff] }
 0xae4   : > { %v6439_v62 = vpop.eup %6438  ;;  %v3522_v6 = vmul.f32 %v6437_v2, %v5402_v40 }
 0xae5   : > { %v3299_v33 = vpop.xlane.xlu0 %3298  ;;  %v3521_v22 = vmul.f32 %v6439_v62, %v3442_v20 }
 0xae6   : > { %6448 = vrcp.f32 %v3299_v33  ;;  %v3297_v16 = vpop.xlane.xlu1 %3296  ;;  %3559 = vrot.lane.b32.xlu1 %v3522_v6, %s6547_s15  ;;  %v6511_v33 = vld [vmem:[%s6625_s24 + $0x18] sm:$0xff] }
 0xae7   : > { %6450 = vrcp.f32 %v3297_v16  ;;  %v6441_v57 = vpop.eup %6440  ;;  %3557 = vrot.lane.b32.xlu0 %v3521_v22, %s6547_s15 }
 0xae8   : > { %v6443_v18 = vpop.eup %6442  ;;  %v3524_v32 = vmul.f32 %v6441_v57, %v5405_v61 }
 0xae9   : > { %v3303_v46 = vpop.xlane.xlu0 %3302  ;;  %v3523_v39 = vmul.f32 %v6443_v18, %v3452_v53  ;;  %v6512_v18 = vld [vmem:[%s6625_s24 + $0x20] sm:$0xff] }
 0xaea   : > { %6452 = vrcp.f32 %v3303_v46  ;;  %v3301_v38 = vpop.xlane.xlu1 %3300  ;;  %3563 = vrot.lane.b32.xlu1 %v3524_v32, %s6547_s15 }
 0xaeb   : > { %6454 = vrcp.f32 %v3301_v38  ;;  %3561 = vrot.lane.b32.xlu0 %v3523_v39, %s6547_s15 }
 0xaec   : > { %v6445_v51 = vpop.eup %6444 }
 0xaed   : > { %v6447_v29 = vpop.eup %6446  ;;  %v3307_v23 = vpop.xlane.xlu0 %3306  ;;  %v3526_v1 = vmul.f32 %v6445_v51, %v8343_v30  ;;  %v6513_v51 = vld [vmem:[%s6625_s24 + $0x28] sm:$0xff] }
 0xaee   : > { %6456 = vrcp.f32 %v3307_v23  ;;  %v2877_v25 = vpop.permute.xlu1 %2876  ;;  %v3525_v17 = vmul.f32 %v6447_v29, %v8345_v37 }
 0xaef   : > { %2916 = vst.msk [vmem:[#allocation2 + $0x48] sm:$0xff] %vm2906_vm4, %v2877_v25  ;;  %3567 = vrot.lane.b32.xlu1 %v3526_v1, %s6547_s15 }
 0xaf0   : > { %v6449_v9 = vpop.eup %6448  ;;  %3565 = vrot.lane.b32.xlu0 %v3525_v17, %s6547_s15  ;;  %v6514_v17 = vld [vmem:[%s6625_s24 + $0x30] sm:$0xff] }
 0xaf1   : > { %v6451_v15 = vpop.eup %6450  ;;  %v2875_v8 = vpop.permute.xlu0 %2874  ;;  %v3528_v3 = vmul.f32 %v6449_v9, %v8347_v19 }
 0xaf2   : > { %2915 = vst.msk [vmem:[#allocation2 + $0x40] sm:$0xff] %vm2906_vm4, %v2875_v8  ;;  %v3527_v42 = vmul.f32 %v6451_v15, %v8349_v11 }
 0xaf3   : > { %3571 = vrot.lane.b32.xlu1 %v3528_v3, %s6547_s15 }
 0xaf4   : > { %v6453_v59 = vpop.eup %6452  ;;  %3569 = vrot.lane.b32.xlu0 %v3527_v42, %s6547_s15  ;;  %v6515_v42 = vld [vmem:[%s6625_s24 + $0x38] sm:$0xff] }
 0xaf5   : > { %v6455_v50 = vpop.eup %6454  ;;  %v2188_v55 = vpop.permute.xlu0 %2187  ;;  %v3530_v43 = vmul.f32 %v6453_v59, %v8351_v60 }
 0xaf6   : > { %2226 = vst.msk [vmem:[#allocation2 + $0x50] sm:$0xff] %vm2215_vm3, %v2188_v55  ;;  %v3529_v52 = vmul.f32 %v6455_v50, %v8353_v56 }
 0xaf7   : > { %3575 = vrot.lane.b32.xlu1 %v3530_v43, %s6547_s15 }
 0xaf8   : > { %v6457_v28 = vpop.eup %6456  ;;  %3573 = vrot.lane.b32.xlu0 %v3529_v52, %s6547_s15  ;;  %v6516_v52 = vld [vmem:[%s6625_s24 + $0x40] sm:$0xff] }
 0xaf9   : > { %v2879_v0 = vpop.permute.xlu0 %2878  ;;  %v3532_v54 = vmul.f32 %v6457_v28, %v5417_v47 }
 0xafa   : > { %2917 = vst.msk [vmem:[#allocation2 + $0x50] sm:$0xff] %vm2906_vm4, %v2879_v0 }
 0xafb   : > { %3579 = vrot.lane.b32.xlu1 %v3532_v54, %s6547_s15 }
 0xafd   : > { %v2192_v34 = vpop.permute.xlu0 %2191 }
 0xafe   : > { %2228 = vst.msk [vmem:[#allocation2 + $0x60] sm:$0xff] %vm2215_vm3, %v2192_v34 }
 0xb01   : > { %v2883_v41 = vpop.permute.xlu0 %2882 }
 0xb02   : > { %2919 = vst.msk [vmem:[#allocation2 + $0x60] sm:$0xff] %vm2906_vm4, %v2883_v41  ;;  %v6517_v41 = vld [vmem:[%s6625_s24 + $0x48] sm:$0xff] }
 0xb05   : > { %v2196_v40 = vpop.permute.xlu0 %2195 }
 0xb06   : > { %2230 = vst.msk [vmem:[#allocation2 + $0x70] sm:$0xff] %vm2215_vm3, %v2196_v40 }
 0xb09   : > { %v2887_v20 = vpop.permute.xlu0 %2886 }
 0xb0a   : > { %2921 = vst.msk [vmem:[#allocation2 + $0x70] sm:$0xff] %vm2906_vm4, %v2887_v20 }
 0xb1e   : > { %v3305_v35 = vpop.xlane.xlu1 %3304 }
 0xb1f   : > { %6458 = vrcp.f32 %v3305_v35 }
 0xb22   : > { %v2190_v61 = vpop.permute.xlu1 %2189 }
 0xb23   : > { %2227 = vst.msk [vmem:[#allocation2 + $0x58] sm:$0xff] %vm2215_vm3, %v2190_v61  ;;  %v6518_v61 = vld [vmem:[%s6625_s24 + $0x50] sm:$0xff] }
 0xb26   : > { %v2881_v53 = vpop.permute.xlu1 %2880 }
 0xb27   : > { %2918 = vst.msk [vmem:[#allocation2 + $0x58] sm:$0xff] %vm2906_vm4, %v2881_v53 }
 0xb29   : > { %v6459_v30 = vpop.eup %6458 }
 0xb2a   : > { %v2194_v37 = vpop.permute.xlu1 %2193  ;;  %v3531_v19 = vmul.f32 %v6459_v30, %v8357_v24 }
 0xb2b   : > { %2229 = vst.msk [vmem:[#allocation2 + $0x68] sm:$0xff] %vm2215_vm3, %v2194_v37 }
 0xb2c   : > { %3577 = vrot.lane.b32.xlu0 %v3531_v19, %s6547_s15  ;;  %v6519_v19 = vld [vmem:[%s6625_s24 + $0x58] sm:$0xff] }
 0xb2e   : > { %v2885_v11 = vpop.permute.xlu1 %2884 }
 0xb2f   : > { %2920 = vst.msk [vmem:[#allocation2 + $0x68] sm:$0xff] %vm2906_vm4, %v2885_v11 }
 0xb32   : > { %v2198_v60 = vpop.permute.xlu1 %2197 }
 0xb33   : > { %2231 = vst.msk [vmem:[#allocation2 + $0x78] sm:$0xff] %vm2215_vm3, %v2198_v60 }
 0xb36   : > { %v2889_v56 = vpop.permute.xlu1 %2888 }
 0xb37   : > { %2922 = vst.msk [vmem:[#allocation2 + $0x78] sm:$0xff] %vm2906_vm4, %v2889_v56 }
 0xb4c   : > { %v3552_v45 = vpop.permute.xlu1 %3551 }
 0xb4d   : > { %3599 = vst.msk [vmem:[#allocation2 + $0x8] sm:$0xff] %vm3597_vm5, %v3552_v45  ;;  %v6520_v45 = vld [vmem:[%s6625_s24 + $0x60] sm:$0xff] }
 0xb50   : > { %v3550_v63 = vpop.permute.xlu0 %3549 }
 0xb51   : > { %3598 = vst.msk [vmem:[#allocation2] sm:$0xff] %vm3597_vm5, %v3550_v63 }
 0xb54   : > { %v3556_v36 = vpop.permute.xlu1 %3555  ;;  %v3615_v5 = vld [vmem:[#allocation2 + $0x8] sm:$0xff] }
 0xb55   : > { %3601 = vst.msk [vmem:[#allocation2 + $0x18] sm:$0xff] %vm3597_vm5, %v3556_v36  ;;  %v3554_v26 = vpop.permute.xlu0 %3553  ;;  %v8398_v27 = vadd.f32 %v6508_v4, %v3615_v5 }
 0xb56   : > { %3600 = vst.msk [vmem:[#allocation2 + $0x10] sm:$0xff] %vm3597_vm5, %v3554_v26  ;;  %v6521_v26 = vld [vmem:[%s6625_s24 + $0x68] sm:$0xff] }
 0xb57   : > { %v3649_v12 = vsel %vm463_vm0, %v8398_v27, 0.0 }
 0xb58   : > { %3650 = vadd.xlane.f32.xlu1 %v3649_v12  ;;  %v3560_v21 = vpop.permute.xlu1 %3559  ;;  %v3614_v10 = vld [vmem:[#allocation2] sm:$0xff] }
 0xb59   : > { %3603 = vst.msk [vmem:[#allocation2 + $0x28] sm:$0xff] %vm3597_vm5, %v3560_v21  ;;  %v3558_v58 = vpop.permute.xlu0 %3557  ;;  %v8405_v44 = vadd.f32 %v6509_v14, %v3614_v10  ;;  %v6522_v10 = vld [vmem:[%s6625_s24 + $0x78] sm:$0xff] }
 0xb5a   : > { %3602 = vst.msk [vmem:[#allocation2 + $0x20] sm:$0xff] %vm3597_vm5, %v3558_v58 }
 0xb5b   : > { %v3646_v49 = vsel %vm463_vm0, %v8405_v44, 0.0 }
 0xb5c   : > { %3647 = vadd.xlane.f32.xlu0 %v3646_v49  ;;  %v3564_v47 = vpop.permute.xlu1 %3563  ;;  %v3617_v24 = vld [vmem:[#allocation2 + $0x18] sm:$0xff] }
 0xb5d   : > { %3605 = vst.msk [vmem:[#allocation2 + $0x38] sm:$0xff] %vm3597_vm5, %v3564_v47  ;;  %v3562_v7 = vpop.permute.xlu0 %3561  ;;  %v3616_v31 = vld [vmem:[#allocation2 + $0x10] sm:$0xff]  ;;  %v8418_v6 = vadd.f32 %v6511_v33, %v3617_v24 }
 0xb5e   : > { %3604 = vst.msk [vmem:[#allocation2 + $0x30] sm:$0xff] %vm3597_vm5, %v3562_v7  ;;  %v8413_v13 = vadd.f32 %v6510_v48, %v3616_v31  ;;  %v6523_v7 = vld [vmem:[%s6625_s24 + $0x70] sm:$0xff] }
 0xb5f   : > { %v3655_v39 = vsel %vm463_vm0, %v8418_v6, 0.0 }
 0xb60   : > { %v3652_v62 = vsel %vm463_vm0, %v8413_v13, 0.0  ;;  %v3619_v57 = vld [vmem:[#allocation2 + $0x28] sm:$0xff] }
 0xb61   : > { %v3568_v2 = vpop.permute.xlu1 %3567  ;;  %3653 = vadd.xlane.f32.xlu0 %v3652_v62  ;;  %v3618_v22 = vld [vmem:[#allocation2 + $0x20] sm:$0xff]  ;;  %v8430_v29 = vadd.f32 %v6513_v51, %v3619_v57 }
 0xb62   : > { %3607 = vst.msk [vmem:[#allocation2 + $0x48] sm:$0xff] %vm3597_vm5, %v3568_v2  ;;  %v3566_v16 = vpop.permute.xlu0 %3565  ;;  %v8423_v46 = vadd.f32 %v6512_v18, %v3618_v22 }
 0xb63   : > { %3606 = vst.msk [vmem:[#allocation2 + $0x40] sm:$0xff] %vm3597_vm5, %v3566_v16  ;;  %v3661_v3 = vsel %vm463_vm0, %v8430_v29, 0.0 }
 0xb64   : > { %v3658_v38 = vsel %vm463_vm0, %v8423_v46, 0.0  ;;  %v3621_v25 = vld [vmem:[#allocation2 + $0x38] sm:$0xff] }
 0xb65   : > { %v3572_v32 = vpop.permute.xlu1 %3571  ;;  %3659 = vadd.xlane.f32.xlu1 %v3658_v38  ;;  %3656 = vadd.xlane.f32.xlu0 %v3655_v39  ;;  %v3620_v1 = vld [vmem:[#allocation2 + $0x30] sm:$0xff]  ;;  %v8442_v59 = vadd.f32 %v6515_v42, %v3621_v25 }
 0xb66   : > { %3609 = vst.msk [vmem:[#allocation2 + $0x58] sm:$0xff] %vm3597_vm5, %v3572_v32  ;;  %v3570_v23 = vpop.permute.xlu0 %3569  ;;  %v8435_v9 = vadd.f32 %v6514_v17, %v3620_v1 }
 0xb67   : > { %3608 = vst.msk [vmem:[#allocation2 + $0x50] sm:$0xff] %vm3597_vm5, %v3570_v23  ;;  %v3667_v34 = vsel %vm463_vm0, %v8442_v59, 0.0 }
 0xb68   : > { %v3664_v8 = vsel %vm463_vm0, %v8435_v9, 0.0 }
 0xb69   : > { %v3576_v15 = vpop.permute.xlu1 %3575  ;;  %3665 = vadd.xlane.f32.xlu1 %v3664_v8  ;;  %3662 = vadd.xlane.f32.xlu0 %v3661_v3  ;;  %v3623_v43 = vld [vmem:[#allocation2 + $0x48] sm:$0xff] }
 0xb6a   : > { %3611 = vst.msk [vmem:[#allocation2 + $0x68] sm:$0xff] %vm3597_vm5, %v3576_v15  ;;  %v3574_v50 = vpop.permute.xlu0 %3573  ;;  %v3622_v55 = vld [vmem:[#allocation2 + $0x40] sm:$0xff]  ;;  %v8454_v40 = vadd.f32 %v6517_v41, %v3623_v43 }
 0xb6b   : > { %3610 = vst.msk [vmem:[#allocation2 + $0x60] sm:$0xff] %vm3597_vm5, %v3574_v50  ;;  %v8447_v28 = vadd.f32 %v6516_v52, %v3622_v55 }
 0xb6c   : > { %v3673_v37 = vsel %vm463_vm0, %v8454_v40, 0.0 }
 0xb6d   : > { %v3580_v0 = vpop.permute.xlu1 %3579  ;;  %v3670_v54 = vsel %vm463_vm0, %v8447_v28, 0.0  ;;  %3668 = vadd.xlane.f32.xlu0 %v3667_v34  ;;  %v3625_v35 = vld [vmem:[#allocation2 + $0x58] sm:$0xff] }
 0xb6e   : > { %3613 = vst.msk [vmem:[#allocation2 + $0x78] sm:$0xff] %vm3597_vm5, %v3580_v0  ;;  %3671 = vadd.xlane.f32.xlu1 %v3670_v54  ;;  %v3624_v20 = vld [vmem:[#allocation2 + $0x50] sm:$0xff]  ;;  %v8465_v11 = vadd.f32 %v6519_v19, %v3625_v35 }
 0xb6f   : > { %v8458_v53 = vadd.f32 %v6518_v61, %v3624_v20 }
 0xb70   : > { %v3679_v5 = vsel %vm463_vm0, %v8465_v11, 0.0 }
 0xb71   : > { %v3676_v30 = vsel %vm463_vm0, %v8458_v53, 0.0  ;;  %3674 = vadd.xlane.f32.xlu0 %v3673_v37  ;;  %v3627_v56 = vld [vmem:[#allocation2 + $0x68] sm:$0xff] }
 0xb72   : > { %3677 = vadd.xlane.f32.xlu1 %v3676_v30  ;;  %v3626_v60 = vld [vmem:[#allocation2 + $0x60] sm:$0xff]  ;;  %v8475_v4 = vadd.f32 %v6521_v26, %v3627_v56 }
 0xb73   : > { %v8468_v63 = vadd.f32 %v6520_v45, %v3626_v60 }
 0xb74   : > { %v3685_v21 = vsel %vm463_vm0, %v8475_v4, 0.0 }
 0xb75   : > { %v3682_v36 = vsel %vm463_vm0, %v8468_v63, 0.0  ;;  %3680 = vadd.xlane.f32.xlu0 %v3679_v5  ;;  %v3629_v12 = vld [vmem:[#allocation2 + $0x78] sm:$0xff] }
 0xb76   : > { %3683 = vadd.xlane.f32.xlu1 %v3682_v36  ;;  %v8480_v58 = vadd.f32 %v6522_v10, %v3629_v12 }
 0xb78   : > { %v3691_v14 = vsel %vm463_vm0, %v8480_v58, 0.0 }
 0xb79   : > { %3686 = vadd.xlane.f32.xlu0 %v3685_v21 }
 0xb7d   : > { %3692 = vadd.xlane.f32.xlu0 %v3691_v14 }
 0xb9e   : > { %v3578_v49 = vpop.permute.xlu0 %3577 }
 0xb9f   : > { %3612 = vst.msk [vmem:[#allocation2 + $0x70] sm:$0xff] %vm3597_vm5, %v3578_v49 }
 0xba6   : > { %v3628_v47 = vld [vmem:[#allocation2 + $0x70] sm:$0xff] }
 0xba7   : > { %v8486_v31 = vadd.f32 %v6523_v7, %v3628_v47 }
 0xba9   : > { %v3688_v24 = vsel %vm463_vm0, %v8486_v31, 0.0 }
 0xbaa   : > { %3689 = vadd.xlane.f32.xlu1 %v3688_v24 }
 0xbe5   : > { %v3651_v48 = vpop.xlane.xlu1 %3650 }
 0xbe6   : > { %v3695_v2 = vmul.f32 0.03125, %v3651_v48 }
 0xbe8   : > { %v8491_v62 = vsub.f32 %v8398_v27, %v3695_v2 }
 0xbe9   : > { %v3648_v33 = vpop.xlane.xlu0 %3647 }
 0xbea   : > { %v3694_v16 = vmul.f32 0.03125, %v3648_v33  ;;  %v3727_v22 = vmul.f32 %v8491_v62, %v8491_v62 }
 0xbec   : > { %v8496_v57 = vsub.f32 %v8405_v44, %v3694_v16  ;;  %v3745_v18 = vsel %vm463_vm0, %v3727_v22, 0.0 }
 0xbed   : > { %3746 = vadd.xlane.f32.xlu0 %v3745_v18 }
 0xbee   : > { %v3654_v32 = vpop.xlane.xlu0 %3653  ;;  %v3726_v38 = vmul.f32 %v8496_v57, %v8496_v57 }
 0xbef   : > { %v3696_v39 = vmul.f32 0.03125, %v3654_v32 }
 0xbf0   : > { %v3742_v51 = vsel %vm463_vm0, %v3726_v38, 0.0 }
 0xbf1   : > { %v8503_v27 = vsub.f32 %v8413_v13, %v3696_v39  ;;  %3743 = vadd.xlane.f32.xlu1 %v3742_v51 }
 0xbf2   : > { %v3657_v23 = vpop.xlane.xlu0 %3656  ;;  %v3660_v1 = vpop.xlane.xlu1 %3659 }
 0xbf3   : > { %v3697_v25 = vmul.f32 0.03125, %v3657_v23  ;;  %v3698_v17 = vmul.f32 0.03125, %v3660_v1  ;;  %v3728_v44 = vmul.f32 %v8503_v27, %v8503_v27  ;;  %v3886_v23 = vld [vmem:[%s8789_s6] sm:$0xff] }
 0xbf5   : > { %v8508_v15 = vsub.f32 %v8418_v6, %v3697_v25  ;;  %v8511_v8 = vsub.f32 %v8423_v46, %v3698_v17  ;;  %v3748_v3 = vsel %vm463_vm0, %v3728_v44, 0.0 }
 0xbf6   : > { %3749 = vadd.xlane.f32.xlu1 %v3748_v3  ;;  %v3663_v42 = vpop.xlane.xlu0 %3662  ;;  %v3666_v13 = vpop.xlane.xlu1 %3665  ;;  %v3888_v3 = vld [vmem:[%s8789_s6 + $0x10] sm:$0xff] }
 0xbf7   : > { %v3699_v50 = vmul.f32 0.03125, %v3663_v42  ;;  %v3700_v55 = vmul.f32 0.03125, %v3666_v13  ;;  %v3729_v43 = vmul.f32 %v8508_v15, %v8508_v15  ;;  %v3730_v52 = vmul.f32 %v8511_v8, %v8511_v8  ;;  %v3889_v42 = vld [vmem:[%s8789_s6 + $0x18] sm:$0xff] }
 0xbf8   : > { %v5814_v13 = vpack.c.bf16 %v3889_v42, %v3888_v3 }
 0xbf9   : > { %v8519_v0 = vsub.f32 %v8430_v29, %v3699_v50  ;;  %v8522_v6 = vsub.f32 %v8435_v9, %v3700_v55  ;;  %v3751_v46 = vsel %vm463_vm0, %v3729_v43, 0.0  ;;  %v3754_v54 = vsel %vm463_vm0, %v3730_v52, 0.0 }
 0xbfa   : > { %v3669_v34 = vpop.xlane.xlu0 %3668  ;;  %3752 = vadd.xlane.f32.xlu0 %v3751_v46  ;;  %3755 = vadd.xlane.f32.xlu1 %v3754_v54 }
 0xbfb   : > { %v3672_v41 = vpop.xlane.xlu1 %3671  ;;  %v3701_v20 = vmul.f32 0.03125, %v3669_v34  ;;  %v3731_v61 = vmul.f32 %v8519_v0, %v8519_v0  ;;  %v3732_v29 = vmul.f32 %v8522_v6, %v8522_v6 }
 0xbfc   : > { %v3702_v35 = vmul.f32 0.03125, %v3672_v41 }
 0xbfd   : > { %v8531_v30 = vsub.f32 %v8442_v59, %v3701_v20  ;;  %v3757_v37 = vsel %vm463_vm0, %v3731_v61, 0.0  ;;  %v3760_v19 = vsel %vm463_vm0, %v3732_v29, 0.0 }
 0xbfe   : > { %v8534_v9 = vsub.f32 %v8447_v28, %v3702_v35  ;;  %v3675_v60 = vpop.xlane.xlu0 %3674  ;;  %3758 = vadd.xlane.f32.xlu0 %v3757_v37  ;;  %3761 = vadd.xlane.f32.xlu1 %v3760_v19 }
 0xbff   : > { %v3678_v56 = vpop.xlane.xlu1 %3677  ;;  %v3703_v45 = vmul.f32 0.03125, %v3675_v60  ;;  %v3733_v5 = vmul.f32 %v8531_v30, %v8531_v30 }
 0xc00   : > { %v3704_v36 = vmul.f32 0.03125, %v3678_v56  ;;  %v3734_v59 = vmul.f32 %v8534_v9, %v8534_v9 }
 0xc01   : > { %v8543_v26 = vsub.f32 %v8454_v40, %v3703_v45  ;;  %v3763_v12 = vsel %vm463_vm0, %v3733_v5, 0.0 }
 0xc02   : > { %v8546_v28 = vsub.f32 %v8458_v53, %v3704_v36  ;;  %v3766_v21 = vsel %vm463_vm0, %v3734_v59, 0.0  ;;  %v3681_v10 = vpop.xlane.xlu0 %3680  ;;  %3764 = vadd.xlane.f32.xlu0 %v3763_v12 }
 0xc03   : > { %3767 = vadd.xlane.f32.xlu1 %v3766_v21  ;;  %v3684_v14 = vpop.xlane.xlu1 %3683  ;;  %v3705_v49 = vmul.f32 0.03125, %v3681_v10  ;;  %v3735_v7 = vmul.f32 %v8543_v26, %v8543_v26 }
 0xc04   : > { %v3706_v47 = vmul.f32 0.03125, %v3684_v14  ;;  %v3736_v40 = vmul.f32 %v8546_v28, %v8546_v28 }
 0xc05   : > { %v8555_v24 = vsub.f32 %v8465_v11, %v3705_v49  ;;  %v3769_v48 = vsel %vm463_vm0, %v3735_v7, 0.0 }
 0xc06   : > { %v8558_v53 = vsub.f32 %v8468_v63, %v3706_v47  ;;  %v3772_v2 = vsel %vm463_vm0, %v3736_v40, 0.0  ;;  %v3687_v33 = vpop.xlane.xlu0 %3686  ;;  %3770 = vadd.xlane.f32.xlu0 %v3769_v48 }
 0xc07   : > { %3773 = vadd.xlane.f32.xlu1 %v3772_v2  ;;  %v3707_v16 = vmul.f32 0.03125, %v3687_v33  ;;  %v3737_v22 = vmul.f32 %v8555_v24, %v8555_v24  ;;  %v8603_v2 = vld [vmem:[%s8787_s4] ss:$0 sm:$0xff] }
 0xc08   : > { %v3738_v18 = vmul.f32 %v8558_v53, %v8558_v53 }
 0xc09   : > { %v8567_v11 = vsub.f32 %v8475_v4, %v3707_v16  ;;  %v3775_v63 = vsel %vm463_vm0, %v3737_v22, 0.0  ;;  %v3887_v4 = vld [vmem:[%s8789_s6 + $0x8] sm:$0xff] }
 0xc0a   : > { %v3778_v32 = vsel %vm463_vm0, %v3738_v18, 0.0  ;;  %v3693_v38 = vpop.xlane.xlu0 %3692  ;;  %3776 = vadd.xlane.f32.xlu0 %v3775_v63  ;;  %v5810_v17 = vpack.c.bf16 %v3887_v4, %v3886_v23 }
 0xc0b   : > { %3779 = vadd.xlane.f32.xlu1 %v3778_v32  ;;  %v3709_v39 = vmul.f32 0.03125, %v3693_v38  ;;  %v3739_v51 = vmul.f32 %v8567_v11, %v8567_v11 }
 0xc0c   : > { %5811 = vmatprep.subr.bf16.mxu1 %v5810_v17 }
 0xc0d   : > { %v8580_v1 = vsub.f32 %v8480_v58, %v3709_v39  ;;  %v3781_v25 = vsel %vm463_vm0, %v3739_v51, 0.0  ;;  %5813 = vmatpush3.bf16.msra.mxu1 %v5810_v17 }
 0xc0e   : > { %3782 = vadd.xlane.f32.xlu0 %v3781_v25  ;;  %5815 = vmatprep.subr.bf16.mxu1 %v5814_v13 }
 0xc0f   : > { %v3741_v44 = vmul.f32 %v8580_v1, %v8580_v1 }
 0xc11   : > { %v3787_v58 = vsel %vm463_vm0, %v3741_v44, 0.0  ;;  %5817 = vmatpush3.bf16.msra.mxu1 %v5814_v13 }
 0xc12   : > { %3788 = vadd.xlane.f32.xlu0 %v3787_v58 }
 0xc37   : > { %v3690_v50 = vpop.xlane.xlu1 %3689 }
 0xc38   : > { %v3708_v55 = vmul.f32 0.03125, %v3690_v50 }
 0xc3a   : > { %v8593_v43 = vsub.f32 %v8486_v31, %v3708_v55 }
 0xc3c   : > { %v3740_v52 = vmul.f32 %v8593_v43, %v8593_v43 }
 0xc3e   : > { %v3784_v46 = vsel %vm463_vm0, %v3740_v52, 0.0 }
 0xc3f   : > { %3785 = vadd.xlane.f32.xlu1 %v3784_v46 }
 0xc7a   : > { %v3747_v54 = vpop.xlane.xlu0 %3746 }
 0xc7b   : > { %v3791_v34 = vmul.f32 0.03125, %v3747_v54 }
 0xc7d   : > { %v3807_v41 = vadd.f32 1e-05, %v3791_v34 }
 0xc7e   : > { %v3744_v20 = vpop.xlane.xlu1 %3743 }
 0xc7f   : > { %6460 = vrsqrt.f32 %v3807_v41  ;;  %v3790_v35 = vmul.f32 0.03125, %v3744_v20 }
 0xc81   : > { %v3806_v61 = vadd.f32 1e-05, %v3790_v35 }
 0xc83   : > { %6462 = vrsqrt.f32 %v3806_v61  ;;  %v3750_v29 = vpop.xlane.xlu1 %3749 }
 0xc84   : > { %v3792_v37 = vmul.f32 0.03125, %v3750_v29 }
 0xc86   : > { %v3808_v19 = vadd.f32 1e-05, %v3792_v37 }
 0xc87   : > { %v3753_v60 = vpop.xlane.xlu0 %3752  ;;  %v3756_v31 = vpop.xlane.xlu1 %3755 }
 0xc88   : > { %6464 = vrsqrt.f32 %v3808_v19  ;;  %v3793_v56 = vmul.f32 0.03125, %v3753_v60  ;;  %v3794_v45 = vmul.f32 0.03125, %v3756_v31 }
 0xc89   : > { %v6461_v36 = vpop.eup %6460 }
 0xc8a   : > { %v3809_v5 = vadd.f32 1e-05, %v3793_v56  ;;  %v3810_v59 = vadd.f32 1e-05, %v3794_v45  ;;  %v3839_v12 = vmul.f32 %v6461_v36, %v8491_v62 }
 0xc8b   : > { %v3759_v21 = vpop.xlane.xlu0 %3758  ;;  %v3762_v10 = vpop.xlane.xlu1 %3761 }
 0xc8c   : > { %6466 = vrsqrt.f32 %v3809_v5  ;;  %v3795_v14 = vmul.f32 0.03125, %v3759_v21  ;;  %v3796_v49 = vmul.f32 0.03125, %v3762_v10  ;;  %v3855_v33 = vmul.f32 %v8603_v2, %v3839_v12 }
 0xc8d   : > { %v6463_v47 = vpop.eup %6462  ;;  %6468 = vrsqrt.f32 %v3810_v59 }
 0xc8e   : > { %v3811_v7 = vadd.f32 1e-05, %v3795_v14  ;;  %v3812_v40 = vadd.f32 1e-05, %v3796_v49  ;;  %v3838_v48 = vmul.f32 %v6463_v47, %v8496_v57  ;;  %v8610_v57 = vld [vmem:[%s8788_s5] ss:$0 sm:$0xff] }
 0xc8f   : > { %v3765_v16 = vpop.xlane.xlu0 %3764  ;;  %v3871_v23 = vadd.f32 %v8610_v57, %v3855_v33 }
 0xc90   : > { %v3768_v62 = vpop.xlane.xlu1 %3767  ;;  %6470 = vrsqrt.f32 %v3811_v7  ;;  %v3797_v22 = vmul.f32 0.03125, %v3765_v16  ;;  %v3854_v63 = vmul.f32 %v8603_v2, %v3838_v48 }
 0xc91   : > { %v3798_v18 = vmul.f32 0.03125, %v3768_v62  ;;  %6472 = vrsqrt.f32 %v3812_v40 }
 0xc92   : > { %v6465_v32 = vpop.eup %6464  ;;  %v3813_v38 = vadd.f32 1e-05, %v3797_v22  ;;  %v3870_v51 = vadd.f32 %v8610_v57, %v3854_v63 }
 0xc93   : > { %v3814_v39 = vadd.f32 1e-05, %v3798_v18  ;;  %v3771_v4 = vpop.xlane.xlu0 %3770  ;;  %v3840_v17 = vmul.f32 %v6465_v32, %v8503_v27 }
 0xc94   : > { %v3774_v25 = vpop.xlane.xlu1 %3773  ;;  %6474 = vrsqrt.f32 %v3813_v38  ;;  %v3799_v44 = vmul.f32 0.03125, %v3771_v4  ;;  %5426 = vmatprep.mubr.msk.f32.mxu1 %vm463_vm0, %v3870_v51 }
 0xc95   : > { %v3800_v3 = vmul.f32 0.03125, %v3774_v25  ;;  %6476 = vrsqrt.f32 %v3814_v39  ;;  %5427 = vmatmul.mubr.msk.f32.vlgmr.msra.gmra.mrb[64].mxu1 %vm463_vm0, %v3871_v23  ;;  %v3856_v42 = vmul.f32 %v8603_v2, %v3840_v17 }
 0xc96   : > { %v6467_v58 = vpop.eup %6466  ;;  %v3815_v13 = vadd.f32 1e-05, %v3799_v44 }
 0xc97   : > { %v3816_v50 = vadd.f32 1e-05, %v3800_v3  ;;  %v6469_v55 = vpop.eup %6468  ;;  %v3777_v52 = vpop.xlane.xlu0 %3776  ;;  %v3872_v54 = vadd.f32 %v8610_v57, %v3856_v42  ;;  %v3841_v27 = vmul.f32 %v6467_v58, %v8508_v15 }
 0xc98   : > { %v3780_v46 = vpop.xlane.xlu1 %3779  ;;  %6478 = vrsqrt.f32 %v3815_v13  ;;  %v3801_v34 = vmul.f32 0.03125, %v3777_v52  ;;  %v3842_v20 = vmul.f32 %v6469_v55, %v8511_v8 }
 0xc99   : > { %v3802_v41 = vmul.f32 0.03125, %v3780_v46  ;;  %6480 = vrsqrt.f32 %v3816_v50  ;;  %5429 = vmatprep.mubr.msk.f32.mxu1 %vm463_vm0, %v3872_v54  ;;  %v3857_v35 = vmul.f32 %v8603_v2, %v3841_v27 }
 0xc9a   : > { %v6471_v61 = vpop.eup %6470  ;;  %v3817_v29 = vadd.f32 1e-05, %v3801_v34  ;;  %v3858_v19 = vmul.f32 %v8603_v2, %v3842_v20  ;;  %v4140_v20 = vld [vmem:[%s8791_s8] sm:$0xff] }
 0xc9b   : > { %v3818_v37 = vadd.f32 1e-05, %v3802_v41  ;;  %v6473_v60 = vpop.eup %6472  ;;  %v3783_v31 = vpop.xlane.xlu0 %3782  ;;  %v3873_v56 = vadd.f32 %v8610_v57, %v3857_v35  ;;  %v3843_v15 = vmul.f32 %v6471_v61, %v8519_v0  ;;  %v8687_v61 = vld [vmem:[%s8790_s7] ss:$0 sm:$0xff] }
 0xc9c   : > { %6482 = vrsqrt.f32 %v3817_v29  ;;  %v3803_v45 = vmul.f32 0.03125, %v3783_v31  ;;  %v3874_v8 = vadd.f32 %v8610_v57, %v3858_v19  ;;  %v3844_v36 = vmul.f32 %v6473_v60, %v8522_v6 }
 0xc9d   : > { %6484 = vrsqrt.f32 %v3818_v37  ;;  %5430 = vmatmul.mubr.msk.f32.gmra.mrb[66].mxu1 %vm463_vm0, %v3873_v56  ;;  %v3859_v5 = vmul.f32 %v8603_v2, %v3843_v15  ;;  %v8689_v37 = vstv %s4090_s17 }
 0xc9e   : > { %v6475_v59 = vpop.eup %6474  ;;  %v3819_v12 = vadd.f32 1e-05, %v3803_v45  ;;  %5432 = vmatprep.mubr.msk.f32.mxu1 %vm463_vm0, %v3874_v8  ;;  %v3860_v21 = vmul.f32 %v8603_v2, %v3844_v36 }
 0xc9f   : > { %v6477_v10 = vpop.eup %6476  ;;  %v3875_v0 = vadd.f32 %v8610_v57, %v3859_v5  ;;  %v3845_v14 = vmul.f32 %v6475_v59, %v8531_v30  ;;  %v3789_v44 = vpop.xlane.xlu0 %3788 }
 0xca0   : > { %6486 = vrsqrt.f32 %v3819_v12  ;;  %v3876_v49 = vadd.f32 %v8610_v57, %v3860_v21  ;;  %v3846_v6 = vmul.f32 %v6477_v10, %v8534_v9  ;;  %v3805_v3 = vmul.f32 0.03125, %v3789_v44 }
 0xca1   : > { %5433 = vmatmul.mubr.msk.f32.gmra.mrb[68].mxu1 %vm463_vm0, %v3875_v0  ;;  %v3861_v47 = vmul.f32 %v8603_v2, %v3845_v14 }
 0xca2   : > { %v6479_v7 = vpop.eup %6478  ;;  %5435 = vmatprep.mubr.msk.f32.mxu1 %vm463_vm0, %v3876_v49  ;;  %v3862_v40 = vmul.f32 %v8603_v2, %v3846_v6  ;;  %v3821_v42 = vadd.f32 1e-05, %v3805_v3 }
 0xca3   : > { %v6481_v48 = vpop.eup %6480  ;;  %v3877_v33 = vadd.f32 %v8610_v57, %v3861_v47  ;;  %v3847_v16 = vmul.f32 %v6479_v7, %v8543_v26 }
 0xca4   : > { %v3878_v30 = vadd.f32 %v8610_v57, %v3862_v40  ;;  %v3848_v62 = vmul.f32 %v6481_v48, %v8546_v28  ;;  %6488 = vrsqrt.f32 %v3821_v42 }
 0xca5   : > { %5436 = vmatmul.mubr.msk.f32.gmra.mrb[70].mxu1 %vm463_vm0, %v3877_v33  ;;  %v3863_v9 = vmul.f32 %v8603_v2, %v3847_v16 }
 0xca6   : > { %v6483_v22 = vpop.eup %6482  ;;  %5438 = vmatprep.mubr.msk.f32.mxu1 %vm463_vm0, %v3878_v30  ;;  %v3864_v18 = vmul.f32 %v8603_v2, %v3848_v62 }
 0xca7   : > { %v6485_v63 = vpop.eup %6484  ;;  %v3879_v32 = vadd.f32 %v8610_v57, %v3863_v9  ;;  %v3849_v38 = vmul.f32 %v6483_v22, %v8555_v24 }
 0xca8   : > { %v3880_v26 = vadd.f32 %v8610_v57, %v3864_v18  ;;  %v3850_v39 = vmul.f32 %v6485_v63, %v8558_v53 }
 0xca9   : > { %5439 = vmatmul.mubr.msk.f32.gmra.mrb[72].mxu1 %vm463_vm0, %v3879_v32  ;;  %v3865_v28 = vmul.f32 %v8603_v2, %v3849_v38 }
 0xcaa   : > { %v6487_v51 = vpop.eup %6486  ;;  %5441 = vmatprep.mubr.msk.f32.mxu1 %vm463_vm0, %v3880_v26  ;;  %v3866_v23 = vmul.f32 %v8603_v2, %v3850_v39 }
 0xcab   : > { %v3881_v4 = vadd.f32 %v8610_v57, %v3865_v28  ;;  %v3851_v25 = vmul.f32 %v6487_v51, %v8567_v11 }
 0xcac   : > { %v3882_v17 = vadd.f32 %v8610_v57, %v3866_v23 }
 0xcad   : > { %5442 = vmatmul.mubr.msk.f32.gmra.mrb[74].mxu1 %vm463_vm0, %v3881_v4  ;;  %v3867_v24 = vmul.f32 %v8603_v2, %v3851_v25 }
 0xcae   : > { %5444 = vmatprep.mubr.msk.f32.mxu1 %vm463_vm0, %v3882_v17  ;;  %v6489_v11 = vpop.eup %6488 }
 0xcaf   : > { %v3883_v53 = vadd.f32 %v8610_v57, %v3867_v24  ;;  %v3853_v55 = vmul.f32 %v6489_v11, %v8580_v1  ;;  %v4141_v1 = vld [vmem:[%s8791_s8 + $0x8] sm:$0xff] }
 0xcb1   : > { %5445 = vmatmul.mubr.msk.f32.gmra.mrb[76].mxu1 %vm463_vm0, %v3883_v53  ;;  %v3869_v54 = vmul.f32 %v8603_v2, %v3853_v55 }
 0xcb3   : > { %v3885_v41 = vadd.f32 %v8610_v57, %v3869_v54 }
 0xccc   : > { %v3786_v58 = vpop.xlane.xlu1 %3785 }
 0xccd   : > { %v3804_v13 = vmul.f32 0.03125, %v3786_v58 }
 0xccf   : > { %v3820_v50 = vadd.f32 1e-05, %v3804_v13 }
 0xcd1   : > { %6490 = vrsqrt.f32 %v3820_v50 }
 0xcdb   : > { %v6491_v52 = vpop.eup %6490 }
 0xcdc   : > { %v3852_v46 = vmul.f32 %v6491_v52, %v8593_v43  ;;  %v5818_v43 = vpack.c.bf16 %v4141_v1, %v4140_v20 }
 0xcde   : > { %v3868_v27 = vmul.f32 %v8603_v2, %v3852_v46  ;;  %5819 = vmatprep.subr.bf16.mxu0 %v5818_v43  ;;  %5826 = vmatprep.subr.bf16.mxu1 %v5818_v43  ;;  %v4142_v2 = vld [vmem:[%s8791_s8 + $0x10] sm:$0xff] }
 0xcdf   : > { %5821 = vmatpush3.bf16.msra.mxu0 %v5818_v43  ;;  %5828 = vmatpush3.bf16.msra.mxu1 %v5818_v43 }
 0xce0   : > { %v3884_v34 = vadd.f32 %v8610_v57, %v3868_v27  ;;  %v4143_v57 = vld [vmem:[%s8791_s8 + $0x18] sm:$0xff] }
 0xce1   : > { %v5822_v35 = vpack.c.bf16 %v4143_v57, %v4142_v2 }
 0xce2   : > { %5447 = vmatprep.mubr.msk.f32.mxu1 %vm463_vm0, %v3884_v34 }
 0xce3   : > { %5448 = vmatmul.mubr.msk.f32.gmra.mrb[78].mxu1 %vm463_vm0, %v3885_v41  ;;  %5823 = vmatprep.subr.bf16.mxu0 %v5822_v35 }
 0xce4   : > { %5827 = vmatprep.subr.bf16.mxu1 %v5822_v35  ;;  %5825 = vmatpush3.bf16.msra.mxu0 %v5822_v35 }
 0xce5   : > { %5829 = vmatpush3.bf16.msra.mxu1 %v5822_v35 }
 0xd68   : > { %v5428_v29 = vpop.f32.mrb[64].mxu1 }
 0xd69   : > { %v4017_v19 = vadd.f32 %v5428_v29, %v8687_v61  ;;  %v4011_v60 = vpop.f32.mrb[65].mxu1 }
 0xd6a   : > { %v4012_v31 = vadd.f32 %v8687_v61, %v4011_v60  ;;  %v4603_v60 = vld [vmem:[%s8792_s9] ss:$0 sm:$0xff] }
 0xd6b   : > { %v4109_v56 = vmul.f32 %v8689_v37, %v4017_v19  ;;  %vm4092_vm6 = vcmp.gt.f32.partialorder %v4017_v19, 0.0 }
 0xd6c   : > { %vm4091_vm7 = vcmp.gt.f32.partialorder %v4012_v31, 0.0  ;;  %v4108_v15 = vmul.f32 %v8689_v37, %v4012_v31 }
 0xd6d   : > { %v4125_v8 = vsel %vm4092_vm6, %v4017_v19, %v4109_v56 }
 0xd6e   : > { %v4124_v45 = vsel %vm4091_vm7, %v4012_v31, %v4108_v15  ;;  %vm4344_vm7 = vcmask 15360  }
 0xd6f   : > { %5458 = vmatprep.mubr.msk.f32.mxu0 %vm463_vm0, %v4124_v45 }
 0xd70   : > { %v5431_v36 = vpop.f32.mrb[66].mxu1  ;;  %5459 = vmatmul.mubr.msk.f32.vlgmr.msra.gmra.mrb[80].mxu0 %vm463_vm0, %v4125_v8 }
 0xd71   : > { %v4027_v5 = vadd.f32 %v5431_v36, %v8687_v61  ;;  %v4021_v59 = vpop.f32.mrb[67].mxu1 }
 0xd72   : > { %v4022_v12 = vadd.f32 %v8687_v61, %v4021_v59 }
 0xd73   : > { %v4111_v21 = vmul.f32 %v8689_v37, %v4027_v5  ;;  %vm4094_vm8 = vcmp.gt.f32.partialorder %v4027_v5, 0.0 }
 0xd74   : > { %vm4093_vm9 = vcmp.gt.f32.partialorder %v4022_v12, 0.0  ;;  %v4110_v10 = vmul.f32 %v8689_v37, %v4022_v12  ;;  %v5434_v0 = vpop.f32.mrb[68].mxu1 }
 0xd75   : > { %v4037_v14 = vadd.f32 %v5434_v0, %v8687_v61  ;;  %v4031_v49 = vpop.f32.mrb[69].mxu1  ;;  %v4127_v40 = vsel %vm4094_vm8, %v4027_v5, %v4111_v21 }
 0xd76   : > { %v4032_v6 = vadd.f32 %v8687_v61, %v4031_v49  ;;  %v4126_v47 = vsel %vm4093_vm9, %v4022_v12, %v4110_v10 }
 0xd77   : > { %v4113_v7 = vmul.f32 %v8689_v37, %v4037_v14  ;;  %5461 = vmatprep.mubr.msk.f32.mxu0 %vm463_vm0, %v4126_v47  ;;  %vm4096_vm10 = vcmp.gt.f32.partialorder %v4037_v14, 0.0 }
 0xd78   : > { %vm4095_vm11 = vcmp.gt.f32.partialorder %v4032_v6, 0.0  ;;  %v4112_v48 = vmul.f32 %v8689_v37, %v4032_v6  ;;  %v5437_v33 = vpop.f32.mrb[70].mxu1  ;;  %5462 = vmatmul.mubr.msk.f32.gmra.mrb[82].mxu0 %vm463_vm0, %v4127_v40 }
 0xd79   : > { %v4047_v16 = vadd.f32 %v5437_v33, %v8687_v61  ;;  %v4041_v30 = vpop.f32.mrb[71].mxu1  ;;  %v4129_v18 = vsel %vm4096_vm10, %v4037_v14, %v4113_v7 }
 0xd7a   : > { %v4042_v62 = vadd.f32 %v8687_v61, %v4041_v30  ;;  %v4128_v9 = vsel %vm4095_vm11, %v4032_v6, %v4112_v48 }
 0xd7b   : > { %v4115_v22 = vmul.f32 %v8689_v37, %v4047_v16  ;;  %5464 = vmatprep.mubr.msk.f32.mxu0 %vm463_vm0, %v4128_v9  ;;  %vm4098_vm12 = vcmp.gt.f32.partialorder %v4047_v16, 0.0 }
 0xd7c   : > { %vm4097_vm13 = vcmp.gt.f32.partialorder %v4042_v62, 0.0  ;;  %v4114_v63 = vmul.f32 %v8689_v37, %v4042_v62  ;;  %v5440_v32 = vpop.f32.mrb[72].mxu1  ;;  %5465 = vmatmul.mubr.msk.f32.gmra.mrb[84].mxu0 %vm463_vm0, %v4129_v18 }
 0xd7d   : > { %v4057_v38 = vadd.f32 %v5440_v32, %v8687_v61  ;;  %v4051_v26 = vpop.f32.mrb[73].mxu1  ;;  %v4131_v23 = vsel %vm4098_vm12, %v4047_v16, %v4115_v22 }
 0xd7e   : > { %v4052_v39 = vadd.f32 %v8687_v61, %v4051_v26  ;;  %v4130_v28 = vsel %vm4097_vm13, %v4042_v62, %v4114_v63 }
 0xd7f   : > { %v4117_v51 = vmul.f32 %v8689_v37, %v4057_v38  ;;  %5467 = vmatprep.mubr.msk.f32.mxu0 %vm463_vm0, %v4130_v28  ;;  %vm4100_vm14 = vcmp.gt.f32.partialorder %v4057_v38, 0.0 }
 0xd80   : > { %vm4099_vm15 = vcmp.gt.f32.partialorder %v4052_v39, 0.0  ;;  %v4116_v4 = vmul.f32 %v8689_v37, %v4052_v39  ;;  %v5443_v25 = vpop.f32.mrb[74].mxu1  ;;  %5468 = vmatmul.mubr.msk.f32.gmra.mrb[86].mxu0 %vm463_vm0, %v4131_v23 }
 0xd81   : > { %v4067_v17 = vadd.f32 %v5443_v25, %v8687_v61  ;;  %v4061_v24 = vpop.f32.mrb[75].mxu1  ;;  %v4133_v42 = vsel %vm4100_vm14, %v4057_v38, %v4117_v51 }
 0xd82   : > { %v4062_v53 = vadd.f32 %v8687_v61, %v4061_v24  ;;  %v4132_v44 = vsel %vm4099_vm15, %v4052_v39, %v4116_v4 }
 0xd83   : > { %v4119_v3 = vmul.f32 %v8689_v37, %v4067_v17  ;;  %5470 = vmatprep.mubr.msk.f32.mxu0 %vm463_vm0, %v4132_v44  ;;  %vm4102_vm1 = vcmp.gt.f32.partialorder %v4067_v17, 0.0 }
 0xd84   : > { %vm4101_vm2 = vcmp.gt.f32.partialorder %v4062_v53, 0.0  ;;  %v4118_v58 = vmul.f32 %v8689_v37, %v4062_v53  ;;  %v5446_v13 = vpop.f32.mrb[76].mxu1  ;;  %5471 = vmatmul.mubr.msk.f32.gmra.mrb[88].mxu0 %vm463_vm0, %v4133_v42 }
 0xd85   : > { %v4077_v50 = vadd.f32 %v5446_v13, %v8687_v61  ;;  %v4071_v11 = vpop.f32.mrb[77].mxu1  ;;  %v4135_v54 = vsel %vm4102_vm1, %v4067_v17, %v4119_v3 }
 0xd86   : > { %v4072_v55 = vadd.f32 %v8687_v61, %v4071_v11  ;;  %v4134_v52 = vsel %vm4101_vm2, %v4062_v53, %v4118_v58 }
 0xd87   : > { %v4121_v46 = vmul.f32 %v8689_v37, %v4077_v50  ;;  %5473 = vmatprep.mubr.msk.f32.mxu0 %vm463_vm0, %v4134_v52  ;;  %vm4104_vm3 = vcmp.gt.f32.partialorder %v4077_v50, 0.0 }
 0xd88   : > { %vm4103_vm4 = vcmp.gt.f32.partialorder %v4072_v55, 0.0  ;;  %v4120_v27 = vmul.f32 %v8689_v37, %v4072_v55  ;;  %5474 = vmatmul.mubr.msk.f32.gmra.mrb[90].mxu0 %vm463_vm0, %v4135_v54 }
 0xd89   : > { %v4137_v41 = vsel %vm4104_vm3, %v4077_v50, %v4121_v46 }
 0xd8a   : > { %v4136_v34 = vsel %vm4103_vm4, %v4072_v55, %v4120_v27 }
 0xd8b   : > { %5476 = vmatprep.mubr.msk.f32.mxu0 %vm463_vm0, %v4136_v34 }
 0xd8c   : > { %5477 = vmatmul.mubr.msk.f32.gmra.mrb[92].mxu0 %vm463_vm0, %v4137_v41 }
 0xdb6   : > { %v5449_v20 = vpop.f32.mrb[78].mxu1 }
 0xdb7   : > { %v4087_v1 = vadd.f32 %v5449_v20, %v8687_v61  ;;  %v4081_v43 = vpop.f32.mrb[79].mxu1 }
 0xdb8   : > { %v4082_v2 = vadd.f32 %v8687_v61, %v4081_v43 }
 0xdb9   : > { %v4123_v57 = vmul.f32 %v8689_v37, %v4087_v1  ;;  %vm4106_vm5 = vcmp.gt.f32.partialorder %v4087_v1, 0.0 }
 0xdba   : > { %vm4105_vm6 = vcmp.gt.f32.partialorder %v4082_v2, 0.0  ;;  %v4122_v35 = vmul.f32 %v8689_v37, %v4082_v2 }
 0xdbb   : > { %v4139_v19 = vsel %vm4106_vm5, %v4087_v1, %v4123_v57 }
 0xdbc   : > { %v4138_v29 = vsel %vm4105_vm6, %v4082_v2, %v4122_v35 }
 0xdbd   : > { %5479 = vmatprep.mubr.msk.f32.mxu1 %vm463_vm0, %v4138_v29 }
 0xdbe   : > { %5480 = vmatmul.mubr.msk.f32.vlgmr.msra.gmra.mrb[80].mxu1 %vm463_vm0, %v4139_v19 }
 0xe43   : > { %v5460_v61 = vpop.f32.mrb[80].mxu0 }
 0xe44   : > { %v4271_v37 = vadd.f32 %v5460_v61, %v4603_v60  ;;  %v4265_v31 = vpop.f32.mrb[81].mxu0 }
 0xe45   : > { %v4266_v56 = vadd.f32 %v4603_v60, %v4265_v31 }
 0xe46   : > { %4346 = vst.msk [vmem:[%s8746_s25 + $0x8] sm:$0xff] %vm4344_vm7, %v4271_v37 }
 0xe47   : > { %4345 = vst.msk [vmem:[%s8746_s25] sm:$0xff] %vm4344_vm7, %v4266_v56 }
 0xe4b   : > { %v5463_v15 = vpop.f32.mrb[82].mxu0 }
 0xe4c   : > { %v4281_v45 = vadd.f32 %v5463_v15, %v4603_v60  ;;  %v4275_v8 = vpop.f32.mrb[83].mxu0 }
 0xe4d   : > { %v4276_v36 = vadd.f32 %v4603_v60, %v4275_v8 }
 0xe4e   : > { %4348 = vst.msk [vmem:[%s8746_s25 + $0x18] sm:$0xff] %vm4344_vm7, %v4281_v45 }
 0xe4f   : > { %4347 = vst.msk [vmem:[%s8746_s25 + $0x10] sm:$0xff] %vm4344_vm7, %v4276_v36  ;;  %v5466_v5 = vpop.f32.mrb[84].mxu0 }
 0xe50   : > { %v4291_v59 = vadd.f32 %v5466_v5, %v4603_v60  ;;  %v4285_v12 = vpop.f32.mrb[85].mxu0 }
 0xe51   : > { %v4286_v21 = vadd.f32 %v4603_v60, %v4285_v12 }
 0xe52   : > { %4350 = vst.msk [vmem:[%s8746_s25 + $0x28] sm:$0xff] %vm4344_vm7, %v4291_v59 }
 0xe53   : > { %4349 = vst.msk [vmem:[%s8746_s25 + $0x20] sm:$0xff] %vm4344_vm7, %v4286_v21  ;;  %v5469_v10 = vpop.f32.mrb[86].mxu0 }
 0xe54   : > { %v4301_v0 = vadd.f32 %v5469_v10, %v4603_v60  ;;  %v4295_v14 = vpop.f32.mrb[87].mxu0 }
 0xe55   : > { %v4296_v49 = vadd.f32 %v4603_v60, %v4295_v14 }
 0xe56   : > { %4352 = vst.msk [vmem:[%s8746_s25 + $0x38] sm:$0xff] %vm4344_vm7, %v4301_v0 }
 0xe57   : > { %4351 = vst.msk [vmem:[%s8746_s25 + $0x30] sm:$0xff] %vm4344_vm7, %v4296_v49  ;;  %v5472_v6 = vpop.f32.mrb[88].mxu0 }
 0xe58   : > { %v4311_v47 = vadd.f32 %v5472_v6, %v4603_v60  ;;  %v4305_v7 = vpop.f32.mrb[89].mxu0 }
 0xe59   : > { %v4306_v40 = vadd.f32 %v4603_v60, %v4305_v7 }
 0xe5a   : > { %4354 = vst.msk [vmem:[%s8746_s25 + $0x48] sm:$0xff] %vm4344_vm7, %v4311_v47 }
 0xe5b   : > { %4353 = vst.msk [vmem:[%s8746_s25 + $0x40] sm:$0xff] %vm4344_vm7, %v4306_v40  ;;  %v5475_v48 = vpop.f32.mrb[90].mxu0 }
 0xe5c   : > { %v4321_v33 = vadd.f32 %v5475_v48, %v4603_v60  ;;  %v4315_v16 = vpop.f32.mrb[91].mxu0 }
 0xe5d   : > { %v4316_v30 = vadd.f32 %v4603_v60, %v4315_v16 }
 0xe5e   : > { %4356 = vst.msk [vmem:[%s8746_s25 + $0x58] sm:$0xff] %vm4344_vm7, %v4321_v33 }
 0xe5f   : > { %4355 = vst.msk [vmem:[%s8746_s25 + $0x50] sm:$0xff] %vm4344_vm7, %v4316_v30  ;;  %v5478_v62 = vpop.f32.mrb[92].mxu0 }
 0xe60   : > { %v4331_v9 = vadd.f32 %v5478_v62, %v4603_v60  ;;  %v4325_v22 = vpop.f32.mrb[93].mxu0 }
 0xe61   : > { %v4326_v18 = vadd.f32 %v4603_v60, %v4325_v22 }
 0xe62   : > { %4358 = vst.msk [vmem:[%s8746_s25 + $0x68] sm:$0xff] %vm4344_vm7, %v4331_v9 }
 0xe63   : > { %4357 = vst.msk [vmem:[%s8746_s25 + $0x60] sm:$0xff] %vm4344_vm7, %v4326_v18 }
 0xe91   : > { %v5481_v63 = vpop.f32.mrb[80].mxu1 }
 0xe92   : > { %v4341_v32 = vadd.f32 %v5481_v63, %v4603_v60  ;;  %v4335_v38 = vpop.f32.mrb[81].mxu1 }
 0xe93   : > { %v4336_v26 = vadd.f32 %v4603_v60, %v4335_v38 }
 0xe94   : > { %4360 = vst.msk [vmem:[%s8746_s25 + $0x78] sm:$0xff] %vm4344_vm7, %v4341_v32 }
 0xe95   : > { %4359 = vst.msk [vmem:[%s8746_s25 + $0x70] sm:$0xff] %vm4344_vm7, %v4336_v26 }
 0xe96 PF: > { %s22_s19 = sadd.s32 1, %s6532_s19  }
 0xe97   : > { %p19_p4 = scmp.ge.s32.totalorder %s22_s19, 4  }
 0xe99   :  { %21 = sbr.rel (!%p19_p4) target bundleno = 2 (0x2), region = 97 }

</bundles_post_ra>
